<compile_context>
chip_gen: v7x
topology: tpu7x:2x2x1
jax: 0.10.0
libtpu: 0.0.40
codegen_flags: <defaults>
</compile_context>

<pallas_src>
import random

import jax
import jax.numpy as jnp
from jax.experimental import pallas as pl
from jax.experimental.pallas import tpu as pltpu


# --------------------------- fused Seq2Seq kernel --------------------------- #
def seq2seq_kernel(tf_ref, src_ref, trg_ref,
                   eemb_ih_ref, ewhh_ref, wctx_ref,
                   dembp_ref, dwhh_ref, wout_ref, bout_ref,
                   out_ref, enc_scr, encp_scr):
    """Whole Seq2Seq forward in one kernel invocation (no grid).

    tf_ref      : (T, 1, 1) i32  teacher-forcing mask (decision of torch iter t)
    src_ref     : (S, B, 1) i32  source token ids
    trg_ref     : (T, B, 1) i32  target token ids
    eemb_ih_ref : (Vs, 4H)  f32  enc_emb @ W_ih + b_enc   (pre-fused, bias folded)
    ewhh_ref    : (H, 4H)   f32  encoder recurrent weights
    wctx_ref    : (H, 4H)   f32  decoder context -> gates projection
    dembp_ref   : (Vt, 4H)  f32  dec_emb @ W_emb + b_dec  (pre-fused, bias folded)
    dwhh_ref    : (H, 4H)   f32  decoder recurrent weights
    wout_ref    : (H, Vt), bout_ref : (1, Vt)
    out_ref     : (T, B, Vt)     logits; row 0 stays zero
    enc_scr     : (S, B, H)      encoder hidden states (VMEM only, never hit HBM)
    encp_scr    : (S, B, 4H)     enc @ W_ctx            (VMEM only)
    """
    S, B, H = enc_scr.shape
    T = out_ref.shape[0]
    Vs = eemb_ih_ref.shape[0]
    Vt = dembp_ref.shape[0]

    eemb_ih = eemb_ih_ref[...]
    ewhh = ewhh_ref[...]
    wctx = wctx_ref[...]

    def lstm_cell(gates, c):
        # Gate order i, f, g, o (PyTorch LSTM convention).
        i = jax.nn.sigmoid(gates[:, 0 * H:1 * H])
        f = jax.nn.sigmoid(gates[:, 1 * H:2 * H])
        g = jnp.tanh(gates[:, 2 * H:3 * H])
        o = jax.nn.sigmoid(gates[:, 3 * H:4 * H])
        c_new = f * c + i * g
        h_new = o * jnp.tanh(c_new)
        return h_new, c_new

    # ---------------- encoder recurrence (in-kernel loop) ----------------
    def enc_step(t, carry):
        h, c = carry
        # Embedding lookup + input projection fused as a one-hot MXU matmul
        # against the pre-projected table (bias already folded in).
        onehot = (jax.lax.broadcasted_iota(jnp.int32, (B, Vs), 1)
                  == src_ref[t]).astype(jnp.float32)                   # (B, Vs)
        gates = (jnp.dot(onehot, eemb_ih, preferred_element_type=jnp.float32)
                 + jnp.dot(h, ewhh, preferred_element_type=jnp.float32))
        h_new, c_new = lstm_cell(gates, c)
        enc_scr[t] = h_new                                             # (B, H)
        # enc @ W_ctx hoisted out of the decoder recurrence, computed here.
        encp_scr[t] = jnp.dot(h_new, wctx, preferred_element_type=jnp.float32)
        return h_new, c_new

    zeros = jnp.zeros((B, H), jnp.float32)
    h0, c0 = jax.lax.fori_loop(0, S, enc_step, (zeros, zeros), unroll=True)

    # ---------------- decoder loop (teacher forcing / greedy) ----------------
    out_ref[0] = jnp.zeros((B, Vt), jnp.float32)       # outputs[0] stays zero

    enc_all = enc_scr[...]                              # (S, B, H)
    encp_all = encp_scr[...]                            # (S, B, 4H)
    dembp = dembp_ref[...]
    dwhh = dwhh_ref[...]
    wout = wout_ref[...]
    bout = bout_ref[...]

    def dec_step(t, carry):
        h, c, best = carry                              # (B,H), (B,H), (B,1) i32

        # Token-level teacher-forcing select (no gate blending, no tf_gates).
        use_tf = jnp.logical_or(t == 0, tf_ref[t] > 0)              # (1, 1) bool
        tok = jnp.where(use_tf, trg_ref[t], best)                   # (B, 1) i32
        onehot = (jax.lax.broadcasted_iota(jnp.int32, (B, Vt), 1)
                  == tok).astype(jnp.float32)                       # (B, Vt)

        # Dot-product attention over source positions (previous hidden state).
        energy = jnp.sum(enc_all * h[None, :, :], axis=-1, keepdims=True)  # (S,B,1)
        energy = energy - jnp.max(energy, axis=0, keepdims=True)
        w = jnp.exp(energy)
        attn = w / jnp.sum(w, axis=0, keepdims=True)                # exact softmax
        ctx_gates = jnp.sum(attn * encp_all, axis=0)                # (B, 4H)

        # LSTM cell; biases are pre-folded into dembp.
        gates = (ctx_gates
                 + jnp.dot(onehot, dembp, preferred_element_type=jnp.float32)
                 + jnp.dot(h, dwhh, preferred_element_type=jnp.float32))
        h_new, c_new = lstm_cell(gates, c)

        logits = (jnp.dot(h_new, wout, preferred_element_type=jnp.float32)
                  + bout)                                           # (B, Vt)
        out_ref[t + 1] = logits

        # Greedy argmax (first occurrence, matches torch.argmax) for next input.
        ids = jax.lax.broadcasted_iota(jnp.int32, (B, Vt), 1)
        is_max = logits == jnp.max(logits, axis=1, keepdims=True)
        best_new = jnp.min(jnp.where(is_max, ids, Vt), axis=1, keepdims=True)
        return h_new, c_new, best_new

    best0 = jnp.zeros((B, 1), jnp.int32)
    jax.lax.fori_loop(0, T - 1, dec_step, (h0, c0, best0), unroll=True)


def seq2seq_pallas(params, tf_mask, src, trg):
    S, B = src.shape
    T = trg.shape[0]
    H = params["enc_W_hh"].shape[0]
    Vt = params["dec_W_out"].shape[1]
    return pl.pallas_call(
        seq2seq_kernel,
        out_shape=jax.ShapeDtypeStruct((T, B, Vt), jnp.float32),
        scratch_shapes=[pltpu.VMEM((S, B, H), jnp.float32),       # encoder states
                        pltpu.VMEM((S, B, 4 * H), jnp.float32)],  # enc @ W_ctx
    )(tf_mask.astype(jnp.int32)[:, None, None],
      src.astype(jnp.int32)[:, :, None],
      trg.astype(jnp.int32)[:, :, None],
      params["enc_emb_ih"], params["enc_W_hh"], params["dec_W_ctx"],
      params["dec_embp_b"], params["dec_W_hh"],
      params["dec_W_out"], params["dec_b_out"])


# ------------------------------ parameters ---------------------------------- #
def make_params(key, src_vocab, trg_vocab, emb_dim, hid_dim):
    ks = jax.random.split(key, 10)
    s = 0.1
    enc_emb = jax.random.normal(ks[0], (src_vocab, emb_dim), jnp.float32) * s
    enc_W_ih = jax.random.normal(ks[1], (emb_dim, 4 * hid_dim), jnp.float32) * s
    enc_W_hh = jax.random.normal(ks[2], (hid_dim, 4 * hid_dim), jnp.float32) * s
    enc_b = jax.random.normal(ks[3], (1, 4 * hid_dim), jnp.float32) * s
    dec_emb = jax.random.normal(ks[4], (trg_vocab, emb_dim), jnp.float32) * s
    dec_W_ctx = jax.random.normal(ks[5], (hid_dim, 4 * hid_dim), jnp.float32) * s
    dec_W_emb = jax.random.normal(ks[6], (emb_dim, 4 * hid_dim), jnp.float32) * s
    dec_W_hh = jax.random.normal(ks[7], (hid_dim, 4 * hid_dim), jnp.float32) * s
    dec_b = jax.random.normal(ks[8], (1, 4 * hid_dim), jnp.float32) * s
    dec_W_out = jax.random.normal(ks[9], (hid_dim, trg_vocab), jnp.float32) * s
    dec_b_out = jnp.zeros((1, trg_vocab), jnp.float32)
    return {
        # Exact parameter-only reparameterisations, done once at init (hoisted
        # out of the forward): onehot(tok) @ (emb @ W + b) == emb[tok] @ W + b.
        "enc_emb_ih": enc_emb @ enc_W_ih + enc_b,        # (Vs, 4H)
        "enc_W_hh": enc_W_hh,                            # (H, 4H)
        "dec_W_ctx": dec_W_ctx,                          # (H, 4H)
        "dec_embp_b": dec_emb @ dec_W_emb + dec_b,       # (Vt, 4H)
        "dec_W_hh": dec_W_hh,                            # (H, 4H)
        "dec_W_out": dec_W_out,                          # (H, Vt)
        "dec_b_out": dec_b_out,                          # (1, Vt)
    }


def make_tf_mask(max_len, teacher_forcing_ratio, seed=0):
    # mask[t] = teacher-forcing decision drawn during torch loop iteration t.
    rng = random.Random(seed)
    mask = [1] * max_len
    for t in range(1, max_len):
        mask[t] = 1 if rng.random() < teacher_forcing_ratio else 0
    return jnp.asarray(mask, dtype=jnp.int32)


@jax.jit
def seq2seq_forward(params, src, trg, tf_mask):
    # src: (S, B) int, trg: (T, B) int  ->  outputs: (T, B, trg_vocab) f32
    return seq2seq_pallas(params, tf_mask, src, trg)


if __name__ == "__main__":
    SRC_LEN, TRG_LEN, BATCH = 8, 8, 2
    SRC_VOCAB, TRG_VOCAB = 24, 32
    EMB_DIM, HID_DIM = 16, 32

    key = jax.random.PRNGKey(0)
    k_p, k_src, k_trg = jax.random.split(key, 3)

    params = make_params(k_p, SRC_VOCAB, TRG_VOCAB, EMB_DIM, HID_DIM)
    src = jax.random.randint(k_src, (SRC_LEN, BATCH), 0, SRC_VOCAB, jnp.int32)
    trg = jax.random.randint(k_trg, (TRG_LEN, BATCH), 0, TRG_VOCAB, jnp.int32)
    tf_mask = make_tf_mask(TRG_LEN, teacher_forcing_ratio=0.5, seed=0)

    out = seq2seq_forward(params, src, trg, tf_mask)
    out = jax.block_until_ready(out)

    assert out.shape == (TRG_LEN, BATCH, TRG_VOCAB)
    assert bool(jnp.all(out[0] == 0.0))
    assert bool(jnp.all(jnp.isfinite(out)))
    print("KERNEL_OK")
</pallas_src>

<mosaic_0001>
module attributes {stable_mosaic.version = 11 : i64} {
  func.func @seq2seq_kernel(%arg0: memref<8x1x1xi32, #tpu.memory_space<vmem>>, %arg1: memref<8x2x1xi32, #tpu.memory_space<vmem>>, %arg2: memref<8x2x1xi32, #tpu.memory_space<vmem>>, %arg3: memref<24x128xf32, #tpu.memory_space<vmem>>, %arg4: memref<32x128xf32, #tpu.memory_space<vmem>>, %arg5: memref<32x128xf32, #tpu.memory_space<vmem>>, %arg6: memref<32x128xf32, #tpu.memory_space<vmem>>, %arg7: memref<32x128xf32, #tpu.memory_space<vmem>>, %arg8: memref<32x32xf32, #tpu.memory_space<vmem>>, %arg9: memref<1x32xf32, #tpu.memory_space<vmem>>, %arg10: memref<8x2x32xf32, #tpu.memory_space<vmem>>, %arg11: memref<8x2x32xf32, #tpu.memory_space<vmem>>, %arg12: memref<8x2x128xf32, #tpu.memory_space<vmem>>) attributes {dimension_semantics = [], scalar_prefetch = 0 : i64, scratch_operands = 2 : i64, tpu.core_type = #tpu.core_type<tc>} {
    %c0 = arith.constant 0 : index
    %c0_0 = arith.constant 0 : index
    %0 = vector.load %arg3[%c0, %c0_0] : memref<24x128xf32, #tpu.memory_space<vmem>>, vector<24x128xf32>
    %c0_1 = arith.constant 0 : index
    %c0_2 = arith.constant 0 : index
    %1 = vector.load %arg4[%c0_1, %c0_2] : memref<32x128xf32, #tpu.memory_space<vmem>>, vector<32x128xf32>
    %c0_3 = arith.constant 0 : index
    %c0_4 = arith.constant 0 : index
    %2 = vector.load %arg5[%c0_3, %c0_4] : memref<32x128xf32, #tpu.memory_space<vmem>>, vector<32x128xf32>
    %cst = arith.constant 0.000000e+00 : f32
    %3 = vector.broadcast %cst : f32 to vector<2x32xf32>
    %c0_i32 = arith.constant 0 : i32
    %4 = tpu.iota {dimensions = array<i32: 1>} : vector<2x24xi32>
    %5 = arith.index_cast %c0_i32 : i32 to index
    %c0_5 = arith.constant 0 : index
    %c0_6 = arith.constant 0 : index
    %6 = vector.load %arg1[%5, %c0_5, %c0_6] : memref<8x2x1xi32, #tpu.memory_space<vmem>>, vector<1x2x1xi32>
    %7 = vector.shape_cast %6 : vector<1x2x1xi32> to vector<2x1xi32>
    %8 = vector.broadcast %7 : vector<2x1xi32> to vector<2x24xi32>
    %9 = arith.cmpi eq, %4, %8 : vector<2x24xi32>
    %10 = arith.extui %9 : vector<2x24xi1> to vector<2x24xi32>
    %11 = arith.sitofp %10 : vector<2x24xi32> to vector<2x24xf32>
    %cst_7 = arith.constant dense<0.000000e+00> : vector<2x128xf32>
    %12 = tpu.matmul %11, %0, %cst_7 {dimension_numbers = #tpu.dot_dimension_numbers<[1], [0], [0], [1], [0, 0, 1, 1], [], []>} : vector<2x24xf32>, vector<24x128xf32>, vector<2x128xf32> -> vector<2x128xf32>
    %cst_8 = arith.constant dense<0.000000e+00> : vector<2x128xf32>
    %13 = tpu.matmul %3, %1, %cst_8 {dimension_numbers = #tpu.dot_dimension_numbers<[1], [0], [0], [1], [0, 0, 1, 1], [], []>} : vector<2x32xf32>, vector<32x128xf32>, vector<2x128xf32> -> vector<2x128xf32>
    %14 = arith.addf %12, %13 : vector<2x128xf32>
    %15 = vector.extract_strided_slice %14 {offsets = [0, 0], sizes = [2, 32], strides = [1, 1]} : vector<2x128xf32> to vector<2x32xf32>
    %16 = arith.negf %15 : vector<2x32xf32>
    %17 = math.exp %16 : vector<2x32xf32>
    %cst_9 = arith.constant 1.000000e+00 : f32
    %18 = vector.broadcast %cst_9 : f32 to vector<2x32xf32>
    %19 = arith.addf %18, %17 : vector<2x32xf32>
    %20 = arith.divf %18, %19 : vector<2x32xf32>
    %21 = vector.extract_strided_slice %14 {offsets = [0, 32], sizes = [2, 32], strides = [1, 1]} : vector<2x128xf32> to vector<2x32xf32>
    %22 = arith.negf %21 : vector<2x32xf32>
    %23 = math.exp %22 : vector<2x32xf32>
    %cst_10 = arith.constant 1.000000e+00 : f32
    %24 = vector.broadcast %cst_10 : f32 to vector<2x32xf32>
    %25 = arith.addf %24, %23 : vector<2x32xf32>
    %26 = arith.divf %24, %25 : vector<2x32xf32>
    %27 = vector.extract_strided_slice %14 {offsets = [0, 64], sizes = [2, 32], strides = [1, 1]} : vector<2x128xf32> to vector<2x32xf32>
    %28 = math.tanh %27 : vector<2x32xf32>
    %29 = vector.extract_strided_slice %14 {offsets = [0, 96], sizes = [2, 32], strides = [1, 1]} : vector<2x128xf32> to vector<2x32xf32>
    %30 = arith.negf %29 : vector<2x32xf32>
    %31 = math.exp %30 : vector<2x32xf32>
    %cst_11 = arith.constant 1.000000e+00 : f32
    %32 = vector.broadcast %cst_11 : f32 to vector<2x32xf32>
    %33 = arith.addf %32, %31 : vector<2x32xf32>
    %34 = arith.divf %32, %33 : vector<2x32xf32>
    %35 = arith.mulf %26, %3 : vector<2x32xf32>
    %36 = arith.mulf %20, %28 : vector<2x32xf32>
    %37 = arith.addf %35, %36 : vector<2x32xf32>
    %38 = math.tanh %37 : vector<2x32xf32>
    %39 = arith.mulf %34, %38 : vector<2x32xf32>
    %40 = arith.index_cast %c0_i32 : i32 to index
    %c0_12 = arith.constant 0 : index
    %c0_13 = arith.constant 0 : index
    %41 = vector.load %arg11[%40, %c0_12, %c0_13] : memref<8x2x32xf32, #tpu.memory_space<vmem>>, vector<1x2x32xf32>
    %42 = vector.shape_cast %41 : vector<1x2x32xf32> to vector<2x32xf32>
    %43 = vector.shape_cast %39 : vector<2x32xf32> to vector<1x2x32xf32>
    tpu.vector_store %arg11[%40, %c0_12, %c0_13], %43 {strides = array<i32>} : memref<8x2x32xf32, #tpu.memory_space<vmem>>, vector<1x2x32xf32>,
    %cst_14 = arith.constant dense<0.000000e+00> : vector<2x128xf32>
    %44 = tpu.matmul %39, %2, %cst_14 {dimension_numbers = #tpu.dot_dimension_numbers<[1], [0], [0], [1], [0, 0, 1, 1], [], []>} : vector<2x32xf32>, vector<32x128xf32>, vector<2x128xf32> -> vector<2x128xf32>
    %45 = arith.index_cast %c0_i32 : i32 to index
    %c0_15 = arith.constant 0 : index
    %c0_16 = arith.constant 0 : index
    %46 = vector.load %arg12[%45, %c0_15, %c0_16] : memref<8x2x128xf32, #tpu.memory_space<vmem>>, vector<1x2x128xf32>
    %47 = vector.shape_cast %46 : vector<1x2x128xf32> to vector<2x128xf32>
    %48 = vector.shape_cast %44 : vector<2x128xf32> to vector<1x2x128xf32>
    tpu.vector_store %arg12[%45, %c0_15, %c0_16], %48 {strides = array<i32>} : memref<8x2x128xf32, #tpu.memory_space<vmem>>, vector<1x2x128xf32>,
    %c1_i32 = arith.constant 1 : i32
    %49 = tpu.iota {dimensions = array<i32: 1>} : vector<2x24xi32>
    %50 = arith.index_cast %c1_i32 : i32 to index
    %c0_17 = arith.constant 0 : index
    %c0_18 = arith.constant 0 : index
    %51 = vector.load %arg1[%50, %c0_17, %c0_18] : memref<8x2x1xi32, #tpu.memory_space<vmem>>, vector<1x2x1xi32>
    %52 = vector.shape_cast %51 : vector<1x2x1xi32> to vector<2x1xi32>
    %53 = vector.broadcast %52 : vector<2x1xi32> to vector<2x24xi32>
    %54 = arith.cmpi eq, %49, %53 : vector<2x24xi32>
    %55 = arith.extui %54 : vector<2x24xi1> to vector<2x24xi32>
    %56 = arith.sitofp %55 : vector<2x24xi32> to vector<2x24xf32>
    %cst_19 = arith.constant dense<0.000000e+00> : vector<2x128xf32>
    %57 = tpu.matmul %56, %0, %cst_19 {dimension_numbers = #tpu.dot_dimension_numbers<[1], [0], [0], [1], [0, 0, 1, 1], [], []>} : vector<2x24xf32>, vector<24x128xf32>, vector<2x128xf32> -> vector<2x128xf32>
    %cst_20 = arith.constant dense<0.000000e+00> : vector<2x128xf32>
    %58 = tpu.matmul %39, %1, %cst_20 {dimension_numbers = #tpu.dot_dimension_numbers<[1], [0], [0], [1], [0, 0, 1, 1], [], []>} : vector<2x32xf32>, vector<32x128xf32>, vector<2x128xf32> -> vector<2x128xf32>
    %59 = arith.addf %57, %58 : vector<2x128xf32>
    %60 = vector.extract_strided_slice %59 {offsets = [0, 0], sizes = [2, 32], strides = [1, 1]} : vector<2x128xf32> to vector<2x32xf32>
    %61 = arith.negf %60 : vector<2x32xf32>
    %62 = math.exp %61 : vector<2x32xf32>
    %cst_21 = arith.constant 1.000000e+00 : f32
    %63 = vector.broadcast %cst_21 : f32 to vector<2x32xf32>
    %64 = arith.addf %63, %62 : vector<2x32xf32>
    %65 = arith.divf %63, %64 : vector<2x32xf32>
    %66 = vector.extract_strided_slice %59 {offsets = [0, 32], sizes = [2, 32], strides = [1, 1]} : vector<2x128xf32> to vector<2x32xf32>
    %67 = arith.negf %66 : vector<2x32xf32>
    %68 = math.exp %67 : vector<2x32xf32>
    %cst_22 = arith.constant 1.000000e+00 : f32
    %69 = vector.broadcast %cst_22 : f32 to vector<2x32xf32>
    %70 = arith.addf %69, %68 : vector<2x32xf32>
    %71 = arith.divf %69, %70 : vector<2x32xf32>
    %72 = vector.extract_strided_slice %59 {offsets = [0, 64], sizes = [2, 32], strides = [1, 1]} : vector<2x128xf32> to vector<2x32xf32>
    %73 = math.tanh %72 : vector<2x32xf32>
    %74 = vector.extract_strided_slice %59 {offsets = [0, 96], sizes = [2, 32], strides = [1, 1]} : vector<2x128xf32> to vector<2x32xf32>
    %75 = arith.negf %74 : vector<2x32xf32>
    %76 = math.exp %75 : vector<2x32xf32>
    %cst_23 = arith.constant 1.000000e+00 : f32
    %77 = vector.broadcast %cst_23 : f32 to vector<2x32xf32>
    %78 = arith.addf %77, %76 : vector<2x32xf32>
    %79 = arith.divf %77, %78 : vector<2x32xf32>
    %80 = arith.mulf %71, %37 : vector<2x32xf32>
    %81 = arith.mulf %65, %73 : vector<2x32xf32>
    %82 = arith.addf %80, %81 : vector<2x32xf32>
    %83 = math.tanh %82 : vector<2x32xf32>
    %84 = arith.mulf %79, %83 : vector<2x32xf32>
    %85 = arith.index_cast %c1_i32 : i32 to index
    %c0_24 = arith.constant 0 : index
    %c0_25 = arith.constant 0 : index
    %86 = vector.load %arg11[%85, %c0_24, %c0_25] : memref<8x2x32xf32, #tpu.memory_space<vmem>>, vector<1x2x32xf32>
    %87 = vector.shape_cast %86 : vector<1x2x32xf32> to vector<2x32xf32>
    %88 = vector.shape_cast %84 : vector<2x32xf32> to vector<1x2x32xf32>
    tpu.vector_store %arg11[%85, %c0_24, %c0_25], %88 {strides = array<i32>} : memref<8x2x32xf32, #tpu.memory_space<vmem>>, vector<1x2x32xf32>,
    %cst_26 = arith.constant dense<0.000000e+00> : vector<2x128xf32>
    %89 = tpu.matmul %84, %2, %cst_26 {dimension_numbers = #tpu.dot_dimension_numbers<[1], [0], [0], [1], [0, 0, 1, 1], [], []>} : vector<2x32xf32>, vector<32x128xf32>, vector<2x128xf32> -> vector<2x128xf32>
    %90 = arith.index_cast %c1_i32 : i32 to index
    %c0_27 = arith.constant 0 : index
    %c0_28 = arith.constant 0 : index
    %91 = vector.load %arg12[%90, %c0_27, %c0_28] : memref<8x2x128xf32, #tpu.memory_space<vmem>>, vector<1x2x128xf32>
    %92 = vector.shape_cast %91 : vector<1x2x128xf32> to vector<2x128xf32>
    %93 = vector.shape_cast %89 : vector<2x128xf32> to vector<1x2x128xf32>
    tpu.vector_store %arg12[%90, %c0_27, %c0_28], %93 {strides = array<i32>} : memref<8x2x128xf32, #tpu.memory_space<vmem>>, vector<1x2x128xf32>,
    %c2_i32 = arith.constant 2 : i32
    %94 = tpu.iota {dimensions = array<i32: 1>} : vector<2x24xi32>
    %95 = arith.index_cast %c2_i32 : i32 to index
    %c0_29 = arith.constant 0 : index
    %c0_30 = arith.constant 0 : index
    %96 = vector.load %arg1[%95, %c0_29, %c0_30] : memref<8x2x1xi32, #tpu.memory_space<vmem>>, vector<1x2x1xi32>
    %97 = vector.shape_cast %96 : vector<1x2x1xi32> to vector<2x1xi32>
    %98 = vector.broadcast %97 : vector<2x1xi32> to vector<2x24xi32>
    %99 = arith.cmpi eq, %94, %98 : vector<2x24xi32>
    %100 = arith.extui %99 : vector<2x24xi1> to vector<2x24xi32>
    %101 = arith.sitofp %100 : vector<2x24xi32> to vector<2x24xf32>
    %cst_31 = arith.constant dense<0.000000e+00> : vector<2x128xf32>
    %102 = tpu.matmul %101, %0, %cst_31 {dimension_numbers = #tpu.dot_dimension_numbers<[1], [0], [0], [1], [0, 0, 1, 1], [], []>} : vector<2x24xf32>, vector<24x128xf32>, vector<2x128xf32> -> vector<2x128xf32>
    %cst_32 = arith.constant dense<0.000000e+00> : vector<2x128xf32>
    %103 = tpu.matmul %84, %1, %cst_32 {dimension_numbers = #tpu.dot_dimension_numbers<[1], [0], [0], [1], [0, 0, 1, 1], [], []>} : vector<2x32xf32>, vector<32x128xf32>, vector<2x128xf32> -> vector<2x128xf32>
    %104 = arith.addf %102, %103 : vector<2x128xf32>
    %105 = vector.extract_strided_slice %104 {offsets = [0, 0], sizes = [2, 32], strides = [1, 1]} : vector<2x128xf32> to vector<2x32xf32>
    %106 = arith.negf %105 : vector<2x32xf32>
    %107 = math.exp %106 : vector<2x32xf32>
    %cst_33 = arith.constant 1.000000e+00 : f32
    %108 = vector.broadcast %cst_33 : f32 to vector<2x32xf32>
    %109 = arith.addf %108, %107 : vector<2x32xf32>
    %110 = arith.divf %108, %109 : vector<2x32xf32>
    %111 = vector.extract_strided_slice %104 {offsets = [0, 32], sizes = [2, 32], strides = [1, 1]} : vector<2x128xf32> to vector<2x32xf32>
    %112 = arith.negf %111 : vector<2x32xf32>
    %113 = math.exp %112 : vector<2x32xf32>
    %cst_34 = arith.constant 1.000000e+00 : f32
    %114 = vector.broadcast %cst_34 : f32 to vector<2x32xf32>
    %115 = arith.addf %114, %113 : vector<2x32xf32>
    %116 = arith.divf %114, %115 : vector<2x32xf32>
    %117 = vector.extract_strided_slice %104 {offsets = [0, 64], sizes = [2, 32], strides = [1, 1]} : vector<2x128xf32> to vector<2x32xf32>
    %118 = math.tanh %117 : vector<2x32xf32>
    %119 = vector.extract_strided_slice %104 {offsets = [0, 96], sizes = [2, 32], strides = [1, 1]} : vector<2x128xf32> to vector<2x32xf32>
    %120 = arith.negf %119 : vector<2x32xf32>
    %121 = math.exp %120 : vector<2x32xf32>
    %cst_35 = arith.constant 1.000000e+00 : f32
    %122 = vector.broadcast %cst_35 : f32 to vector<2x32xf32>
    %123 = arith.addf %122, %121 : vector<2x32xf32>
    %124 = arith.divf %122, %123 : vector<2x32xf32>
    %125 = arith.mulf %116, %82 : vector<2x32xf32>
    %126 = arith.mulf %110, %118 : vector<2x32xf32>
    %127 = arith.addf %125, %126 : vector<2x32xf32>
    %128 = math.tanh %127 : vector<2x32xf32>
    %129 = arith.mulf %124, %128 : vector<2x32xf32>
    %130 = arith.index_cast %c2_i32 : i32 to index
    %c0_36 = arith.constant 0 : index
    %c0_37 = arith.constant 0 : index
    %131 = vector.load %arg11[%130, %c0_36, %c0_37] : memref<8x2x32xf32, #tpu.memory_space<vmem>>, vector<1x2x32xf32>
    %132 = vector.shape_cast %131 : vector<1x2x32xf32> to vector<2x32xf32>
    %133 = vector.shape_cast %129 : vector<2x32xf32> to vector<1x2x32xf32>
    tpu.vector_store %arg11[%130, %c0_36, %c0_37], %133 {strides = array<i32>} : memref<8x2x32xf32, #tpu.memory_space<vmem>>, vector<1x2x32xf32>,
    %cst_38 = arith.constant dense<0.000000e+00> : vector<2x128xf32>
    %134 = tpu.matmul %129, %2, %cst_38 {dimension_numbers = #tpu.dot_dimension_numbers<[1], [0], [0], [1], [0, 0, 1, 1], [], []>} : vector<2x32xf32>, vector<32x128xf32>, vector<2x128xf32> -> vector<2x128xf32>
    %135 = arith.index_cast %c2_i32 : i32 to index
    %c0_39 = arith.constant 0 : index
    %c0_40 = arith.constant 0 : index
    %136 = vector.load %arg12[%135, %c0_39, %c0_40] : memref<8x2x128xf32, #tpu.memory_space<vmem>>, vector<1x2x128xf32>
    %137 = vector.shape_cast %136 : vector<1x2x128xf32> to vector<2x128xf32>
    %138 = vector.shape_cast %134 : vector<2x128xf32> to vector<1x2x128xf32>
    tpu.vector_store %arg12[%135, %c0_39, %c0_40], %138 {strides = array<i32>} : memref<8x2x128xf32, #tpu.memory_space<vmem>>, vector<1x2x128xf32>,
    %c3_i32 = arith.constant 3 : i32
    %139 = tpu.iota {dimensions = array<i32: 1>} : vector<2x24xi32>
    %140 = arith.index_cast %c3_i32 : i32 to index
    %c0_41 = arith.constant 0 : index
    %c0_42 = arith.constant 0 : index
    %141 = vector.load %arg1[%140, %c0_41, %c0_42] : memref<8x2x1xi32, #tpu.memory_space<vmem>>, vector<1x2x1xi32>
    %142 = vector.shape_cast %141 : vector<1x2x1xi32> to vector<2x1xi32>
    %143 = vector.broadcast %142 : vector<2x1xi32> to vector<2x24xi32>
    %144 = arith.cmpi eq, %139, %143 : vector<2x24xi32>
    %145 = arith.extui %144 : vector<2x24xi1> to vector<2x24xi32>
    %146 = arith.sitofp %145 : vector<2x24xi32> to vector<2x24xf32>
    %cst_43 = arith.constant dense<0.000000e+00> : vector<2x128xf32>
    %147 = tpu.matmul %146, %0, %cst_43 {dimension_numbers = #tpu.dot_dimension_numbers<[1], [0], [0], [1], [0, 0, 1, 1], [], []>} : vector<2x24xf32>, vector<24x128xf32>, vector<2x128xf32> -> vector<2x128xf32>
    %cst_44 = arith.constant dense<0.000000e+00> : vector<2x128xf32>
    %148 = tpu.matmul %129, %1, %cst_44 {dimension_numbers = #tpu.dot_dimension_numbers<[1], [0], [0], [1], [0, 0, 1, 1], [], []>} : vector<2x32xf32>, vector<32x128xf32>, vector<2x128xf32> -> vector<2x128xf32>
    %149 = arith.addf %147, %148 : vector<2x128xf32>
    %150 = vector.extract_strided_slice %149 {offsets = [0, 0], sizes = [2, 32], strides = [1, 1]} : vector<2x128xf32> to vector<2x32xf32>
    %151 = arith.negf %150 : vector<2x32xf32>
    %152 = math.exp %151 : vector<2x32xf32>
    %cst_45 = arith.constant 1.000000e+00 : f32
    %153 = vector.broadcast %cst_45 : f32 to vector<2x32xf32>
    %154 = arith.addf %153, %152 : vector<2x32xf32>
    %155 = arith.divf %153, %154 : vector<2x32xf32>
    %156 = vector.extract_strided_slice %149 {offsets = [0, 32], sizes = [2, 32], strides = [1, 1]} : vector<2x128xf32> to vector<2x32xf32>
    %157 = arith.negf %156 : vector<2x32xf32>
    %158 = math.exp %157 : vector<2x32xf32>
    %cst_46 = arith.constant 1.000000e+00 : f32
    %159 = vector.broadcast %cst_46 : f32 to vector<2x32xf32>
    %160 = arith.addf %159, %158 : vector<2x32xf32>
    %161 = arith.divf %159, %160 : vector<2x32xf32>
    %162 = vector.extract_strided_slice %149 {offsets = [0, 64], sizes = [2, 32], strides = [1, 1]} : vector<2x128xf32> to vector<2x32xf32>
    %163 = math.tanh %162 : vector<2x32xf32>
    %164 = vector.extract_strided_slice %149 {offsets = [0, 96], sizes = [2, 32], strides = [1, 1]} : vector<2x128xf32> to vector<2x32xf32>
    %165 = arith.negf %164 : vector<2x32xf32>
    %166 = math.exp %165 : vector<2x32xf32>
    %cst_47 = arith.constant 1.000000e+00 : f32
    %167 = vector.broadcast %cst_47 : f32 to vector<2x32xf32>
    %168 = arith.addf %167, %166 : vector<2x32xf32>
    %169 = arith.divf %167, %168 : vector<2x32xf32>
    %170 = arith.mulf %161, %127 : vector<2x32xf32>
    %171 = arith.mulf %155, %163 : vector<2x32xf32>
    %172 = arith.addf %170, %171 : vector<2x32xf32>
    %173 = math.tanh %172 : vector<2x32xf32>
    %174 = arith.mulf %169, %173 : vector<2x32xf32>
    %175 = arith.index_cast %c3_i32 : i32 to index
    %c0_48 = arith.constant 0 : index
    %c0_49 = arith.constant 0 : index
    %176 = vector.load %arg11[%175, %c0_48, %c0_49] : memref<8x2x32xf32, #tpu.memory_space<vmem>>, vector<1x2x32xf32>
    %177 = vector.shape_cast %176 : vector<1x2x32xf32> to vector<2x32xf32>
    %178 = vector.shape_cast %174 : vector<2x32xf32> to vector<1x2x32xf32>
    tpu.vector_store %arg11[%175, %c0_48, %c0_49], %178 {strides = array<i32>} : memref<8x2x32xf32, #tpu.memory_space<vmem>>, vector<1x2x32xf32>,
    %cst_50 = arith.constant dense<0.000000e+00> : vector<2x128xf32>
    %179 = tpu.matmul %174, %2, %cst_50 {dimension_numbers = #tpu.dot_dimension_numbers<[1], [0], [0], [1], [0, 0, 1, 1], [], []>} : vector<2x32xf32>, vector<32x128xf32>, vector<2x128xf32> -> vector<2x128xf32>
    %180 = arith.index_cast %c3_i32 : i32 to index
    %c0_51 = arith.constant 0 : index
    %c0_52 = arith.constant 0 : index
    %181 = vector.load %arg12[%180, %c0_51, %c0_52] : memref<8x2x128xf32, #tpu.memory_space<vmem>>, vector<1x2x128xf32>
    %182 = vector.shape_cast %181 : vector<1x2x128xf32> to vector<2x128xf32>
    %183 = vector.shape_cast %179 : vector<2x128xf32> to vector<1x2x128xf32>
    tpu.vector_store %arg12[%180, %c0_51, %c0_52], %183 {strides = array<i32>} : memref<8x2x128xf32, #tpu.memory_space<vmem>>, vector<1x2x128xf32>,
    %c4_i32 = arith.constant 4 : i32
    %184 = tpu.iota {dimensions = array<i32: 1>} : vector<2x24xi32>
    %185 = arith.index_cast %c4_i32 : i32 to index
    %c0_53 = arith.constant 0 : index
    %c0_54 = arith.constant 0 : index
    %186 = vector.load %arg1[%185, %c0_53, %c0_54] : memref<8x2x1xi32, #tpu.memory_space<vmem>>, vector<1x2x1xi32>
    %187 = vector.shape_cast %186 : vector<1x2x1xi32> to vector<2x1xi32>
    %188 = vector.broadcast %187 : vector<2x1xi32> to vector<2x24xi32>
    %189 = arith.cmpi eq, %184, %188 : vector<2x24xi32>
    %190 = arith.extui %189 : vector<2x24xi1> to vector<2x24xi32>
    %191 = arith.sitofp %190 : vector<2x24xi32> to vector<2x24xf32>
    %cst_55 = arith.constant dense<0.000000e+00> : vector<2x128xf32>
    %192 = tpu.matmul %191, %0, %cst_55 {dimension_numbers = #tpu.dot_dimension_numbers<[1], [0], [0], [1], [0, 0, 1, 1], [], []>} : vector<2x24xf32>, vector<24x128xf32>, vector<2x128xf32> -> vector<2x128xf32>
    %cst_56 = arith.constant dense<0.000000e+00> : vector<2x128xf32>
    %193 = tpu.matmul %174, %1, %cst_56 {dimension_numbers = #tpu.dot_dimension_numbers<[1], [0], [0], [1], [0, 0, 1, 1], [], []>} : vector<2x32xf32>, vector<32x128xf32>, vector<2x128xf32> -> vector<2x128xf32>
    %194 = arith.addf %192, %193 : vector<2x128xf32>
    %195 = vector.extract_strided_slice %194 {offsets = [0, 0], sizes = [2, 32], strides = [1, 1]} : vector<2x128xf32> to vector<2x32xf32>
    %196 = arith.negf %195 : vector<2x32xf32>
    %197 = math.exp %196 : vector<2x32xf32>
    %cst_57 = arith.constant 1.000000e+00 : f32
    %198 = vector.broadcast %cst_57 : f32 to vector<2x32xf32>
    %199 = arith.addf %198, %197 : vector<2x32xf32>
    %200 = arith.divf %198, %199 : vector<2x32xf32>
    %201 = vector.extract_strided_slice %194 {offsets = [0, 32], sizes = [2, 32], strides = [1, 1]} : vector<2x128xf32> to vector<2x32xf32>
    %202 = arith.negf %201 : vector<2x32xf32>
    %203 = math.exp %202 : vector<2x32xf32>
    %cst_58 = arith.constant 1.000000e+00 : f32
    %204 = vector.broadcast %cst_58 : f32 to vector<2x32xf32>
    %205 = arith.addf %204, %203 : vector<2x32xf32>
    %206 = arith.divf %204, %205 : vector<2x32xf32>
    %207 = vector.extract_strided_slice %194 {offsets = [0, 64], sizes = [2, 32], strides = [1, 1]} : vector<2x128xf32> to vector<2x32xf32>
    %208 = math.tanh %207 : vector<2x32xf32>
    %209 = vector.extract_strided_slice %194 {offsets = [0, 96], sizes = [2, 32], strides = [1, 1]} : vector<2x128xf32> to vector<2x32xf32>
    %210 = arith.negf %209 : vector<2x32xf32>
    %211 = math.exp %210 : vector<2x32xf32>
    %cst_59 = arith.constant 1.000000e+00 : f32
    %212 = vector.broadcast %cst_59 : f32 to vector<2x32xf32>
    %213 = arith.addf %212, %211 : vector<2x32xf32>
    %214 = arith.divf %212, %213 : vector<2x32xf32>
    %215 = arith.mulf %206, %172 : vector<2x32xf32>
    %216 = arith.mulf %200, %208 : vector<2x32xf32>
    %217 = arith.addf %215, %216 : vector<2x32xf32>
    %218 = math.tanh %217 : vector<2x32xf32>
    %219 = arith.mulf %214, %218 : vector<2x32xf32>
    %220 = arith.index_cast %c4_i32 : i32 to index
    %c0_60 = arith.constant 0 : index
    %c0_61 = arith.constant 0 : index
    %221 = vector.load %arg11[%220, %c0_60, %c0_61] : memref<8x2x32xf32, #tpu.memory_space<vmem>>, vector<1x2x32xf32>
    %222 = vector.shape_cast %221 : vector<1x2x32xf32> to vector<2x32xf32>
    %223 = vector.shape_cast %219 : vector<2x32xf32> to vector<1x2x32xf32>
    tpu.vector_store %arg11[%220, %c0_60, %c0_61], %223 {strides = array<i32>} : memref<8x2x32xf32, #tpu.memory_space<vmem>>, vector<1x2x32xf32>,
    %cst_62 = arith.constant dense<0.000000e+00> : vector<2x128xf32>
    %224 = tpu.matmul %219, %2, %cst_62 {dimension_numbers = #tpu.dot_dimension_numbers<[1], [0], [0], [1], [0, 0, 1, 1], [], []>} : vector<2x32xf32>, vector<32x128xf32>, vector<2x128xf32> -> vector<2x128xf32>
    %225 = arith.index_cast %c4_i32 : i32 to index
    %c0_63 = arith.constant 0 : index
    %c0_64 = arith.constant 0 : index
    %226 = vector.load %arg12[%225, %c0_63, %c0_64] : memref<8x2x128xf32, #tpu.memory_space<vmem>>, vector<1x2x128xf32>
    %227 = vector.shape_cast %226 : vector<1x2x128xf32> to vector<2x128xf32>
    %228 = vector.shape_cast %224 : vector<2x128xf32> to vector<1x2x128xf32>
    tpu.vector_store %arg12[%225, %c0_63, %c0_64], %228 {strides = array<i32>} : memref<8x2x128xf32, #tpu.memory_space<vmem>>, vector<1x2x128xf32>,
    %c5_i32 = arith.constant 5 : i32
    %229 = tpu.iota {dimensions = array<i32: 1>} : vector<2x24xi32>
    %230 = arith.index_cast %c5_i32 : i32 to index
    %c0_65 = arith.constant 0 : index
    %c0_66 = arith.constant 0 : index
    %231 = vector.load %arg1[%230, %c0_65, %c0_66] : memref<8x2x1xi32, #tpu.memory_space<vmem>>, vector<1x2x1xi32>
    %232 = vector.shape_cast %231 : vector<1x2x1xi32> to vector<2x1xi32>
    %233 = vector.broadcast %232 : vector<2x1xi32> to vector<2x24xi32>
    %234 = arith.cmpi eq, %229, %233 : vector<2x24xi32>
    %235 = arith.extui %234 : vector<2x24xi1> to vector<2x24xi32>
    %236 = arith.sitofp %235 : vector<2x24xi32> to vector<2x24xf32>
    %cst_67 = arith.constant dense<0.000000e+00> : vector<2x128xf32>
    %237 = tpu.matmul %236, %0, %cst_67 {dimension_numbers = #tpu.dot_dimension_numbers<[1], [0], [0], [1], [0, 0, 1, 1], [], []>} : vector<2x24xf32>, vector<24x128xf32>, vector<2x128xf32> -> vector<2x128xf32>
    %cst_68 = arith.constant dense<0.000000e+00> : vector<2x128xf32>
    %238 = tpu.matmul %219, %1, %cst_68 {dimension_numbers = #tpu.dot_dimension_numbers<[1], [0], [0], [1], [0, 0, 1, 1], [], []>} : vector<2x32xf32>, vector<32x128xf32>, vector<2x128xf32> -> vector<2x128xf32>
    %239 = arith.addf %237, %238 : vector<2x128xf32>
    %240 = vector.extract_strided_slice %239 {offsets = [0, 0], sizes = [2, 32], strides = [1, 1]} : vector<2x128xf32> to vector<2x32xf32>
    %241 = arith.negf %240 : vector<2x32xf32>
    %242 = math.exp %241 : vector<2x32xf32>
    %cst_69 = arith.constant 1.000000e+00 : f32
    %243 = vector.broadcast %cst_69 : f32 to vector<2x32xf32>
    %244 = arith.addf %243, %242 : vector<2x32xf32>
    %245 = arith.divf %243, %244 : vector<2x32xf32>
    %246 = vector.extract_strided_slice %239 {offsets = [0, 32], sizes = [2, 32], strides = [1, 1]} : vector<2x128xf32> to vector<2x32xf32>
    %247 = arith.negf %246 : vector<2x32xf32>
    %248 = math.exp %247 : vector<2x32xf32>
    %cst_70 = arith.constant 1.000000e+00 : f32
    %249 = vector.broadcast %cst_70 : f32 to vector<2x32xf32>
    %250 = arith.addf %249, %248 : vector<2x32xf32>
    %251 = arith.divf %249, %250 : vector<2x32xf32>
    %252 = vector.extract_strided_slice %239 {offsets = [0, 64], sizes = [2, 32], strides = [1, 1]} : vector<2x128xf32> to vector<2x32xf32>
    %253 = math.tanh %252 : vector<2x32xf32>
    %254 = vector.extract_strided_slice %239 {offsets = [0, 96], sizes = [2, 32], strides = [1, 1]} : vector<2x128xf32> to vector<2x32xf32>
    %255 = arith.negf %254 : vector<2x32xf32>
    %256 = math.exp %255 : vector<2x32xf32>
    %cst_71 = arith.constant 1.000000e+00 : f32
    %257 = vector.broadcast %cst_71 : f32 to vector<2x32xf32>
    %258 = arith.addf %257, %256 : vector<2x32xf32>
    %259 = arith.divf %257, %258 : vector<2x32xf32>
    %260 = arith.mulf %251, %217 : vector<2x32xf32>
    %261 = arith.mulf %245, %253 : vector<2x32xf32>
    %262 = arith.addf %260, %261 : vector<2x32xf32>
    %263 = math.tanh %262 : vector<2x32xf32>
    %264 = arith.mulf %259, %263 : vector<2x32xf32>
    %265 = arith.index_cast %c5_i32 : i32 to index
    %c0_72 = arith.constant 0 : index
    %c0_73 = arith.constant 0 : index
    %266 = vector.load %arg11[%265, %c0_72, %c0_73] : memref<8x2x32xf32, #tpu.memory_space<vmem>>, vector<1x2x32xf32>
    %267 = vector.shape_cast %266 : vector<1x2x32xf32> to vector<2x32xf32>
    %268 = vector.shape_cast %264 : vector<2x32xf32> to vector<1x2x32xf32>
    tpu.vector_store %arg11[%265, %c0_72, %c0_73], %268 {strides = array<i32>} : memref<8x2x32xf32, #tpu.memory_space<vmem>>, vector<1x2x32xf32>,
    %cst_74 = arith.constant dense<0.000000e+00> : vector<2x128xf32>
    %269 = tpu.matmul %264, %2, %cst_74 {dimension_numbers = #tpu.dot_dimension_numbers<[1], [0], [0], [1], [0, 0, 1, 1], [], []>} : vector<2x32xf32>, vector<32x128xf32>, vector<2x128xf32> -> vector<2x128xf32>
    %270 = arith.index_cast %c5_i32 : i32 to index
    %c0_75 = arith.constant 0 : index
    %c0_76 = arith.constant 0 : index
    %271 = vector.load %arg12[%270, %c0_75, %c0_76] : memref<8x2x128xf32, #tpu.memory_space<vmem>>, vector<1x2x128xf32>
    %272 = vector.shape_cast %271 : vector<1x2x128xf32> to vector<2x128xf32>
    %273 = vector.shape_cast %269 : vector<2x128xf32> to vector<1x2x128xf32>
    tpu.vector_store %arg12[%270, %c0_75, %c0_76], %273 {strides = array<i32>} : memref<8x2x128xf32, #tpu.memory_space<vmem>>, vector<1x2x128xf32>,
    %c6_i32 = arith.constant 6 : i32
    %274 = tpu.iota {dimensions = array<i32: 1>} : vector<2x24xi32>
    %275 = arith.index_cast %c6_i32 : i32 to index
    %c0_77 = arith.constant 0 : index
    %c0_78 = arith.constant 0 : index
    %276 = vector.load %arg1[%275, %c0_77, %c0_78] : memref<8x2x1xi32, #tpu.memory_space<vmem>>, vector<1x2x1xi32>
    %277 = vector.shape_cast %276 : vector<1x2x1xi32> to vector<2x1xi32>
    %278 = vector.broadcast %277 : vector<2x1xi32> to vector<2x24xi32>
    %279 = arith.cmpi eq, %274, %278 : vector<2x24xi32>
    %280 = arith.extui %279 : vector<2x24xi1> to vector<2x24xi32>
    %281 = arith.sitofp %280 : vector<2x24xi32> to vector<2x24xf32>
    %cst_79 = arith.constant dense<0.000000e+00> : vector<2x128xf32>
    %282 = tpu.matmul %281, %0, %cst_79 {dimension_numbers = #tpu.dot_dimension_numbers<[1], [0], [0], [1], [0, 0, 1, 1], [], []>} : vector<2x24xf32>, vector<24x128xf32>, vector<2x128xf32> -> vector<2x128xf32>
    %cst_80 = arith.constant dense<0.000000e+00> : vector<2x128xf32>
    %283 = tpu.matmul %264, %1, %cst_80 {dimension_numbers = #tpu.dot_dimension_numbers<[1], [0], [0], [1], [0, 0, 1, 1], [], []>} : vector<2x32xf32>, vector<32x128xf32>, vector<2x128xf32> -> vector<2x128xf32>
    %284 = arith.addf %282, %283 : vector<2x128xf32>
    %285 = vector.extract_strided_slice %284 {offsets = [0, 0], sizes = [2, 32], strides = [1, 1]} : vector<2x128xf32> to vector<2x32xf32>
    %286 = arith.negf %285 : vector<2x32xf32>
    %287 = math.exp %286 : vector<2x32xf32>
    %cst_81 = arith.constant 1.000000e+00 : f32
    %288 = vector.broadcast %cst_81 : f32 to vector<2x32xf32>
    %289 = arith.addf %288, %287 : vector<2x32xf32>
    %290 = arith.divf %288, %289 : vector<2x32xf32>
    %291 = vector.extract_strided_slice %284 {offsets = [0, 32], sizes = [2, 32], strides = [1, 1]} : vector<2x128xf32> to vector<2x32xf32>
    %292 = arith.negf %291 : vector<2x32xf32>
    %293 = math.exp %292 : vector<2x32xf32>
    %cst_82 = arith.constant 1.000000e+00 : f32
    %294 = vector.broadcast %cst_82 : f32 to vector<2x32xf32>
    %295 = arith.addf %294, %293 : vector<2x32xf32>
    %296 = arith.divf %294, %295 : vector<2x32xf32>
    %297 = vector.extract_strided_slice %284 {offsets = [0, 64], sizes = [2, 32], strides = [1, 1]} : vector<2x128xf32> to vector<2x32xf32>
    %298 = math.tanh %297 : vector<2x32xf32>
    %299 = vector.extract_strided_slice %284 {offsets = [0, 96], sizes = [2, 32], strides = [1, 1]} : vector<2x128xf32> to vector<2x32xf32>
    %300 = arith.negf %299 : vector<2x32xf32>
    %301 = math.exp %300 : vector<2x32xf32>
    %cst_83 = arith.constant 1.000000e+00 : f32
    %302 = vector.broadcast %cst_83 : f32 to vector<2x32xf32>
    %303 = arith.addf %302, %301 : vector<2x32xf32>
    %304 = arith.divf %302, %303 : vector<2x32xf32>
    %305 = arith.mulf %296, %262 : vector<2x32xf32>
    %306 = arith.mulf %290, %298 : vector<2x32xf32>
    %307 = arith.addf %305, %306 : vector<2x32xf32>
    %308 = math.tanh %307 : vector<2x32xf32>
    %309 = arith.mulf %304, %308 : vector<2x32xf32>
    %310 = arith.index_cast %c6_i32 : i32 to index
    %c0_84 = arith.constant 0 : index
    %c0_85 = arith.constant 0 : index
    %311 = vector.load %arg11[%310, %c0_84, %c0_85] : memref<8x2x32xf32, #tpu.memory_space<vmem>>, vector<1x2x32xf32>
    %312 = vector.shape_cast %311 : vector<1x2x32xf32> to vector<2x32xf32>
    %313 = vector.shape_cast %309 : vector<2x32xf32> to vector<1x2x32xf32>
    tpu.vector_store %arg11[%310, %c0_84, %c0_85], %313 {strides = array<i32>} : memref<8x2x32xf32, #tpu.memory_space<vmem>>, vector<1x2x32xf32>,
    %cst_86 = arith.constant dense<0.000000e+00> : vector<2x128xf32>
    %314 = tpu.matmul %309, %2, %cst_86 {dimension_numbers = #tpu.dot_dimension_numbers<[1], [0], [0], [1], [0, 0, 1, 1], [], []>} : vector<2x32xf32>, vector<32x128xf32>, vector<2x128xf32> -> vector<2x128xf32>
    %315 = arith.index_cast %c6_i32 : i32 to index
    %c0_87 = arith.constant 0 : index
    %c0_88 = arith.constant 0 : index
    %316 = vector.load %arg12[%315, %c0_87, %c0_88] : memref<8x2x128xf32, #tpu.memory_space<vmem>>, vector<1x2x128xf32>
    %317 = vector.shape_cast %316 : vector<1x2x128xf32> to vector<2x128xf32>
    %318 = vector.shape_cast %314 : vector<2x128xf32> to vector<1x2x128xf32>
    tpu.vector_store %arg12[%315, %c0_87, %c0_88], %318 {strides = array<i32>} : memref<8x2x128xf32, #tpu.memory_space<vmem>>, vector<1x2x128xf32>,
    %c7_i32 = arith.constant 7 : i32
    %319 = tpu.iota {dimensions = array<i32: 1>} : vector<2x24xi32>
    %320 = arith.index_cast %c7_i32 : i32 to index
    %c0_89 = arith.constant 0 : index
    %c0_90 = arith.constant 0 : index
    %321 = vector.load %arg1[%320, %c0_89, %c0_90] : memref<8x2x1xi32, #tpu.memory_space<vmem>>, vector<1x2x1xi32>
    %322 = vector.shape_cast %321 : vector<1x2x1xi32> to vector<2x1xi32>
    %323 = vector.broadcast %322 : vector<2x1xi32> to vector<2x24xi32>
    %324 = arith.cmpi eq, %319, %323 : vector<2x24xi32>
    %325 = arith.extui %324 : vector<2x24xi1> to vector<2x24xi32>
    %326 = arith.sitofp %325 : vector<2x24xi32> to vector<2x24xf32>
    %cst_91 = arith.constant dense<0.000000e+00> : vector<2x128xf32>
    %327 = tpu.matmul %326, %0, %cst_91 {dimension_numbers = #tpu.dot_dimension_numbers<[1], [0], [0], [1], [0, 0, 1, 1], [], []>} : vector<2x24xf32>, vector<24x128xf32>, vector<2x128xf32> -> vector<2x128xf32>
    %cst_92 = arith.constant dense<0.000000e+00> : vector<2x128xf32>
    %328 = tpu.matmul %309, %1, %cst_92 {dimension_numbers = #tpu.dot_dimension_numbers<[1], [0], [0], [1], [0, 0, 1, 1], [], []>} : vector<2x32xf32>, vector<32x128xf32>, vector<2x128xf32> -> vector<2x128xf32>
    %329 = arith.addf %327, %328 : vector<2x128xf32>
    %330 = vector.extract_strided_slice %329 {offsets = [0, 0], sizes = [2, 32], strides = [1, 1]} : vector<2x128xf32> to vector<2x32xf32>
    %331 = arith.negf %330 : vector<2x32xf32>
    %332 = math.exp %331 : vector<2x32xf32>
    %cst_93 = arith.constant 1.000000e+00 : f32
    %333 = vector.broadcast %cst_93 : f32 to vector<2x32xf32>
    %334 = arith.addf %333, %332 : vector<2x32xf32>
    %335 = arith.divf %333, %334 : vector<2x32xf32>
    %336 = vector.extract_strided_slice %329 {offsets = [0, 32], sizes = [2, 32], strides = [1, 1]} : vector<2x128xf32> to vector<2x32xf32>
    %337 = arith.negf %336 : vector<2x32xf32>
    %338 = math.exp %337 : vector<2x32xf32>
    %cst_94 = arith.constant 1.000000e+00 : f32
    %339 = vector.broadcast %cst_94 : f32 to vector<2x32xf32>
    %340 = arith.addf %339, %338 : vector<2x32xf32>
    %341 = arith.divf %339, %340 : vector<2x32xf32>
    %342 = vector.extract_strided_slice %329 {offsets = [0, 64], sizes = [2, 32], strides = [1, 1]} : vector<2x128xf32> to vector<2x32xf32>
    %343 = math.tanh %342 : vector<2x32xf32>
    %344 = vector.extract_strided_slice %329 {offsets = [0, 96], sizes = [2, 32], strides = [1, 1]} : vector<2x128xf32> to vector<2x32xf32>
    %345 = arith.negf %344 : vector<2x32xf32>
    %346 = math.exp %345 : vector<2x32xf32>
    %cst_95 = arith.constant 1.000000e+00 : f32
    %347 = vector.broadcast %cst_95 : f32 to vector<2x32xf32>
    %348 = arith.addf %347, %346 : vector<2x32xf32>
    %349 = arith.divf %347, %348 : vector<2x32xf32>
    %350 = arith.mulf %341, %307 : vector<2x32xf32>
    %351 = arith.mulf %335, %343 : vector<2x32xf32>
    %352 = arith.addf %350, %351 : vector<2x32xf32>
    %353 = math.tanh %352 : vector<2x32xf32>
    %354 = arith.mulf %349, %353 : vector<2x32xf32>
    %355 = arith.index_cast %c7_i32 : i32 to index
    %c0_96 = arith.constant 0 : index
    %c0_97 = arith.constant 0 : index
    %356 = vector.load %arg11[%355, %c0_96, %c0_97] : memref<8x2x32xf32, #tpu.memory_space<vmem>>, vector<1x2x32xf32>
    %357 = vector.shape_cast %356 : vector<1x2x32xf32> to vector<2x32xf32>
    %358 = vector.shape_cast %354 : vector<2x32xf32> to vector<1x2x32xf32>
    tpu.vector_store %arg11[%355, %c0_96, %c0_97], %358 {strides = array<i32>} : memref<8x2x32xf32, #tpu.memory_space<vmem>>, vector<1x2x32xf32>,
    %cst_98 = arith.constant dense<0.000000e+00> : vector<2x128xf32>
    %359 = tpu.matmul %354, %2, %cst_98 {dimension_numbers = #tpu.dot_dimension_numbers<[1], [0], [0], [1], [0, 0, 1, 1], [], []>} : vector<2x32xf32>, vector<32x128xf32>, vector<2x128xf32> -> vector<2x128xf32>
    %360 = arith.index_cast %c7_i32 : i32 to index
    %c0_99 = arith.constant 0 : index
    %c0_100 = arith.constant 0 : index
    %361 = vector.load %arg12[%360, %c0_99, %c0_100] : memref<8x2x128xf32, #tpu.memory_space<vmem>>, vector<1x2x128xf32>
    %362 = vector.shape_cast %361 : vector<1x2x128xf32> to vector<2x128xf32>
    %363 = vector.shape_cast %359 : vector<2x128xf32> to vector<1x2x128xf32>
    tpu.vector_store %arg12[%360, %c0_99, %c0_100], %363 {strides = array<i32>} : memref<8x2x128xf32, #tpu.memory_space<vmem>>, vector<1x2x128xf32>,
    %c8_i32 = arith.constant 8 : i32
    %cst_101 = arith.constant 0.000000e+00 : f32
    %364 = vector.broadcast %cst_101 : f32 to vector<2x32xf32>
    %c0_102 = arith.constant 0 : index
    %c0_103 = arith.constant 0 : index
    %c0_104 = arith.constant 0 : index
    %365 = vector.load %arg10[%c0_102, %c0_103, %c0_104] : memref<8x2x32xf32, #tpu.memory_space<vmem>>, vector<1x2x32xf32>
    %366 = vector.shape_cast %365 : vector<1x2x32xf32> to vector<2x32xf32>
    %367 = vector.shape_cast %364 : vector<2x32xf32> to vector<1x2x32xf32>
    tpu.vector_store %arg10[%c0_102, %c0_103, %c0_104], %367 {strides = array<i32>} : memref<8x2x32xf32, #tpu.memory_space<vmem>>, vector<1x2x32xf32>,
    %c0_105 = arith.constant 0 : index
    %c0_106 = arith.constant 0 : index
    %c0_107 = arith.constant 0 : index
    %368 = vector.load %arg11[%c0_105, %c0_106, %c0_107] : memref<8x2x32xf32, #tpu.memory_space<vmem>>, vector<8x2x32xf32>
    %c0_108 = arith.constant 0 : index
    %c0_109 = arith.constant 0 : index
    %c0_110 = arith.constant 0 : index
    %369 = vector.load %arg12[%c0_108, %c0_109, %c0_110] : memref<8x2x128xf32, #tpu.memory_space<vmem>>, vector<8x2x128xf32>
    %c0_111 = arith.constant 0 : index
    %c0_112 = arith.constant 0 : index
    %370 = vector.load %arg6[%c0_111, %c0_112] : memref<32x128xf32, #tpu.memory_space<vmem>>, vector<32x128xf32>
    %c0_113 = arith.constant 0 : index
    %c0_114 = arith.constant 0 : index
    %371 = vector.load %arg7[%c0_113, %c0_114] : memref<32x128xf32, #tpu.memory_space<vmem>>, vector<32x128xf32>
    %c0_115 = arith.constant 0 : index
    %c0_116 = arith.constant 0 : index
    %372 = vector.load %arg8[%c0_115, %c0_116] : memref<32x32xf32, #tpu.memory_space<vmem>>, vector<32x32xf32>
    %c0_117 = arith.constant 0 : index
    %c0_118 = arith.constant 0 : index
    %373 = vector.load %arg9[%c0_117, %c0_118] : memref<1x32xf32, #tpu.memory_space<vmem>>, vector<1x32xf32>
    %c0_i32_119 = arith.constant 0 : i32
    %374 = vector.broadcast %c0_i32_119 : i32 to vector<2x1xi32>
    %c0_i32_120 = arith.constant 0 : i32
    %c0_i32_121 = arith.constant 0 : i32
    %375 = arith.cmpi eq, %c0_i32_120, %c0_i32_121 : i32
    %376 = arith.index_cast %c0_i32_120 : i32 to index
    %c0_122 = arith.constant 0 : index
    %c0_123 = arith.constant 0 : index
    %377 = vector.load %arg0[%376, %c0_122, %c0_123] : memref<8x1x1xi32, #tpu.memory_space<vmem>>, vector<1x1x1xi32>
    %378 = vector.shape_cast %377 : vector<1x1x1xi32> to vector<1x1xi32>
    %c0_i32_124 = arith.constant 0 : i32
    %379 = vector.broadcast %c0_i32_124 : i32 to vector<1x1xi32>
    %380 = arith.cmpi sgt, %378, %379 : vector<1x1xi32>
    %381 = vector.broadcast %375 : i1 to vector<1x1xi1>
    %382 = arith.ori %381, %380 : vector<1x1xi1>
    %383 = arith.index_cast %c0_i32_120 : i32 to index
    %c0_125 = arith.constant 0 : index
    %c0_126 = arith.constant 0 : index
    %384 = vector.load %arg2[%383, %c0_125, %c0_126] : memref<8x2x1xi32, #tpu.memory_space<vmem>>, vector<1x2x1xi32>
    %385 = vector.shape_cast %384 : vector<1x2x1xi32> to vector<2x1xi32>
    %386 = vector.shape_cast %382 : vector<1x1xi1> to vector<1x1xi1>
    %387 = vector.broadcast %386 : vector<1x1xi1> to vector<2x1xi1>
    %388 = arith.select %387, %385, %374 : vector<2x1xi1>, vector<2x1xi32>
    %389 = tpu.iota {dimensions = array<i32: 1>} : vector<2x32xi32>
    %390 = vector.broadcast %388 : vector<2x1xi32> to vector<2x32xi32>
    %391 = arith.cmpi eq, %389, %390 : vector<2x32xi32>
    %392 = arith.extui %391 : vector<2x32xi1> to vector<2x32xi32>
    %393 = arith.sitofp %392 : vector<2x32xi32> to vector<2x32xf32>
    %394 = vector.shape_cast %354 : vector<2x32xf32> to vector<1x2x32xf32>
    %395 = vector.broadcast %394 : vector<1x2x32xf32> to vector<8x2x32xf32>
    %396 = arith.mulf %368, %395 : vector<8x2x32xf32>
    %cst_127 = arith.constant dense<0.000000e+00> : vector<8x2xf32>
    %397 = vector.multi_reduction <add>, %396, %cst_127 [2] : vector<8x2x32xf32> to vector<8x2xf32>
    %398 = vector.shape_cast %397 : vector<8x2xf32> to vector<8x2x1xf32>
    %cst_128 = arith.constant dense<0xFF800000> : vector<2x1xf32>
    %399 = vector.multi_reduction <maximumf>, %398, %cst_128 [0] : vector<8x2x1xf32> to vector<2x1xf32>
    %400 = vector.shape_cast %399 : vector<2x1xf32> to vector<1x2x1xf32>
    %401 = vector.broadcast %400 : vector<1x2x1xf32> to vector<8x2x1xf32>
    %402 = arith.subf %398, %401 : vector<8x2x1xf32>
    %403 = math.exp %402 : vector<8x2x1xf32>
    %cst_129 = arith.constant dense<0.000000e+00> : vector<2x1xf32>
    %404 = vector.multi_reduction <add>, %403, %cst_129 [0] : vector<8x2x1xf32> to vector<2x1xf32>
    %405 = vector.shape_cast %404 : vector<2x1xf32> to vector<1x2x1xf32>
    %406 = vector.broadcast %405 : vector<1x2x1xf32> to vector<8x2x1xf32>
    %407 = arith.divf %403, %406 : vector<8x2x1xf32>
    %408 = vector.broadcast %407 : vector<8x2x1xf32> to vector<8x2x128xf32>
    %409 = arith.mulf %408, %369 : vector<8x2x128xf32>
    %cst_130 = arith.constant dense<0.000000e+00> : vector<2x128xf32>
    %410 = vector.multi_reduction <add>, %409, %cst_130 [0] : vector<8x2x128xf32> to vector<2x128xf32>
    %cst_131 = arith.constant dense<0.000000e+00> : vector<2x128xf32>
    %411 = tpu.matmul %393, %370, %cst_131 {dimension_numbers = #tpu.dot_dimension_numbers<[1], [0], [0], [1], [0, 0, 1, 1], [], []>} : vector<2x32xf32>, vector<32x128xf32>, vector<2x128xf32> -> vector<2x128xf32>
    %412 = arith.addf %410, %411 : vector<2x128xf32>
    %cst_132 = arith.constant dense<0.000000e+00> : vector<2x128xf32>
    %413 = tpu.matmul %354, %371, %cst_132 {dimension_numbers = #tpu.dot_dimension_numbers<[1], [0], [0], [1], [0, 0, 1, 1], [], []>} : vector<2x32xf32>, vector<32x128xf32>, vector<2x128xf32> -> vector<2x128xf32>
    %414 = arith.addf %412, %413 : vector<2x128xf32>
    %415 = vector.extract_strided_slice %414 {offsets = [0, 0], sizes = [2, 32], strides = [1, 1]} : vector<2x128xf32> to vector<2x32xf32>
    %416 = arith.negf %415 : vector<2x32xf32>
    %417 = math.exp %416 : vector<2x32xf32>
    %cst_133 = arith.constant 1.000000e+00 : f32
    %418 = vector.broadcast %cst_133 : f32 to vector<2x32xf32>
    %419 = arith.addf %418, %417 : vector<2x32xf32>
    %420 = arith.divf %418, %419 : vector<2x32xf32>
    %421 = vector.extract_strided_slice %414 {offsets = [0, 32], sizes = [2, 32], strides = [1, 1]} : vector<2x128xf32> to vector<2x32xf32>
    %422 = arith.negf %421 : vector<2x32xf32>
    %423 = math.exp %422 : vector<2x32xf32>
    %cst_134 = arith.constant 1.000000e+00 : f32
    %424 = vector.broadcast %cst_134 : f32 to vector<2x32xf32>
    %425 = arith.addf %424, %423 : vector<2x32xf32>
    %426 = arith.divf %424, %425 : vector<2x32xf32>
    %427 = vector.extract_strided_slice %414 {offsets = [0, 64], sizes = [2, 32], strides = [1, 1]} : vector<2x128xf32> to vector<2x32xf32>
    %428 = math.tanh %427 : vector<2x32xf32>
    %429 = vector.extract_strided_slice %414 {offsets = [0, 96], sizes = [2, 32], strides = [1, 1]} : vector<2x128xf32> to vector<2x32xf32>
    %430 = arith.negf %429 : vector<2x32xf32>
    %431 = math.exp %430 : vector<2x32xf32>
    %cst_135 = arith.constant 1.000000e+00 : f32
    %432 = vector.broadcast %cst_135 : f32 to vector<2x32xf32>
    %433 = arith.addf %432, %431 : vector<2x32xf32>
    %434 = arith.divf %432, %433 : vector<2x32xf32>
    %435 = arith.mulf %426, %352 : vector<2x32xf32>
    %436 = arith.mulf %420, %428 : vector<2x32xf32>
    %437 = arith.addf %435, %436 : vector<2x32xf32>
    %438 = math.tanh %437 : vector<2x32xf32>
    %439 = arith.mulf %434, %438 : vector<2x32xf32>
    %cst_136 = arith.constant dense<0.000000e+00> : vector<2x32xf32>
    %440 = tpu.matmul %439, %372, %cst_136 {dimension_numbers = #tpu.dot_dimension_numbers<[1], [0], [0], [1], [0, 0, 1, 1], [], []>} : vector<2x32xf32>, vector<32x32xf32>, vector<2x32xf32> -> vector<2x32xf32>
    %441 = vector.broadcast %373 : vector<1x32xf32> to vector<2x32xf32>
    %442 = arith.addf %440, %441 : vector<2x32xf32>
    %c1_i32_137 = arith.constant 1 : i32
    %443 = arith.addi %c0_i32_120, %c1_i32_137 : i32
    %444 = arith.index_cast %443 : i32 to index
    %c0_138 = arith.constant 0 : index
    %c0_139 = arith.constant 0 : index
    %445 = vector.load %arg10[%444, %c0_138, %c0_139] : memref<8x2x32xf32, #tpu.memory_space<vmem>>, vector<1x2x32xf32>
    %446 = vector.shape_cast %445 : vector<1x2x32xf32> to vector<2x32xf32>
    %447 = vector.shape_cast %442 : vector<2x32xf32> to vector<1x2x32xf32>
    tpu.vector_store %arg10[%444, %c0_138, %c0_139], %447 {strides = array<i32>} : memref<8x2x32xf32, #tpu.memory_space<vmem>>, vector<1x2x32xf32>,
    %448 = tpu.iota {dimensions = array<i32: 1>} : vector<2x32xi32>
    %cst_140 = arith.constant dense<0xFF800000> : vector<2xf32>
    %449 = vector.multi_reduction <maximumf>, %442, %cst_140 [1] : vector<2x32xf32> to vector<2xf32>
    %450 = vector.shape_cast %449 : vector<2xf32> to vector<2x1xf32>
    %451 = vector.broadcast %450 : vector<2x1xf32> to vector<2x32xf32>
    %452 = arith.cmpf oeq, %442, %451 : vector<2x32xf32>
    %c32_i32 = arith.constant 32 : i32
    %453 = vector.broadcast %c32_i32 : i32 to vector<2x32xi32>
    %454 = arith.select %452, %448, %453 : vector<2x32xi1>, vector<2x32xi32>
    %cst_141 = arith.constant dense<2147483647> : vector<2xi32>
    %455 = vector.multi_reduction <minsi>, %454, %cst_141 [1] : vector<2x32xi32> to vector<2xi32>
    %456 = vector.shape_cast %455 : vector<2xi32> to vector<2x1xi32>
    %c1_i32_142 = arith.constant 1 : i32
    %c0_i32_143 = arith.constant 0 : i32
    %457 = arith.cmpi eq, %c1_i32_142, %c0_i32_143 : i32
    %458 = arith.index_cast %c1_i32_142 : i32 to index
    %c0_144 = arith.constant 0 : index
    %c0_145 = arith.constant 0 : index
    %459 = vector.load %arg0[%458, %c0_144, %c0_145] : memref<8x1x1xi32, #tpu.memory_space<vmem>>, vector<1x1x1xi32>
    %460 = vector.shape_cast %459 : vector<1x1x1xi32> to vector<1x1xi32>
    %c0_i32_146 = arith.constant 0 : i32
    %461 = vector.broadcast %c0_i32_146 : i32 to vector<1x1xi32>
    %462 = arith.cmpi sgt, %460, %461 : vector<1x1xi32>
    %463 = vector.broadcast %457 : i1 to vector<1x1xi1>
    %464 = arith.ori %463, %462 : vector<1x1xi1>
    %465 = arith.index_cast %c1_i32_142 : i32 to index
    %c0_147 = arith.constant 0 : index
    %c0_148 = arith.constant 0 : index
    %466 = vector.load %arg2[%465, %c0_147, %c0_148] : memref<8x2x1xi32, #tpu.memory_space<vmem>>, vector<1x2x1xi32>
    %467 = vector.shape_cast %466 : vector<1x2x1xi32> to vector<2x1xi32>
    %468 = vector.shape_cast %464 : vector<1x1xi1> to vector<1x1xi1>
    %469 = vector.broadcast %468 : vector<1x1xi1> to vector<2x1xi1>
    %470 = arith.select %469, %467, %456 : vector<2x1xi1>, vector<2x1xi32>
    %471 = tpu.iota {dimensions = array<i32: 1>} : vector<2x32xi32>
    %472 = vector.broadcast %470 : vector<2x1xi32> to vector<2x32xi32>
    %473 = arith.cmpi eq, %471, %472 : vector<2x32xi32>
    %474 = arith.extui %473 : vector<2x32xi1> to vector<2x32xi32>
    %475 = arith.sitofp %474 : vector<2x32xi32> to vector<2x32xf32>
    %476 = vector.shape_cast %439 : vector<2x32xf32> to vector<1x2x32xf32>
    %477 = vector.broadcast %476 : vector<1x2x32xf32> to vector<8x2x32xf32>
    %478 = arith.mulf %368, %477 : vector<8x2x32xf32>
    %cst_149 = arith.constant dense<0.000000e+00> : vector<8x2xf32>
    %479 = vector.multi_reduction <add>, %478, %cst_149 [2] : vector<8x2x32xf32> to vector<8x2xf32>
    %480 = vector.shape_cast %479 : vector<8x2xf32> to vector<8x2x1xf32>
    %cst_150 = arith.constant dense<0xFF800000> : vector<2x1xf32>
    %481 = vector.multi_reduction <maximumf>, %480, %cst_150 [0] : vector<8x2x1xf32> to vector<2x1xf32>
    %482 = vector.shape_cast %481 : vector<2x1xf32> to vector<1x2x1xf32>
    %483 = vector.broadcast %482 : vector<1x2x1xf32> to vector<8x2x1xf32>
    %484 = arith.subf %480, %483 : vector<8x2x1xf32>
    %485 = math.exp %484 : vector<8x2x1xf32>
    %cst_151 = arith.constant dense<0.000000e+00> : vector<2x1xf32>
    %486 = vector.multi_reduction <add>, %485, %cst_151 [0] : vector<8x2x1xf32> to vector<2x1xf32>
    %487 = vector.shape_cast %486 : vector<2x1xf32> to vector<1x2x1xf32>
    %488 = vector.broadcast %487 : vector<1x2x1xf32> to vector<8x2x1xf32>
    %489 = arith.divf %485, %488 : vector<8x2x1xf32>
    %490 = vector.broadcast %489 : vector<8x2x1xf32> to vector<8x2x128xf32>
    %491 = arith.mulf %490, %369 : vector<8x2x128xf32>
    %cst_152 = arith.constant dense<0.000000e+00> : vector<2x128xf32>
    %492 = vector.multi_reduction <add>, %491, %cst_152 [0] : vector<8x2x128xf32> to vector<2x128xf32>
    %cst_153 = arith.constant dense<0.000000e+00> : vector<2x128xf32>
    %493 = tpu.matmul %475, %370, %cst_153 {dimension_numbers = #tpu.dot_dimension_numbers<[1], [0], [0], [1], [0, 0, 1, 1], [], []>} : vector<2x32xf32>, vector<32x128xf32>, vector<2x128xf32> -> vector<2x128xf32>
    %494 = arith.addf %492, %493 : vector<2x128xf32>
    %cst_154 = arith.constant dense<0.000000e+00> : vector<2x128xf32>
    %495 = tpu.matmul %439, %371, %cst_154 {dimension_numbers = #tpu.dot_dimension_numbers<[1], [0], [0], [1], [0, 0, 1, 1], [], []>} : vector<2x32xf32>, vector<32x128xf32>, vector<2x128xf32> -> vector<2x128xf32>
    %496 = arith.addf %494, %495 : vector<2x128xf32>
    %497 = vector.extract_strided_slice %496 {offsets = [0, 0], sizes = [2, 32], strides = [1, 1]} : vector<2x128xf32> to vector<2x32xf32>
    %498 = arith.negf %497 : vector<2x32xf32>
    %499 = math.exp %498 : vector<2x32xf32>
    %cst_155 = arith.constant 1.000000e+00 : f32
    %500 = vector.broadcast %cst_155 : f32 to vector<2x32xf32>
    %501 = arith.addf %500, %499 : vector<2x32xf32>
    %502 = arith.divf %500, %501 : vector<2x32xf32>
    %503 = vector.extract_strided_slice %496 {offsets = [0, 32], sizes = [2, 32], strides = [1, 1]} : vector<2x128xf32> to vector<2x32xf32>
    %504 = arith.negf %503 : vector<2x32xf32>
    %505 = math.exp %504 : vector<2x32xf32>
    %cst_156 = arith.constant 1.000000e+00 : f32
    %506 = vector.broadcast %cst_156 : f32 to vector<2x32xf32>
    %507 = arith.addf %506, %505 : vector<2x32xf32>
    %508 = arith.divf %506, %507 : vector<2x32xf32>
    %509 = vector.extract_strided_slice %496 {offsets = [0, 64], sizes = [2, 32], strides = [1, 1]} : vector<2x128xf32> to vector<2x32xf32>
    %510 = math.tanh %509 : vector<2x32xf32>
    %511 = vector.extract_strided_slice %496 {offsets = [0, 96], sizes = [2, 32], strides = [1, 1]} : vector<2x128xf32> to vector<2x32xf32>
    %512 = arith.negf %511 : vector<2x32xf32>
    %513 = math.exp %512 : vector<2x32xf32>
    %cst_157 = arith.constant 1.000000e+00 : f32
    %514 = vector.broadcast %cst_157 : f32 to vector<2x32xf32>
    %515 = arith.addf %514, %513 : vector<2x32xf32>
    %516 = arith.divf %514, %515 : vector<2x32xf32>
    %517 = arith.mulf %508, %437 : vector<2x32xf32>
    %518 = arith.mulf %502, %510 : vector<2x32xf32>
    %519 = arith.addf %517, %518 : vector<2x32xf32>
    %520 = math.tanh %519 : vector<2x32xf32>
    %521 = arith.mulf %516, %520 : vector<2x32xf32>
    %cst_158 = arith.constant dense<0.000000e+00> : vector<2x32xf32>
    %522 = tpu.matmul %521, %372, %cst_158 {dimension_numbers = #tpu.dot_dimension_numbers<[1], [0], [0], [1], [0, 0, 1, 1], [], []>} : vector<2x32xf32>, vector<32x32xf32>, vector<2x32xf32> -> vector<2x32xf32>
    %523 = vector.broadcast %373 : vector<1x32xf32> to vector<2x32xf32>
    %524 = arith.addf %522, %523 : vector<2x32xf32>
    %c1_i32_159 = arith.constant 1 : i32
    %525 = arith.addi %c1_i32_142, %c1_i32_159 : i32
    %526 = arith.index_cast %525 : i32 to index
    %c0_160 = arith.constant 0 : index
    %c0_161 = arith.constant 0 : index
    %527 = vector.load %arg10[%526, %c0_160, %c0_161] : memref<8x2x32xf32, #tpu.memory_space<vmem>>, vector<1x2x32xf32>
    %528 = vector.shape_cast %527 : vector<1x2x32xf32> to vector<2x32xf32>
    %529 = vector.shape_cast %524 : vector<2x32xf32> to vector<1x2x32xf32>
    tpu.vector_store %arg10[%526, %c0_160, %c0_161], %529 {strides = array<i32>} : memref<8x2x32xf32, #tpu.memory_space<vmem>>, vector<1x2x32xf32>,
    %530 = tpu.iota {dimensions = array<i32: 1>} : vector<2x32xi32>
    %cst_162 = arith.constant dense<0xFF800000> : vector<2xf32>
    %531 = vector.multi_reduction <maximumf>, %524, %cst_162 [1] : vector<2x32xf32> to vector<2xf32>
    %532 = vector.shape_cast %531 : vector<2xf32> to vector<2x1xf32>
    %533 = vector.broadcast %532 : vector<2x1xf32> to vector<2x32xf32>
    %534 = arith.cmpf oeq, %524, %533 : vector<2x32xf32>
    %c32_i32_163 = arith.constant 32 : i32
    %535 = vector.broadcast %c32_i32_163 : i32 to vector<2x32xi32>
    %536 = arith.select %534, %530, %535 : vector<2x32xi1>, vector<2x32xi32>
    %cst_164 = arith.constant dense<2147483647> : vector<2xi32>
    %537 = vector.multi_reduction <minsi>, %536, %cst_164 [1] : vector<2x32xi32> to vector<2xi32>
    %538 = vector.shape_cast %537 : vector<2xi32> to vector<2x1xi32>
    %c2_i32_165 = arith.constant 2 : i32
    %c0_i32_166 = arith.constant 0 : i32
    %539 = arith.cmpi eq, %c2_i32_165, %c0_i32_166 : i32
    %540 = arith.index_cast %c2_i32_165 : i32 to index
    %c0_167 = arith.constant 0 : index
    %c0_168 = arith.constant 0 : index
    %541 = vector.load %arg0[%540, %c0_167, %c0_168] : memref<8x1x1xi32, #tpu.memory_space<vmem>>, vector<1x1x1xi32>
    %542 = vector.shape_cast %541 : vector<1x1x1xi32> to vector<1x1xi32>
    %c0_i32_169 = arith.constant 0 : i32
    %543 = vector.broadcast %c0_i32_169 : i32 to vector<1x1xi32>
    %544 = arith.cmpi sgt, %542, %543 : vector<1x1xi32>
    %545 = vector.broadcast %539 : i1 to vector<1x1xi1>
    %546 = arith.ori %545, %544 : vector<1x1xi1>
    %547 = arith.index_cast %c2_i32_165 : i32 to index
    %c0_170 = arith.constant 0 : index
    %c0_171 = arith.constant 0 : index
    %548 = vector.load %arg2[%547, %c0_170, %c0_171] : memref<8x2x1xi32, #tpu.memory_space<vmem>>, vector<1x2x1xi32>
    %549 = vector.shape_cast %548 : vector<1x2x1xi32> to vector<2x1xi32>
    %550 = vector.shape_cast %546 : vector<1x1xi1> to vector<1x1xi1>
    %551 = vector.broadcast %550 : vector<1x1xi1> to vector<2x1xi1>
    %552 = arith.select %551, %549, %538 : vector<2x1xi1>, vector<2x1xi32>
    %553 = tpu.iota {dimensions = array<i32: 1>} : vector<2x32xi32>
    %554 = vector.broadcast %552 : vector<2x1xi32> to vector<2x32xi32>
    %555 = arith.cmpi eq, %553, %554 : vector<2x32xi32>
    %556 = arith.extui %555 : vector<2x32xi1> to vector<2x32xi32>
    %557 = arith.sitofp %556 : vector<2x32xi32> to vector<2x32xf32>
    %558 = vector.shape_cast %521 : vector<2x32xf32> to vector<1x2x32xf32>
    %559 = vector.broadcast %558 : vector<1x2x32xf32> to vector<8x2x32xf32>
    %560 = arith.mulf %368, %559 : vector<8x2x32xf32>
    %cst_172 = arith.constant dense<0.000000e+00> : vector<8x2xf32>
    %561 = vector.multi_reduction <add>, %560, %cst_172 [2] : vector<8x2x32xf32> to vector<8x2xf32>
    %562 = vector.shape_cast %561 : vector<8x2xf32> to vector<8x2x1xf32>
    %cst_173 = arith.constant dense<0xFF800000> : vector<2x1xf32>
    %563 = vector.multi_reduction <maximumf>, %562, %cst_173 [0] : vector<8x2x1xf32> to vector<2x1xf32>
    %564 = vector.shape_cast %563 : vector<2x1xf32> to vector<1x2x1xf32>
    %565 = vector.broadcast %564 : vector<1x2x1xf32> to vector<8x2x1xf32>
    %566 = arith.subf %562, %565 : vector<8x2x1xf32>
    %567 = math.exp %566 : vector<8x2x1xf32>
    %cst_174 = arith.constant dense<0.000000e+00> : vector<2x1xf32>
    %568 = vector.multi_reduction <add>, %567, %cst_174 [0] : vector<8x2x1xf32> to vector<2x1xf32>
    %569 = vector.shape_cast %568 : vector<2x1xf32> to vector<1x2x1xf32>
    %570 = vector.broadcast %569 : vector<1x2x1xf32> to vector<8x2x1xf32>
    %571 = arith.divf %567, %570 : vector<8x2x1xf32>
    %572 = vector.broadcast %571 : vector<8x2x1xf32> to vector<8x2x128xf32>
    %573 = arith.mulf %572, %369 : vector<8x2x128xf32>
    %cst_175 = arith.constant dense<0.000000e+00> : vector<2x128xf32>
    %574 = vector.multi_reduction <add>, %573, %cst_175 [0] : vector<8x2x128xf32> to vector<2x128xf32>
    %cst_176 = arith.constant dense<0.000000e+00> : vector<2x128xf32>
    %575 = tpu.matmul %557, %370, %cst_176 {dimension_numbers = #tpu.dot_dimension_numbers<[1], [0], [0], [1], [0, 0, 1, 1], [], []>} : vector<2x32xf32>, vector<32x128xf32>, vector<2x128xf32> -> vector<2x128xf32>
    %576 = arith.addf %574, %575 : vector<2x128xf32>
    %cst_177 = arith.constant dense<0.000000e+00> : vector<2x128xf32>
    %577 = tpu.matmul %521, %371, %cst_177 {dimension_numbers = #tpu.dot_dimension_numbers<[1], [0], [0], [1], [0, 0, 1, 1], [], []>} : vector<2x32xf32>, vector<32x128xf32>, vector<2x128xf32> -> vector<2x128xf32>
    %578 = arith.addf %576, %577 : vector<2x128xf32>
    %579 = vector.extract_strided_slice %578 {offsets = [0, 0], sizes = [2, 32], strides = [1, 1]} : vector<2x128xf32> to vector<2x32xf32>
    %580 = arith.negf %579 : vector<2x32xf32>
    %581 = math.exp %580 : vector<2x32xf32>
    %cst_178 = arith.constant 1.000000e+00 : f32
    %582 = vector.broadcast %cst_178 : f32 to vector<2x32xf32>
    %583 = arith.addf %582, %581 : vector<2x32xf32>
    %584 = arith.divf %582, %583 : vector<2x32xf32>
    %585 = vector.extract_strided_slice %578 {offsets = [0, 32], sizes = [2, 32], strides = [1, 1]} : vector<2x128xf32> to vector<2x32xf32>
    %586 = arith.negf %585 : vector<2x32xf32>
    %587 = math.exp %586 : vector<2x32xf32>
    %cst_179 = arith.constant 1.000000e+00 : f32
    %588 = vector.broadcast %cst_179 : f32 to vector<2x32xf32>
    %589 = arith.addf %588, %587 : vector<2x32xf32>
    %590 = arith.divf %588, %589 : vector<2x32xf32>
    %591 = vector.extract_strided_slice %578 {offsets = [0, 64], sizes = [2, 32], strides = [1, 1]} : vector<2x128xf32> to vector<2x32xf32>
    %592 = math.tanh %591 : vector<2x32xf32>
    %593 = vector.extract_strided_slice %578 {offsets = [0, 96], sizes = [2, 32], strides = [1, 1]} : vector<2x128xf32> to vector<2x32xf32>
    %594 = arith.negf %593 : vector<2x32xf32>
    %595 = math.exp %594 : vector<2x32xf32>
    %cst_180 = arith.constant 1.000000e+00 : f32
    %596 = vector.broadcast %cst_180 : f32 to vector<2x32xf32>
    %597 = arith.addf %596, %595 : vector<2x32xf32>
    %598 = arith.divf %596, %597 : vector<2x32xf32>
    %599 = arith.mulf %590, %519 : vector<2x32xf32>
    %600 = arith.mulf %584, %592 : vector<2x32xf32>
    %601 = arith.addf %599, %600 : vector<2x32xf32>
    %602 = math.tanh %601 : vector<2x32xf32>
    %603 = arith.mulf %598, %602 : vector<2x32xf32>
    %cst_181 = arith.constant dense<0.000000e+00> : vector<2x32xf32>
    %604 = tpu.matmul %603, %372, %cst_181 {dimension_numbers = #tpu.dot_dimension_numbers<[1], [0], [0], [1], [0, 0, 1, 1], [], []>} : vector<2x32xf32>, vector<32x32xf32>, vector<2x32xf32> -> vector<2x32xf32>
    %605 = vector.broadcast %373 : vector<1x32xf32> to vector<2x32xf32>
    %606 = arith.addf %604, %605 : vector<2x32xf32>
    %c1_i32_182 = arith.constant 1 : i32
    %607 = arith.addi %c2_i32_165, %c1_i32_182 : i32
    %608 = arith.index_cast %607 : i32 to index
    %c0_183 = arith.constant 0 : index
    %c0_184 = arith.constant 0 : index
    %609 = vector.load %arg10[%608, %c0_183, %c0_184] : memref<8x2x32xf32, #tpu.memory_space<vmem>>, vector<1x2x32xf32>
    %610 = vector.shape_cast %609 : vector<1x2x32xf32> to vector<2x32xf32>
    %611 = vector.shape_cast %606 : vector<2x32xf32> to vector<1x2x32xf32>
    tpu.vector_store %arg10[%608, %c0_183, %c0_184], %611 {strides = array<i32>} : memref<8x2x32xf32, #tpu.memory_space<vmem>>, vector<1x2x32xf32>,
    %612 = tpu.iota {dimensions = array<i32: 1>} : vector<2x32xi32>
    %cst_185 = arith.constant dense<0xFF800000> : vector<2xf32>
    %613 = vector.multi_reduction <maximumf>, %606, %cst_185 [1] : vector<2x32xf32> to vector<2xf32>
    %614 = vector.shape_cast %613 : vector<2xf32> to vector<2x1xf32>
    %615 = vector.broadcast %614 : vector<2x1xf32> to vector<2x32xf32>
    %616 = arith.cmpf oeq, %606, %615 : vector<2x32xf32>
    %c32_i32_186 = arith.constant 32 : i32
    %617 = vector.broadcast %c32_i32_186 : i32 to vector<2x32xi32>
    %618 = arith.select %616, %612, %617 : vector<2x32xi1>, vector<2x32xi32>
    %cst_187 = arith.constant dense<2147483647> : vector<2xi32>
    %619 = vector.multi_reduction <minsi>, %618, %cst_187 [1] : vector<2x32xi32> to vector<2xi32>
    %620 = vector.shape_cast %619 : vector<2xi32> to vector<2x1xi32>
    %c3_i32_188 = arith.constant 3 : i32
    %c0_i32_189 = arith.constant 0 : i32
    %621 = arith.cmpi eq, %c3_i32_188, %c0_i32_189 : i32
    %622 = arith.index_cast %c3_i32_188 : i32 to index
    %c0_190 = arith.constant 0 : index
    %c0_191 = arith.constant 0 : index
    %623 = vector.load %arg0[%622, %c0_190, %c0_191] : memref<8x1x1xi32, #tpu.memory_space<vmem>>, vector<1x1x1xi32>
    %624 = vector.shape_cast %623 : vector<1x1x1xi32> to vector<1x1xi32>
    %c0_i32_192 = arith.constant 0 : i32
    %625 = vector.broadcast %c0_i32_192 : i32 to vector<1x1xi32>
    %626 = arith.cmpi sgt, %624, %625 : vector<1x1xi32>
    %627 = vector.broadcast %621 : i1 to vector<1x1xi1>
    %628 = arith.ori %627, %626 : vector<1x1xi1>
    %629 = arith.index_cast %c3_i32_188 : i32 to index
    %c0_193 = arith.constant 0 : index
    %c0_194 = arith.constant 0 : index
    %630 = vector.load %arg2[%629, %c0_193, %c0_194] : memref<8x2x1xi32, #tpu.memory_space<vmem>>, vector<1x2x1xi32>
    %631 = vector.shape_cast %630 : vector<1x2x1xi32> to vector<2x1xi32>
    %632 = vector.shape_cast %628 : vector<1x1xi1> to vector<1x1xi1>
    %633 = vector.broadcast %632 : vector<1x1xi1> to vector<2x1xi1>
    %634 = arith.select %633, %631, %620 : vector<2x1xi1>, vector<2x1xi32>
    %635 = tpu.iota {dimensions = array<i32: 1>} : vector<2x32xi32>
    %636 = vector.broadcast %634 : vector<2x1xi32> to vector<2x32xi32>
    %637 = arith.cmpi eq, %635, %636 : vector<2x32xi32>
    %638 = arith.extui %637 : vector<2x32xi1> to vector<2x32xi32>
    %639 = arith.sitofp %638 : vector<2x32xi32> to vector<2x32xf32>
    %640 = vector.shape_cast %603 : vector<2x32xf32> to vector<1x2x32xf32>
    %641 = vector.broadcast %640 : vector<1x2x32xf32> to vector<8x2x32xf32>
    %642 = arith.mulf %368, %641 : vector<8x2x32xf32>
    %cst_195 = arith.constant dense<0.000000e+00> : vector<8x2xf32>
    %643 = vector.multi_reduction <add>, %642, %cst_195 [2] : vector<8x2x32xf32> to vector<8x2xf32>
    %644 = vector.shape_cast %643 : vector<8x2xf32> to vector<8x2x1xf32>
    %cst_196 = arith.constant dense<0xFF800000> : vector<2x1xf32>
    %645 = vector.multi_reduction <maximumf>, %644, %cst_196 [0] : vector<8x2x1xf32> to vector<2x1xf32>
    %646 = vector.shape_cast %645 : vector<2x1xf32> to vector<1x2x1xf32>
    %647 = vector.broadcast %646 : vector<1x2x1xf32> to vector<8x2x1xf32>
    %648 = arith.subf %644, %647 : vector<8x2x1xf32>
    %649 = math.exp %648 : vector<8x2x1xf32>
    %cst_197 = arith.constant dense<0.000000e+00> : vector<2x1xf32>
    %650 = vector.multi_reduction <add>, %649, %cst_197 [0] : vector<8x2x1xf32> to vector<2x1xf32>
    %651 = vector.shape_cast %650 : vector<2x1xf32> to vector<1x2x1xf32>
    %652 = vector.broadcast %651 : vector<1x2x1xf32> to vector<8x2x1xf32>
    %653 = arith.divf %649, %652 : vector<8x2x1xf32>
    %654 = vector.broadcast %653 : vector<8x2x1xf32> to vector<8x2x128xf32>
    %655 = arith.mulf %654, %369 : vector<8x2x128xf32>
    %cst_198 = arith.constant dense<0.000000e+00> : vector<2x128xf32>
    %656 = vector.multi_reduction <add>, %655, %cst_198 [0] : vector<8x2x128xf32> to vector<2x128xf32>
    %cst_199 = arith.constant dense<0.000000e+00> : vector<2x128xf32>
    %657 = tpu.matmul %639, %370, %cst_199 {dimension_numbers = #tpu.dot_dimension_numbers<[1], [0], [0], [1], [0, 0, 1, 1], [], []>} : vector<2x32xf32>, vector<32x128xf32>, vector<2x128xf32> -> vector<2x128xf32>
    %658 = arith.addf %656, %657 : vector<2x128xf32>
    %cst_200 = arith.constant dense<0.000000e+00> : vector<2x128xf32>
    %659 = tpu.matmul %603, %371, %cst_200 {dimension_numbers = #tpu.dot_dimension_numbers<[1], [0], [0], [1], [0, 0, 1, 1], [], []>} : vector<2x32xf32>, vector<32x128xf32>, vector<2x128xf32> -> vector<2x128xf32>
    %660 = arith.addf %658, %659 : vector<2x128xf32>
    %661 = vector.extract_strided_slice %660 {offsets = [0, 0], sizes = [2, 32], strides = [1, 1]} : vector<2x128xf32> to vector<2x32xf32>
    %662 = arith.negf %661 : vector<2x32xf32>
    %663 = math.exp %662 : vector<2x32xf32>
    %cst_201 = arith.constant 1.000000e+00 : f32
    %664 = vector.broadcast %cst_201 : f32 to vector<2x32xf32>
    %665 = arith.addf %664, %663 : vector<2x32xf32>
    %666 = arith.divf %664, %665 : vector<2x32xf32>
    %667 = vector.extract_strided_slice %660 {offsets = [0, 32], sizes = [2, 32], strides = [1, 1]} : vector<2x128xf32> to vector<2x32xf32>
    %668 = arith.negf %667 : vector<2x32xf32>
    %669 = math.exp %668 : vector<2x32xf32>
    %cst_202 = arith.constant 1.000000e+00 : f32
    %670 = vector.broadcast %cst_202 : f32 to vector<2x32xf32>
    %671 = arith.addf %670, %669 : vector<2x32xf32>
    %672 = arith.divf %670, %671 : vector<2x32xf32>
    %673 = vector.extract_strided_slice %660 {offsets = [0, 64], sizes = [2, 32], strides = [1, 1]} : vector<2x128xf32> to vector<2x32xf32>
    %674 = math.tanh %673 : vector<2x32xf32>
    %675 = vector.extract_strided_slice %660 {offsets = [0, 96], sizes = [2, 32], strides = [1, 1]} : vector<2x128xf32> to vector<2x32xf32>
    %676 = arith.negf %675 : vector<2x32xf32>
    %677 = math.exp %676 : vector<2x32xf32>
    %cst_203 = arith.constant 1.000000e+00 : f32
    %678 = vector.broadcast %cst_203 : f32 to vector<2x32xf32>
    %679 = arith.addf %678, %677 : vector<2x32xf32>
    %680 = arith.divf %678, %679 : vector<2x32xf32>
    %681 = arith.mulf %672, %601 : vector<2x32xf32>
    %682 = arith.mulf %666, %674 : vector<2x32xf32>
    %683 = arith.addf %681, %682 : vector<2x32xf32>
    %684 = math.tanh %683 : vector<2x32xf32>
    %685 = arith.mulf %680, %684 : vector<2x32xf32>
    %cst_204 = arith.constant dense<0.000000e+00> : vector<2x32xf32>
    %686 = tpu.matmul %685, %372, %cst_204 {dimension_numbers = #tpu.dot_dimension_numbers<[1], [0], [0], [1], [0, 0, 1, 1], [], []>} : vector<2x32xf32>, vector<32x32xf32>, vector<2x32xf32> -> vector<2x32xf32>
    %687 = vector.broadcast %373 : vector<1x32xf32> to vector<2x32xf32>
    %688 = arith.addf %686, %687 : vector<2x32xf32>
    %c1_i32_205 = arith.constant 1 : i32
    %689 = arith.addi %c3_i32_188, %c1_i32_205 : i32
    %690 = arith.index_cast %689 : i32 to index
    %c0_206 = arith.constant 0 : index
    %c0_207 = arith.constant 0 : index
    %691 = vector.load %arg10[%690, %c0_206, %c0_207] : memref<8x2x32xf32, #tpu.memory_space<vmem>>, vector<1x2x32xf32>
    %692 = vector.shape_cast %691 : vector<1x2x32xf32> to vector<2x32xf32>
    %693 = vector.shape_cast %688 : vector<2x32xf32> to vector<1x2x32xf32>
    tpu.vector_store %arg10[%690, %c0_206, %c0_207], %693 {strides = array<i32>} : memref<8x2x32xf32, #tpu.memory_space<vmem>>, vector<1x2x32xf32>,
    %694 = tpu.iota {dimensions = array<i32: 1>} : vector<2x32xi32>
    %cst_208 = arith.constant dense<0xFF800000> : vector<2xf32>
    %695 = vector.multi_reduction <maximumf>, %688, %cst_208 [1] : vector<2x32xf32> to vector<2xf32>
    %696 = vector.shape_cast %695 : vector<2xf32> to vector<2x1xf32>
    %697 = vector.broadcast %696 : vector<2x1xf32> to vector<2x32xf32>
    %698 = arith.cmpf oeq, %688, %697 : vector<2x32xf32>
    %c32_i32_209 = arith.constant 32 : i32
    %699 = vector.broadcast %c32_i32_209 : i32 to vector<2x32xi32>
    %700 = arith.select %698, %694, %699 : vector<2x32xi1>, vector<2x32xi32>
    %cst_210 = arith.constant dense<2147483647> : vector<2xi32>
    %701 = vector.multi_reduction <minsi>, %700, %cst_210 [1] : vector<2x32xi32> to vector<2xi32>
    %702 = vector.shape_cast %701 : vector<2xi32> to vector<2x1xi32>
    %c4_i32_211 = arith.constant 4 : i32
    %c0_i32_212 = arith.constant 0 : i32
    %703 = arith.cmpi eq, %c4_i32_211, %c0_i32_212 : i32
    %704 = arith.index_cast %c4_i32_211 : i32 to index
    %c0_213 = arith.constant 0 : index
    %c0_214 = arith.constant 0 : index
    %705 = vector.load %arg0[%704, %c0_213, %c0_214] : memref<8x1x1xi32, #tpu.memory_space<vmem>>, vector<1x1x1xi32>
    %706 = vector.shape_cast %705 : vector<1x1x1xi32> to vector<1x1xi32>
    %c0_i32_215 = arith.constant 0 : i32
    %707 = vector.broadcast %c0_i32_215 : i32 to vector<1x1xi32>
    %708 = arith.cmpi sgt, %706, %707 : vector<1x1xi32>
    %709 = vector.broadcast %703 : i1 to vector<1x1xi1>
    %710 = arith.ori %709, %708 : vector<1x1xi1>
    %711 = arith.index_cast %c4_i32_211 : i32 to index
    %c0_216 = arith.constant 0 : index
    %c0_217 = arith.constant 0 : index
    %712 = vector.load %arg2[%711, %c0_216, %c0_217] : memref<8x2x1xi32, #tpu.memory_space<vmem>>, vector<1x2x1xi32>
    %713 = vector.shape_cast %712 : vector<1x2x1xi32> to vector<2x1xi32>
    %714 = vector.shape_cast %710 : vector<1x1xi1> to vector<1x1xi1>
    %715 = vector.broadcast %714 : vector<1x1xi1> to vector<2x1xi1>
    %716 = arith.select %715, %713, %702 : vector<2x1xi1>, vector<2x1xi32>
    %717 = tpu.iota {dimensions = array<i32: 1>} : vector<2x32xi32>
    %718 = vector.broadcast %716 : vector<2x1xi32> to vector<2x32xi32>
    %719 = arith.cmpi eq, %717, %718 : vector<2x32xi32>
    %720 = arith.extui %719 : vector<2x32xi1> to vector<2x32xi32>
    %721 = arith.sitofp %720 : vector<2x32xi32> to vector<2x32xf32>
    %722 = vector.shape_cast %685 : vector<2x32xf32> to vector<1x2x32xf32>
    %723 = vector.broadcast %722 : vector<1x2x32xf32> to vector<8x2x32xf32>
    %724 = arith.mulf %368, %723 : vector<8x2x32xf32>
    %cst_218 = arith.constant dense<0.000000e+00> : vector<8x2xf32>
    %725 = vector.multi_reduction <add>, %724, %cst_218 [2] : vector<8x2x32xf32> to vector<8x2xf32>
    %726 = vector.shape_cast %725 : vector<8x2xf32> to vector<8x2x1xf32>
    %cst_219 = arith.constant dense<0xFF800000> : vector<2x1xf32>
    %727 = vector.multi_reduction <maximumf>, %726, %cst_219 [0] : vector<8x2x1xf32> to vector<2x1xf32>
    %728 = vector.shape_cast %727 : vector<2x1xf32> to vector<1x2x1xf32>
    %729 = vector.broadcast %728 : vector<1x2x1xf32> to vector<8x2x1xf32>
    %730 = arith.subf %726, %729 : vector<8x2x1xf32>
    %731 = math.exp %730 : vector<8x2x1xf32>
    %cst_220 = arith.constant dense<0.000000e+00> : vector<2x1xf32>
    %732 = vector.multi_reduction <add>, %731, %cst_220 [0] : vector<8x2x1xf32> to vector<2x1xf32>
    %733 = vector.shape_cast %732 : vector<2x1xf32> to vector<1x2x1xf32>
    %734 = vector.broadcast %733 : vector<1x2x1xf32> to vector<8x2x1xf32>
    %735 = arith.divf %731, %734 : vector<8x2x1xf32>
    %736 = vector.broadcast %735 : vector<8x2x1xf32> to vector<8x2x128xf32>
    %737 = arith.mulf %736, %369 : vector<8x2x128xf32>
    %cst_221 = arith.constant dense<0.000000e+00> : vector<2x128xf32>
    %738 = vector.multi_reduction <add>, %737, %cst_221 [0] : vector<8x2x128xf32> to vector<2x128xf32>
    %cst_222 = arith.constant dense<0.000000e+00> : vector<2x128xf32>
    %739 = tpu.matmul %721, %370, %cst_222 {dimension_numbers = #tpu.dot_dimension_numbers<[1], [0], [0], [1], [0, 0, 1, 1], [], []>} : vector<2x32xf32>, vector<32x128xf32>, vector<2x128xf32> -> vector<2x128xf32>
    %740 = arith.addf %738, %739 : vector<2x128xf32>
    %cst_223 = arith.constant dense<0.000000e+00> : vector<2x128xf32>
    %741 = tpu.matmul %685, %371, %cst_223 {dimension_numbers = #tpu.dot_dimension_numbers<[1], [0], [0], [1], [0, 0, 1, 1], [], []>} : vector<2x32xf32>, vector<32x128xf32>, vector<2x128xf32> -> vector<2x128xf32>
    %742 = arith.addf %740, %741 : vector<2x128xf32>
    %743 = vector.extract_strided_slice %742 {offsets = [0, 0], sizes = [2, 32], strides = [1, 1]} : vector<2x128xf32> to vector<2x32xf32>
    %744 = arith.negf %743 : vector<2x32xf32>
    %745 = math.exp %744 : vector<2x32xf32>
    %cst_224 = arith.constant 1.000000e+00 : f32
    %746 = vector.broadcast %cst_224 : f32 to vector<2x32xf32>
    %747 = arith.addf %746, %745 : vector<2x32xf32>
    %748 = arith.divf %746, %747 : vector<2x32xf32>
    %749 = vector.extract_strided_slice %742 {offsets = [0, 32], sizes = [2, 32], strides = [1, 1]} : vector<2x128xf32> to vector<2x32xf32>
    %750 = arith.negf %749 : vector<2x32xf32>
    %751 = math.exp %750 : vector<2x32xf32>
    %cst_225 = arith.constant 1.000000e+00 : f32
    %752 = vector.broadcast %cst_225 : f32 to vector<2x32xf32>
    %753 = arith.addf %752, %751 : vector<2x32xf32>
    %754 = arith.divf %752, %753 : vector<2x32xf32>
    %755 = vector.extract_strided_slice %742 {offsets = [0, 64], sizes = [2, 32], strides = [1, 1]} : vector<2x128xf32> to vector<2x32xf32>
    %756 = math.tanh %755 : vector<2x32xf32>
    %757 = vector.extract_strided_slice %742 {offsets = [0, 96], sizes = [2, 32], strides = [1, 1]} : vector<2x128xf32> to vector<2x32xf32>
    %758 = arith.negf %757 : vector<2x32xf32>
    %759 = math.exp %758 : vector<2x32xf32>
    %cst_226 = arith.constant 1.000000e+00 : f32
    %760 = vector.broadcast %cst_226 : f32 to vector<2x32xf32>
    %761 = arith.addf %760, %759 : vector<2x32xf32>
    %762 = arith.divf %760, %761 : vector<2x32xf32>
    %763 = arith.mulf %754, %683 : vector<2x32xf32>
    %764 = arith.mulf %748, %756 : vector<2x32xf32>
    %765 = arith.addf %763, %764 : vector<2x32xf32>
    %766 = math.tanh %765 : vector<2x32xf32>
    %767 = arith.mulf %762, %766 : vector<2x32xf32>
    %cst_227 = arith.constant dense<0.000000e+00> : vector<2x32xf32>
    %768 = tpu.matmul %767, %372, %cst_227 {dimension_numbers = #tpu.dot_dimension_numbers<[1], [0], [0], [1], [0, 0, 1, 1], [], []>} : vector<2x32xf32>, vector<32x32xf32>, vector<2x32xf32> -> vector<2x32xf32>
    %769 = vector.broadcast %373 : vector<1x32xf32> to vector<2x32xf32>
    %770 = arith.addf %768, %769 : vector<2x32xf32>
    %c1_i32_228 = arith.constant 1 : i32
    %771 = arith.addi %c4_i32_211, %c1_i32_228 : i32
    %772 = arith.index_cast %771 : i32 to index
    %c0_229 = arith.constant 0 : index
    %c0_230 = arith.constant 0 : index
    %773 = vector.load %arg10[%772, %c0_229, %c0_230] : memref<8x2x32xf32, #tpu.memory_space<vmem>>, vector<1x2x32xf32>
    %774 = vector.shape_cast %773 : vector<1x2x32xf32> to vector<2x32xf32>
    %775 = vector.shape_cast %770 : vector<2x32xf32> to vector<1x2x32xf32>
    tpu.vector_store %arg10[%772, %c0_229, %c0_230], %775 {strides = array<i32>} : memref<8x2x32xf32, #tpu.memory_space<vmem>>, vector<1x2x32xf32>,
    %776 = tpu.iota {dimensions = array<i32: 1>} : vector<2x32xi32>
    %cst_231 = arith.constant dense<0xFF800000> : vector<2xf32>
    %777 = vector.multi_reduction <maximumf>, %770, %cst_231 [1] : vector<2x32xf32> to vector<2xf32>
    %778 = vector.shape_cast %777 : vector<2xf32> to vector<2x1xf32>
    %779 = vector.broadcast %778 : vector<2x1xf32> to vector<2x32xf32>
    %780 = arith.cmpf oeq, %770, %779 : vector<2x32xf32>
    %c32_i32_232 = arith.constant 32 : i32
    %781 = vector.broadcast %c32_i32_232 : i32 to vector<2x32xi32>
    %782 = arith.select %780, %776, %781 : vector<2x32xi1>, vector<2x32xi32>
    %cst_233 = arith.constant dense<2147483647> : vector<2xi32>
    %783 = vector.multi_reduction <minsi>, %782, %cst_233 [1] : vector<2x32xi32> to vector<2xi32>
    %784 = vector.shape_cast %783 : vector<2xi32> to vector<2x1xi32>
    %c5_i32_234 = arith.constant 5 : i32
    %c0_i32_235 = arith.constant 0 : i32
    %785 = arith.cmpi eq, %c5_i32_234, %c0_i32_235 : i32
    %786 = arith.index_cast %c5_i32_234 : i32 to index
    %c0_236 = arith.constant 0 : index
    %c0_237 = arith.constant 0 : index
    %787 = vector.load %arg0[%786, %c0_236, %c0_237] : memref<8x1x1xi32, #tpu.memory_space<vmem>>, vector<1x1x1xi32>
    %788 = vector.shape_cast %787 : vector<1x1x1xi32> to vector<1x1xi32>
    %c0_i32_238 = arith.constant 0 : i32
    %789 = vector.broadcast %c0_i32_238 : i32 to vector<1x1xi32>
    %790 = arith.cmpi sgt, %788, %789 : vector<1x1xi32>
    %791 = vector.broadcast %785 : i1 to vector<1x1xi1>
    %792 = arith.ori %791, %790 : vector<1x1xi1>
    %793 = arith.index_cast %c5_i32_234 : i32 to index
    %c0_239 = arith.constant 0 : index
    %c0_240 = arith.constant 0 : index
    %794 = vector.load %arg2[%793, %c0_239, %c0_240] : memref<8x2x1xi32, #tpu.memory_space<vmem>>, vector<1x2x1xi32>
    %795 = vector.shape_cast %794 : vector<1x2x1xi32> to vector<2x1xi32>
    %796 = vector.shape_cast %792 : vector<1x1xi1> to vector<1x1xi1>
    %797 = vector.broadcast %796 : vector<1x1xi1> to vector<2x1xi1>
    %798 = arith.select %797, %795, %784 : vector<2x1xi1>, vector<2x1xi32>
    %799 = tpu.iota {dimensions = array<i32: 1>} : vector<2x32xi32>
    %800 = vector.broadcast %798 : vector<2x1xi32> to vector<2x32xi32>
    %801 = arith.cmpi eq, %799, %800 : vector<2x32xi32>
    %802 = arith.extui %801 : vector<2x32xi1> to vector<2x32xi32>
    %803 = arith.sitofp %802 : vector<2x32xi32> to vector<2x32xf32>
    %804 = vector.shape_cast %767 : vector<2x32xf32> to vector<1x2x32xf32>
    %805 = vector.broadcast %804 : vector<1x2x32xf32> to vector<8x2x32xf32>
    %806 = arith.mulf %368, %805 : vector<8x2x32xf32>
    %cst_241 = arith.constant dense<0.000000e+00> : vector<8x2xf32>
    %807 = vector.multi_reduction <add>, %806, %cst_241 [2] : vector<8x2x32xf32> to vector<8x2xf32>
    %808 = vector.shape_cast %807 : vector<8x2xf32> to vector<8x2x1xf32>
    %cst_242 = arith.constant dense<0xFF800000> : vector<2x1xf32>
    %809 = vector.multi_reduction <maximumf>, %808, %cst_242 [0] : vector<8x2x1xf32> to vector<2x1xf32>
    %810 = vector.shape_cast %809 : vector<2x1xf32> to vector<1x2x1xf32>
    %811 = vector.broadcast %810 : vector<1x2x1xf32> to vector<8x2x1xf32>
    %812 = arith.subf %808, %811 : vector<8x2x1xf32>
    %813 = math.exp %812 : vector<8x2x1xf32>
    %cst_243 = arith.constant dense<0.000000e+00> : vector<2x1xf32>
    %814 = vector.multi_reduction <add>, %813, %cst_243 [0] : vector<8x2x1xf32> to vector<2x1xf32>
    %815 = vector.shape_cast %814 : vector<2x1xf32> to vector<1x2x1xf32>
    %816 = vector.broadcast %815 : vector<1x2x1xf32> to vector<8x2x1xf32>
    %817 = arith.divf %813, %816 : vector<8x2x1xf32>
    %818 = vector.broadcast %817 : vector<8x2x1xf32> to vector<8x2x128xf32>
    %819 = arith.mulf %818, %369 : vector<8x2x128xf32>
    %cst_244 = arith.constant dense<0.000000e+00> : vector<2x128xf32>
    %820 = vector.multi_reduction <add>, %819, %cst_244 [0] : vector<8x2x128xf32> to vector<2x128xf32>
    %cst_245 = arith.constant dense<0.000000e+00> : vector<2x128xf32>
    %821 = tpu.matmul %803, %370, %cst_245 {dimension_numbers = #tpu.dot_dimension_numbers<[1], [0], [0], [1], [0, 0, 1, 1], [], []>} : vector<2x32xf32>, vector<32x128xf32>, vector<2x128xf32> -> vector<2x128xf32>
    %822 = arith.addf %820, %821 : vector<2x128xf32>
    %cst_246 = arith.constant dense<0.000000e+00> : vector<2x128xf32>
    %823 = tpu.matmul %767, %371, %cst_246 {dimension_numbers = #tpu.dot_dimension_numbers<[1], [0], [0], [1], [0, 0, 1, 1], [], []>} : vector<2x32xf32>, vector<32x128xf32>, vector<2x128xf32> -> vector<2x128xf32>
    %824 = arith.addf %822, %823 : vector<2x128xf32>
    %825 = vector.extract_strided_slice %824 {offsets = [0, 0], sizes = [2, 32], strides = [1, 1]} : vector<2x128xf32> to vector<2x32xf32>
    %826 = arith.negf %825 : vector<2x32xf32>
    %827 = math.exp %826 : vector<2x32xf32>
    %cst_247 = arith.constant 1.000000e+00 : f32
    %828 = vector.broadcast %cst_247 : f32 to vector<2x32xf32>
    %829 = arith.addf %828, %827 : vector<2x32xf32>
    %830 = arith.divf %828, %829 : vector<2x32xf32>
    %831 = vector.extract_strided_slice %824 {offsets = [0, 32], sizes = [2, 32], strides = [1, 1]} : vector<2x128xf32> to vector<2x32xf32>
    %832 = arith.negf %831 : vector<2x32xf32>
    %833 = math.exp %832 : vector<2x32xf32>
    %cst_248 = arith.constant 1.000000e+00 : f32
    %834 = vector.broadcast %cst_248 : f32 to vector<2x32xf32>
    %835 = arith.addf %834, %833 : vector<2x32xf32>
    %836 = arith.divf %834, %835 : vector<2x32xf32>
    %837 = vector.extract_strided_slice %824 {offsets = [0, 64], sizes = [2, 32], strides = [1, 1]} : vector<2x128xf32> to vector<2x32xf32>
    %838 = math.tanh %837 : vector<2x32xf32>
    %839 = vector.extract_strided_slice %824 {offsets = [0, 96], sizes = [2, 32], strides = [1, 1]} : vector<2x128xf32> to vector<2x32xf32>
    %840 = arith.negf %839 : vector<2x32xf32>
    %841 = math.exp %840 : vector<2x32xf32>
    %cst_249 = arith.constant 1.000000e+00 : f32
    %842 = vector.broadcast %cst_249 : f32 to vector<2x32xf32>
    %843 = arith.addf %842, %841 : vector<2x32xf32>
    %844 = arith.divf %842, %843 : vector<2x32xf32>
    %845 = arith.mulf %836, %765 : vector<2x32xf32>
    %846 = arith.mulf %830, %838 : vector<2x32xf32>
    %847 = arith.addf %845, %846 : vector<2x32xf32>
    %848 = math.tanh %847 : vector<2x32xf32>
    %849 = arith.mulf %844, %848 : vector<2x32xf32>
    %cst_250 = arith.constant dense<0.000000e+00> : vector<2x32xf32>
    %850 = tpu.matmul %849, %372, %cst_250 {dimension_numbers = #tpu.dot_dimension_numbers<[1], [0], [0], [1], [0, 0, 1, 1], [], []>} : vector<2x32xf32>, vector<32x32xf32>, vector<2x32xf32> -> vector<2x32xf32>
    %851 = vector.broadcast %373 : vector<1x32xf32> to vector<2x32xf32>
    %852 = arith.addf %850, %851 : vector<2x32xf32>
    %c1_i32_251 = arith.constant 1 : i32
    %853 = arith.addi %c5_i32_234, %c1_i32_251 : i32
    %854 = arith.index_cast %853 : i32 to index
    %c0_252 = arith.constant 0 : index
    %c0_253 = arith.constant 0 : index
    %855 = vector.load %arg10[%854, %c0_252, %c0_253] : memref<8x2x32xf32, #tpu.memory_space<vmem>>, vector<1x2x32xf32>
    %856 = vector.shape_cast %855 : vector<1x2x32xf32> to vector<2x32xf32>
    %857 = vector.shape_cast %852 : vector<2x32xf32> to vector<1x2x32xf32>
    tpu.vector_store %arg10[%854, %c0_252, %c0_253], %857 {strides = array<i32>} : memref<8x2x32xf32, #tpu.memory_space<vmem>>, vector<1x2x32xf32>,
    %858 = tpu.iota {dimensions = array<i32: 1>} : vector<2x32xi32>
    %cst_254 = arith.constant dense<0xFF800000> : vector<2xf32>
    %859 = vector.multi_reduction <maximumf>, %852, %cst_254 [1] : vector<2x32xf32> to vector<2xf32>
    %860 = vector.shape_cast %859 : vector<2xf32> to vector<2x1xf32>
    %861 = vector.broadcast %860 : vector<2x1xf32> to vector<2x32xf32>
    %862 = arith.cmpf oeq, %852, %861 : vector<2x32xf32>
    %c32_i32_255 = arith.constant 32 : i32
    %863 = vector.broadcast %c32_i32_255 : i32 to vector<2x32xi32>
    %864 = arith.select %862, %858, %863 : vector<2x32xi1>, vector<2x32xi32>
    %cst_256 = arith.constant dense<2147483647> : vector<2xi32>
    %865 = vector.multi_reduction <minsi>, %864, %cst_256 [1] : vector<2x32xi32> to vector<2xi32>
    %866 = vector.shape_cast %865 : vector<2xi32> to vector<2x1xi32>
    %c6_i32_257 = arith.constant 6 : i32
    %c0_i32_258 = arith.constant 0 : i32
    %867 = arith.cmpi eq, %c6_i32_257, %c0_i32_258 : i32
    %868 = arith.index_cast %c6_i32_257 : i32 to index
    %c0_259 = arith.constant 0 : index
    %c0_260 = arith.constant 0 : index
    %869 = vector.load %arg0[%868, %c0_259, %c0_260] : memref<8x1x1xi32, #tpu.memory_space<vmem>>, vector<1x1x1xi32>
    %870 = vector.shape_cast %869 : vector<1x1x1xi32> to vector<1x1xi32>
    %c0_i32_261 = arith.constant 0 : i32
    %871 = vector.broadcast %c0_i32_261 : i32 to vector<1x1xi32>
    %872 = arith.cmpi sgt, %870, %871 : vector<1x1xi32>
    %873 = vector.broadcast %867 : i1 to vector<1x1xi1>
    %874 = arith.ori %873, %872 : vector<1x1xi1>
    %875 = arith.index_cast %c6_i32_257 : i32 to index
    %c0_262 = arith.constant 0 : index
    %c0_263 = arith.constant 0 : index
    %876 = vector.load %arg2[%875, %c0_262, %c0_263] : memref<8x2x1xi32, #tpu.memory_space<vmem>>, vector<1x2x1xi32>
    %877 = vector.shape_cast %876 : vector<1x2x1xi32> to vector<2x1xi32>
    %878 = vector.shape_cast %874 : vector<1x1xi1> to vector<1x1xi1>
    %879 = vector.broadcast %878 : vector<1x1xi1> to vector<2x1xi1>
    %880 = arith.select %879, %877, %866 : vector<2x1xi1>, vector<2x1xi32>
    %881 = tpu.iota {dimensions = array<i32: 1>} : vector<2x32xi32>
    %882 = vector.broadcast %880 : vector<2x1xi32> to vector<2x32xi32>
    %883 = arith.cmpi eq, %881, %882 : vector<2x32xi32>
    %884 = arith.extui %883 : vector<2x32xi1> to vector<2x32xi32>
    %885 = arith.sitofp %884 : vector<2x32xi32> to vector<2x32xf32>
    %886 = vector.shape_cast %849 : vector<2x32xf32> to vector<1x2x32xf32>
    %887 = vector.broadcast %886 : vector<1x2x32xf32> to vector<8x2x32xf32>
    %888 = arith.mulf %368, %887 : vector<8x2x32xf32>
    %cst_264 = arith.constant dense<0.000000e+00> : vector<8x2xf32>
    %889 = vector.multi_reduction <add>, %888, %cst_264 [2] : vector<8x2x32xf32> to vector<8x2xf32>
    %890 = vector.shape_cast %889 : vector<8x2xf32> to vector<8x2x1xf32>
    %cst_265 = arith.constant dense<0xFF800000> : vector<2x1xf32>
    %891 = vector.multi_reduction <maximumf>, %890, %cst_265 [0] : vector<8x2x1xf32> to vector<2x1xf32>
    %892 = vector.shape_cast %891 : vector<2x1xf32> to vector<1x2x1xf32>
    %893 = vector.broadcast %892 : vector<1x2x1xf32> to vector<8x2x1xf32>
    %894 = arith.subf %890, %893 : vector<8x2x1xf32>
    %895 = math.exp %894 : vector<8x2x1xf32>
    %cst_266 = arith.constant dense<0.000000e+00> : vector<2x1xf32>
    %896 = vector.multi_reduction <add>, %895, %cst_266 [0] : vector<8x2x1xf32> to vector<2x1xf32>
    %897 = vector.shape_cast %896 : vector<2x1xf32> to vector<1x2x1xf32>
    %898 = vector.broadcast %897 : vector<1x2x1xf32> to vector<8x2x1xf32>
    %899 = arith.divf %895, %898 : vector<8x2x1xf32>
    %900 = vector.broadcast %899 : vector<8x2x1xf32> to vector<8x2x128xf32>
    %901 = arith.mulf %900, %369 : vector<8x2x128xf32>
    %cst_267 = arith.constant dense<0.000000e+00> : vector<2x128xf32>
    %902 = vector.multi_reduction <add>, %901, %cst_267 [0] : vector<8x2x128xf32> to vector<2x128xf32>
    %cst_268 = arith.constant dense<0.000000e+00> : vector<2x128xf32>
    %903 = tpu.matmul %885, %370, %cst_268 {dimension_numbers = #tpu.dot_dimension_numbers<[1], [0], [0], [1], [0, 0, 1, 1], [], []>} : vector<2x32xf32>, vector<32x128xf32>, vector<2x128xf32> -> vector<2x128xf32>
    %904 = arith.addf %902, %903 : vector<2x128xf32>
    %cst_269 = arith.constant dense<0.000000e+00> : vector<2x128xf32>
    %905 = tpu.matmul %849, %371, %cst_269 {dimension_numbers = #tpu.dot_dimension_numbers<[1], [0], [0], [1], [0, 0, 1, 1], [], []>} : vector<2x32xf32>, vector<32x128xf32>, vector<2x128xf32> -> vector<2x128xf32>
    %906 = arith.addf %904, %905 : vector<2x128xf32>
    %907 = vector.extract_strided_slice %906 {offsets = [0, 0], sizes = [2, 32], strides = [1, 1]} : vector<2x128xf32> to vector<2x32xf32>
    %908 = arith.negf %907 : vector<2x32xf32>
    %909 = math.exp %908 : vector<2x32xf32>
    %cst_270 = arith.constant 1.000000e+00 : f32
    %910 = vector.broadcast %cst_270 : f32 to vector<2x32xf32>
    %911 = arith.addf %910, %909 : vector<2x32xf32>
    %912 = arith.divf %910, %911 : vector<2x32xf32>
    %913 = vector.extract_strided_slice %906 {offsets = [0, 32], sizes = [2, 32], strides = [1, 1]} : vector<2x128xf32> to vector<2x32xf32>
    %914 = arith.negf %913 : vector<2x32xf32>
    %915 = math.exp %914 : vector<2x32xf32>
    %cst_271 = arith.constant 1.000000e+00 : f32
    %916 = vector.broadcast %cst_271 : f32 to vector<2x32xf32>
    %917 = arith.addf %916, %915 : vector<2x32xf32>
    %918 = arith.divf %916, %917 : vector<2x32xf32>
    %919 = vector.extract_strided_slice %906 {offsets = [0, 64], sizes = [2, 32], strides = [1, 1]} : vector<2x128xf32> to vector<2x32xf32>
    %920 = math.tanh %919 : vector<2x32xf32>
    %921 = vector.extract_strided_slice %906 {offsets = [0, 96], sizes = [2, 32], strides = [1, 1]} : vector<2x128xf32> to vector<2x32xf32>
    %922 = arith.negf %921 : vector<2x32xf32>
    %923 = math.exp %922 : vector<2x32xf32>
    %cst_272 = arith.constant 1.000000e+00 : f32
    %924 = vector.broadcast %cst_272 : f32 to vector<2x32xf32>
    %925 = arith.addf %924, %923 : vector<2x32xf32>
    %926 = arith.divf %924, %925 : vector<2x32xf32>
    %927 = arith.mulf %918, %847 : vector<2x32xf32>
    %928 = arith.mulf %912, %920 : vector<2x32xf32>
    %929 = arith.addf %927, %928 : vector<2x32xf32>
    %930 = math.tanh %929 : vector<2x32xf32>
    %931 = arith.mulf %926, %930 : vector<2x32xf32>
    %cst_273 = arith.constant dense<0.000000e+00> : vector<2x32xf32>
    %932 = tpu.matmul %931, %372, %cst_273 {dimension_numbers = #tpu.dot_dimension_numbers<[1], [0], [0], [1], [0, 0, 1, 1], [], []>} : vector<2x32xf32>, vector<32x32xf32>, vector<2x32xf32> -> vector<2x32xf32>
    %933 = vector.broadcast %373 : vector<1x32xf32> to vector<2x32xf32>
    %934 = arith.addf %932, %933 : vector<2x32xf32>
    %c1_i32_274 = arith.constant 1 : i32
    %935 = arith.addi %c6_i32_257, %c1_i32_274 : i32
    %936 = arith.index_cast %935 : i32 to index
    %c0_275 = arith.constant 0 : index
    %c0_276 = arith.constant 0 : index
    %937 = vector.load %arg10[%936, %c0_275, %c0_276] : memref<8x2x32xf32, #tpu.memory_space<vmem>>, vector<1x2x32xf32>
    %938 = vector.shape_cast %937 : vector<1x2x32xf32> to vector<2x32xf32>
    %939 = vector.shape_cast %934 : vector<2x32xf32> to vector<1x2x32xf32>
    tpu.vector_store %arg10[%936, %c0_275, %c0_276], %939 {strides = array<i32>} : memref<8x2x32xf32, #tpu.memory_space<vmem>>, vector<1x2x32xf32>,
    %940 = tpu.iota {dimensions = array<i32: 1>} : vector<2x32xi32>
    %cst_277 = arith.constant dense<0xFF800000> : vector<2xf32>
    %941 = vector.multi_reduction <maximumf>, %934, %cst_277 [1] : vector<2x32xf32> to vector<2xf32>
    %942 = vector.shape_cast %941 : vector<2xf32> to vector<2x1xf32>
    %943 = vector.broadcast %942 : vector<2x1xf32> to vector<2x32xf32>
    %944 = arith.cmpf oeq, %934, %943 : vector<2x32xf32>
    %c32_i32_278 = arith.constant 32 : i32
    %945 = vector.broadcast %c32_i32_278 : i32 to vector<2x32xi32>
    %946 = arith.select %944, %940, %945 : vector<2x32xi1>, vector<2x32xi32>
    %cst_279 = arith.constant dense<2147483647> : vector<2xi32>
    %947 = vector.multi_reduction <minsi>, %946, %cst_279 [1] : vector<2x32xi32> to vector<2xi32>
    %948 = vector.shape_cast %947 : vector<2xi32> to vector<2x1xi32>
    %c7_i32_280 = arith.constant 7 : i32
    return
  }
}

</mosaic_0001>

<bundles_post_ra>
// kernel: seq2seq_forward.1
= control target key start
LH: loop header
LB: loop body
LE: loop exit
PB: predicated region body
PF: predicated region fallthrough
CT: control target
= control target key end

     0   :  { %15 = vsyncpa [#allocation5], 0  ;;  %s7713_s0 = inlined_call_operand.vmem [shape: s32[8,1,1], index: 0, kind: input, shape index: {}]   ;;  %s7714_s1 = inlined_call_operand.vmem [shape: s32[8,2,1], index: 1, kind: input, shape index: {}]   ;;  %s7715_s2 = inlined_call_operand.vmem [shape: s32[8,2,1], index: 2, kind: input, shape index: {}]   ;;  %s7716_s3 = inlined_call_operand.hbm [shape: f32[24,128], index: 3, kind: input, shape index: {}]   ;;  %s7717_s4 = inlined_call_operand.vmem [shape: f32[32,128], index: 4, kind: input, shape index: {}]   ;;  %s7718_s5 = inlined_call_operand.hbm [shape: f32[32,128], index: 5, kind: input, shape index: {}]   ;;  %s7719_s6 = inlined_call_operand.vmem [shape: f32[32,128], index: 6, kind: input, shape index: {}]   ;;  %s7720_s7 = inlined_call_operand.hbm [shape: f32[32,128], index: 7, kind: input, shape index: {}]   ;;  %s7721_s8 = inlined_call_operand.hbm [shape: f32[32,32], index: 8, kind: input, shape index: {}]   ;;  %s7722_s9 = inlined_call_operand.vmem [shape: f32[1,32], index: 9, kind: input, shape index: {}]   ;;  %s7723_s10 = inlined_call_operand.hbm [shape: f32[8,2,32], index: 10, kind: output, shape index: {}]  }
   0x1   :  { %16 = vsyncpa [#allocation8], 0 }
   0x2   :  { %17 = vsyncpa [#allocation11], 0 }
   0x3   :  { %18 = vsyncpa [#allocation6], 0  ;;  %s6478_s13 = smov [#allocation7]   ;;  %s6479_s15 = smov [#allocation4]  }
   0x4   :  { %s44_s14 = sshll.u32 %s6478_s13, 4  ;;  %s30_s16 = sshll.u32 %s6479_s15, 4  ;;  %s45_s14 = int_to_ptr.vmem [resolvable:$true] %s44_s14  ;;  %s6547_s16 = int_to_ptr.vmem [resolvable:$true] %s30_s16 }
   0x5   :  { %s6360_s19 = scalar_lea.hbm %s7718_s5, 512 }
   0x6   :  { %p6361_p0 = scmp.ne.s32.totalorder %s7718_s5, %s6360_s19  ;;  %p6364_p1 = scmp.lt.u32.totalorder %s6360_s19, %s7718_s5 }
   0x8   :  { %p6366_p2 = pnand %p6364_p1, %p6361_p0 }
   0xa   :  { %6369 = shalt.err (!%p6366_p2)
}
   0xb   :  { %s6370_s24 = scalar_lea.vmem %s45_s14, 512  ;;  %p6375_p4 = scmp.lt.s32.totalorder %s45_s14, %s45_s14 }
   0xc   :  { %p6371_p3 = scmp.ne.s32.totalorder %s45_s14, %s6370_s24  ;;  %p6376_p5 = scmp.lt.s32.totalorder %s6370_s24, %s6370_s24 }
   0xe   :  { %p6377_p6 = por %p6376_p5, %p6375_p4 }
  0x10   :  { %p6378_p7 = pnand %p6377_p6, %p6371_p3 }
  0x12   :  { %6381 = shalt.err (!%p6378_p7)
}
  0x13   :  { %s6480_s25 = smov 128   ;;  %s6481_s26 = smov 8  }
  0x14   :  { %50 = dma.hbm_to_vmem [thread:$0]  %s7718_s5, 512, %s45_s14, [#allocation8], %s6480_s25, %s6480_s25, %s6481_s26  }
  0x15   :  { %s6382_s11 = scalar_lea.hbm %s7716_s3, 384 }
  0x16   :  { %p6383_p8 = scmp.ne.s32.totalorder %s7716_s3, %s6382_s11  ;;  %p6386_p9 = scmp.lt.u32.totalorder %s6382_s11, %s7716_s3 }
  0x18   :  { %p6388_p10 = pnand %p6386_p9, %p6383_p8 }
  0x1a   :  { %6391 = shalt.err (!%p6388_p10)
}
  0x1b   :  { %s6392_s18 = scalar_lea.vmem %s6547_s16, 384  ;;  %p6397_p12 = scmp.lt.s32.totalorder %s6547_s16, %s6547_s16 }
  0x1c   :  { %p6393_p11 = scmp.ne.s32.totalorder %s6547_s16, %s6392_s18  ;;  %p6398_p13 = scmp.lt.s32.totalorder %s6392_s18, %s6392_s18 }
  0x1e   :  { %p6399_p0 = por %p6398_p13, %p6397_p12 }
  0x20   :  { %p6400_p1 = pnand %p6399_p0, %p6393_p11 }
  0x22   :  { %6403 = shalt.err (!%p6400_p1)
}
  0x23   :  { %36 = dma.hbm_to_vmem [thread:$0]  %s7716_s3, 384, %s6547_s16, [#allocation5], %s6480_s25, %s6480_s25, %s6481_s26  }
  0x24   :  { %s6482_s19 = smov [#allocation9]   ;;  %s6483_s21 = smov [#allocation10]  }
  0x25   :  { %s58_s20 = sshll.u32 %s6482_s19, 4  ;;  %s70_s22 = sshll.u32 %s6483_s21, 4  ;;  %s59_s20 = int_to_ptr.vmem [resolvable:$true] %s58_s20  ;;  %s6584_s22 = int_to_ptr.vmem [resolvable:$true] %s70_s22 }
  0x26   :  { %s6404_s27 = scalar_lea.hbm %s7720_s7, 512 }
  0x27   :  { %p6405_p2 = scmp.ne.s32.totalorder %s7720_s7, %s6404_s27  ;;  %p6408_p3 = scmp.lt.u32.totalorder %s6404_s27, %s7720_s7 }
  0x29   :  { %p6410_p4 = pnand %p6408_p3, %p6405_p2 }
  0x2b   :  { %6413 = shalt.err (!%p6410_p4)
}
  0x2c   :  { %s6414_s3 = scalar_lea.vmem %s59_s20, 512  ;;  %p6419_p6 = scmp.lt.s32.totalorder %s59_s20, %s59_s20 }
  0x2d   :  { %p6415_p5 = scmp.ne.s32.totalorder %s59_s20, %s6414_s3  ;;  %p6420_p7 = scmp.lt.s32.totalorder %s6414_s3, %s6414_s3 }
  0x2f   :  { %p6421_p8 = por %p6420_p7, %p6419_p6 }
  0x31   :  { %p6422_p9 = pnand %p6421_p8, %p6415_p5 }
  0x33   :  { %6425 = shalt.err (!%p6422_p9)
}
  0x34   :  { %64 = dma.hbm_to_vmem [thread:$0]  %s7720_s7, 512, %s59_s20, [#allocation8], %s6480_s25, %s6480_s25, %s6481_s26  }
  0x35   :  { %s6426_s17 = scalar_lea.hbm %s7721_s8, 512 }
  0x36   :  { %p6427_p10 = scmp.ne.s32.totalorder %s7721_s8, %s6426_s17  ;;  %p6430_p11 = scmp.lt.u32.totalorder %s6426_s17, %s7721_s8 }
  0x38   :  { %p6432_p12 = pnand %p6430_p11, %p6427_p10 }
  0x3a   :  { %6435 = shalt.err (!%p6432_p12)
}
  0x3b   :  { %s6436_s21 = scalar_lea.vmem %s6584_s22, 512  ;;  %p6441_p0 = scmp.lt.s32.totalorder %s6584_s22, %s6584_s22 }
  0x3c   :  { %p6437_p13 = scmp.ne.s32.totalorder %s6584_s22, %s6436_s21  ;;  %p6442_p1 = scmp.lt.s32.totalorder %s6436_s21, %s6436_s21 }
  0x3e   :  { %p6443_p2 = por %p6442_p1, %p6441_p0 }
  0x40   :  { %p6444_p3 = pnand %p6443_p2, %p6437_p13 }
  0x42   :  { %6447 = shalt.err (!%p6444_p3)
}
  0x43   :  { %76 = dma.hbm_to_vmem [thread:$0]  %s7721_s8, 512, %s6584_s22, [#allocation11], %s6480_s25, %s6480_s25, %s6481_s26  }
  0x44   :  { %6470 = dma.done.wait [#allocation5], 384  }
  0x45   :  { %6471 = vsyncadd [#allocation5], 4294966912 }
  0x46   :  { %6472 = dma.done.wait [#allocation8], 1024  }
  0x47   :  { %6473 = vsyncadd [#allocation8], 4294966272 }
  0x48   :  { %6474 = dma.done.wait [#allocation11], 512  }
  0x49   :  { %6475 = vsyncadd [#allocation11], 4294966784  ;;  %v6484_v0 = vmov 0   ;;  %v6485_v1 = vmov 0.0|0.0   ;;  %v104_v2 = vld [vmem:[%s7714_s1] sm:$0x3]  ;;  %v102_v14 = vlaneseq }
  0x4a   :  { %6078 = vset.pattern.permute.xlu0 %v6484_v0  ;;  %5782 = vmatprep.subr.bf16.mxu0 %v6485_v1  ;;  %v94_v3 = vld [vmem:[%s7717_s4] sm:$0xff]  ;;  %v95_v4 = vld [vmem:[%s7717_s4 + $0x8] sm:$0xff]  ;;  %v96_v8 = vld [vmem:[%s7717_s4 + $0x10] sm:$0xff]  ;;  %vm6486_vm0 = vmmov 0   ;;  %v6487_v9 = vmov 0.0   ;;  %vm185_vm1 = vcmask 195584  }
  0x4b   :  { %5788 = vmatprep.subr.bf16.mxu1 %v6485_v1  ;;  %6079 = vset.pattern.permute.xlu1 %v6484_v0  ;;  %v6634_v5 = vpack.c.bf16 %v95_v4, %v94_v3  ;;  %v91_v6 = vld [vmem:[#allocation4] sm:$0xff]  ;;  %v92_v7 = vld [vmem:[#allocation4 + $0x8] sm:$0xff]  ;;  %v97_v11 = vld [vmem:[%s7717_s4 + $0x18] sm:$0xff]  ;;  %v6664_v15 = vand.u32 127, %v102_v14  ;;  %s6488_s4 = smov 64   ;;  %s6489_s11 = smov 32  }
  0x4c   :  { %106 = vperm.xlu0 %6078, %v104_v2   ;;  %5311 = vmatprep.mubr.msk.f32.mxu0 %vm6486_vm0, %v6487_v9  ;;  %v6641_v10 = vpack.c.bf16 %v92_v7, %v91_v6  ;;  %v6649_v12 = vpack.c.bf16 %v97_v11, %v96_v8  ;;  %v6654_v13 = vld [vmem:[#allocation4 + $0x10] sm:$0xff]  ;;  %v98_v33 = vld [vmem:[#allocation7] sm:$0xff]  ;;  %v99_v34 = vld [vmem:[#allocation7 + $0x8] sm:$0xff]  ;;  %vm287_vm3 = vcmask 254976   ;;  %vm111_vm4 = vcmask 261120  }
  0x4d   :  { %5320 = vmatprep.mubr.msk.f32.mxu1 %vm6486_vm0, %v6487_v9  ;;  %5784 = vmatpush3.bf16.msra.mxu0 %v6634_v5  ;;  %v100_v35 = vld [vmem:[#allocation7 + $0x10] sm:$0xff]  ;;  %v6676_v36 = vpack.c.bf16 %v99_v34, %v98_v33  ;;  %v101_v37 = vld [vmem:[#allocation7 + $0x18] sm:$0xff]  ;;  %2147 = vst.msk [vmem:[#allocation12] sm:$0x3] %vm287_vm3, %v6487_v9  ;;  %v4996_v40 = vld [vmem:[%s7714_s1 + $0x2] sm:$0x3] }
  0x4e   :  { %5785 = vmatprep.subr.bf16.mxu0 %v6485_v1  ;;  %5790 = vmatpush3.bf16.msra.mxu1 %v6641_v10  ;;  %v6681_v38 = vpack.c.bf16 %v101_v37, %v100_v35  ;;  %v5002_v61 = vld [vmem:[%s7714_s1 + $0x4] sm:$0x3]  ;;  %vm2216_vm13 = vcmask 1041408  }
  0x4f   :  { %5318 = vmatprep.subr.mxu1 %v6487_v9 }
  0x51   :  { %5787 = vmatpush3.bf16.msra.mxu0 %v6649_v12 }
  0x52   :  { %5319 = vmatpush3.msra.mxu1 %v6654_v13  ;;  %5806 = vmatprep.subr.bf16.mxu0 %v6485_v1 }
  0x53   :  { %5791 = vmatprep.subr.bf16.mxu1 %v6485_v1 }
  0x54   :  { %5312 = vmatmul.mubr.f32.vlgmr.msra.gmra.mrb[0].mxu0 %v6487_v9 }
  0x55   :  { %5362 = vmatprep.mubr.msk.f32.mxu0 %vm6486_vm0, %v6487_v9  ;;  %5808 = vmatpush3.bf16.msra.mxu0 %v6676_v36 }
  0x56   :  { %5809 = vmatprep.subr.bf16.mxu0 %v6485_v1 }
  0x59   :  { %5811 = vmatpush3.bf16.msra.mxu0 %v6681_v38 }
  0x5a   :  { %5812 = vmatprep.subr.bf16.mxu0 %v6485_v1 }
  0xcb   :  { %v107_v16 = vpop.permute.xlu0 %106 }
  0xcc   :  { %vm108_vm2 = vcmp.eq.s32.totalorder %v6664_v15, %v107_v16 }
  0xcd   :  { %v4992_v17 = vsel %vm108_vm2, 1.0, %v6487_v9 }
  0xce   :  { %5321 = vmatmul.mubr.msk.f32.vlgmr.msra.gmra.mrb[0].mxu1 %vm185_vm1, %v4992_v17 }
  0xcf   :  { %5331 = vmatprep.mubr.msk.f32.mxu1 %vm6486_vm0, %v6487_v9  ;;  %5793 = vmatpush3.bf16.msra.mxu1 %v6676_v36 }
  0xd0   :  { %5794 = vmatprep.subr.bf16.mxu1 %v6485_v1 }
  0xd3   :  { %5796 = vmatpush3.bf16.msra.mxu1 %v6681_v38 }
  0xd4   :  { %5797 = vmatprep.subr.bf16.mxu1 %v6485_v1 }
 0x127   :  { %v181_v18 = vpop.f32.mrb[0].mxu0 }
 0x128   :  { %v5313_v19 = vpop.f32.mrb[1].mxu0 }
 0x1a1   :  { %v255_v20 = vpop.f32.mrb[0].mxu1 }
 0x1a2   :  { %v256_v21 = vadd.f32 %v255_v20, %v181_v18  ;;  %v5322_v22 = vpop.f32.mrb[1].mxu1 }
 0x1a4   :  { %6080 = vtanh.f32 %v256_v21  ;;  %v4994_v24 = vmul.f32 -1.442695, %v256_v21 }
 0x1a6   :  { %6082 = vpow2.f32 %v4994_v24 }
 0x1ae   :  { %v6081_v23 = vpop.eup %6080 }
 0x1af   :  { %268 = vrot.lane.b32.xlu0 %v6081_v23, %s6488_s4 }
 0x1b0   :  { %v6083_v25 = vpop.eup %6082 }
 0x1b1   :  { %v262_v26 = vadd.f32 1.0, %v6083_v25 }
 0x1b3   :  { %6084 = vrcp.f32 %v262_v26 }
 0x1bd   :  { %v6085_v27 = vpop.eup %6084 }
 0x1be   :  { %v266_v30 = vmul.f32 0.0, %v6085_v27 }
 0x221   :  { %v269_v28 = vpop.permute.xlu0 %268 }
 0x222   :  { %v271_v29 = vmul.f32 %v6085_v27, %v269_v28 }
 0x224   :  { %273 = vrot.lane.b32.xlu1 %v271_v29, %s6489_s11 }
 0x296   :  { %v274_v31 = vpop.permute.xlu1 %273 }
 0x297   :  { %v6673_v32 = vadd.f32 %v274_v31, %v266_v30 }
 0x299   :  { %6086 = vtanh.f32 %v6673_v32 }
 0x2a3   :  { %v6087_v39 = vpop.eup %6086 }
 0x2a4   :  { %279 = vrot.lane.b32.xlu1 %v6087_v39, %s6488_s4 }
 0x2a8   :  { %365 = vperm.xlu1 %6079, %v4996_v40  }
 0x316   :  { %v280_v41 = vpop.permute.xlu1 %279 }
 0x317   :  { %v282_v42 = vmul.f32 %v6085_v27, %v280_v41  ;;  %v5008_v27 = vld [vmem:[%s7714_s1 + $0x6] sm:$0x3] }
 0x319   :  { %284 = vrot.lane.b32.xlu0 %v282_v42, %s6489_s11 }
 0x327   :  { %v366_v44 = vpop.permute.xlu1 %365 }
 0x328   :  { %vm367_vm5 = vcmp.eq.s32.totalorder %v6664_v15, %v366_v44 }
 0x329   :  { %v4997_v45 = vsel %vm367_vm5, 1.0, %v6487_v9 }
 0x38b   :  { %v285_v43 = vpop.permute.xlu0 %284 }
 0x38c   :  { %288 = vst.msk [vmem:[#allocation2] sm:$0x3] %vm287_vm3, %v285_v43  ;;  %5332 = vmatmul.mubr.msk.f32.vlgmr.msra.gmra.mrb[2].mxu1 %vm111_vm4, %v285_v43 }
 0x38d   :  { %5799 = vmatpush3.bf16.msra.mxu1 %v6634_v5  ;;  %5342 = vmatprep.mubr.msk.f32.mxu1 %vm6486_vm0, %v6487_v9 }
 0x38e   :  { %5800 = vmatprep.subr.bf16.mxu1 %v6485_v1 }
 0x391   :  { %5802 = vmatpush3.bf16.msra.mxu1 %v6649_v12 }
 0x392   :  { %5803 = vmatprep.subr.bf16.mxu1 %v6485_v1 }
 0x394   :  { %5343 = vmatmul.mubr.msk.f32.vlgmr.msra.gmra.mrb[4].mxu1 %vm111_vm4, %v285_v43 }
 0x395   :  { %5805 = vmatpush3.bf16.msra.mxu1 %v6641_v10  ;;  %5351 = vmatprep.mubr.msk.f32.mxu1 %vm6486_vm0, %v6487_v9 }
 0x396   :  { %5349 = vmatprep.subr.mxu1 %v6487_v9 }
 0x399   :  { %5350 = vmatpush3.msra.mxu1 %v6654_v13 }
 0x39a   :  { %5821 = vmatprep.subr.bf16.mxu1 %v6485_v1 }
 0x39c   :  { %5352 = vmatmul.mubr.msk.f32.vlgmr.msra.gmra.mrb[4].mxu1 %vm185_vm1, %v4997_v45 }
 0x39d   :  { %5823 = vmatpush3.bf16.msra.mxu1 %v6676_v36  ;;  %5393 = vmatprep.mubr.msk.f32.mxu1 %vm6486_vm0, %v6487_v9 }
 0x39e   :  { %5824 = vmatprep.subr.bf16.mxu1 %v6485_v1 }
 0x3a1   :  { %5826 = vmatpush3.bf16.msra.mxu1 %v6681_v38 }
 0x3a2   :  { %5827 = vmatprep.subr.bf16.mxu1 %v6485_v1 }
 0x45f   :  { %v357_v46 = vpop.f32.mrb[2].mxu1 }
 0x460   :  { %361 = vst [vmem:[#allocation3] sm:$0x3] %v357_v46  ;;  %v5333_v47 = vpop.f32.mrb[3].mxu1 }
 0x46f   :  { %v509_v48 = vpop.f32.mrb[4].mxu1 }
 0x470   :  { %6088 = vtanh.f32 %v509_v48  ;;  %v5353_v49 = vpop.f32.mrb[5].mxu1  ;;  %v5000_v51 = vmul.f32 -1.442695, %v509_v48 }
 0x472   :  { %6090 = vpow2.f32 %v5000_v51 }
 0x47a   :  { %v6089_v50 = vpop.eup %6088 }
 0x47b   :  { %522 = vrot.lane.b32.xlu0 %v6089_v50, %s6488_s4  ;;  %v5014_v50 = vld [vmem:[%s7714_s1 + $0x8] sm:$0x3] }
 0x47c   :  { %v6091_v52 = vpop.eup %6090 }
 0x47d   :  { %v516_v53 = vadd.f32 1.0, %v6091_v52 }
 0x47f   :  { %6092 = vrcp.f32 %v516_v53 }
 0x489   :  { %v6093_v54 = vpop.eup %6092 }
 0x48a   :  { %v520_v57 = vmul.f32 %v6093_v54, %v6673_v32 }
 0x4ed   :  { %v523_v55 = vpop.permute.xlu0 %522 }
 0x4ee   :  { %v525_v56 = vmul.f32 %v6093_v54, %v523_v55 }
 0x4f0   :  { %527 = vrot.lane.b32.xlu1 %v525_v56, %s6489_s11 }
 0x562   :  { %v528_v58 = vpop.permute.xlu1 %527 }
 0x563   :  { %v530_v59 = vadd.f32 %v528_v58, %v520_v57 }
 0x565   :  { %6094 = vtanh.f32 %v530_v59 }
 0x56f   :  { %v6095_v60 = vpop.eup %6094 }
 0x570   :  { %533 = vrot.lane.b32.xlu0 %v6095_v60, %s6488_s4 }
 0x574   :  { %620 = vperm.xlu0 %6078, %v5002_v61  }
 0x5e2   :  { %v534_v62 = vpop.permute.xlu0 %533 }
 0x5e3   :  { %v536_v63 = vmul.f32 %v6093_v54, %v534_v62 }
 0x5e5   :  { %538 = vrot.lane.b32.xlu1 %v536_v63, %s6489_s11 }
 0x5f3   :  { %v621_v3 = vpop.permute.xlu0 %620 }
 0x5f4   :  { %vm622_vm6 = vcmp.eq.s32.totalorder %v6664_v15, %v621_v3 }
 0x5f5   :  { %v5003_v4 = vsel %vm622_vm6, 1.0, %v6487_v9 }
 0x657   :  { %v539_v2 = vpop.permute.xlu1 %538 }
 0x658   :  { %542 = vst.msk [vmem:[#allocation2 + $0x2] sm:$0x3] %vm287_vm3, %v539_v2  ;;  %5363 = vmatmul.mubr.msk.f32.vlgmr.msra.gmra.mrb[2].mxu0 %vm111_vm4, %v539_v2 }
 0x659   :  { %5814 = vmatpush3.bf16.msra.mxu0 %v6634_v5  ;;  %5373 = vmatprep.mubr.msk.f32.mxu0 %vm6486_vm0, %v6487_v9 }
 0x65a   :  { %5815 = vmatprep.subr.bf16.mxu0 %v6485_v1 }
 0x65d   :  { %5817 = vmatpush3.bf16.msra.mxu0 %v6649_v12 }
 0x65e   :  { %5818 = vmatprep.subr.bf16.mxu0 %v6485_v1 }
 0x660   :  { %5374 = vmatmul.mubr.msk.f32.vlgmr.msra.gmra.mrb[4].mxu0 %vm111_vm4, %v539_v2 }
 0x661   :  { %5820 = vmatpush3.bf16.msra.mxu0 %v6641_v10  ;;  %5382 = vmatprep.mubr.msk.f32.mxu0 %vm6486_vm0, %v6487_v9 }
 0x662   :  { %5380 = vmatprep.subr.mxu0 %v6487_v9 }
 0x665   :  { %5381 = vmatpush3.msra.mxu0 %v6654_v13 }
 0x666   :  { %5836 = vmatprep.subr.bf16.mxu0 %v6485_v1 }
 0x668   :  { %5383 = vmatmul.mubr.msk.f32.vlgmr.msra.gmra.mrb[4].mxu0 %vm185_vm1, %v5003_v4 }
 0x669   :  { %5838 = vmatpush3.bf16.msra.mxu0 %v6676_v36  ;;  %5424 = vmatprep.mubr.msk.f32.mxu0 %vm6486_vm0, %v6487_v9 }
 0x66a   :  { %5839 = vmatprep.subr.bf16.mxu0 %v6485_v1 }
 0x66d   :  { %5841 = vmatpush3.bf16.msra.mxu0 %v6681_v38 }
 0x66e   :  { %5842 = vmatprep.subr.bf16.mxu0 %v6485_v1 }
 0x72b   :  { %v611_v6 = vpop.f32.mrb[2].mxu0 }
 0x72c   :  { %616 = vst [vmem:[#allocation3 + $0x2] sm:$0x3] %v611_v6  ;;  %v5364_v7 = vpop.f32.mrb[3].mxu0 }
 0x73b   :  { %v764_v8 = vpop.f32.mrb[4].mxu0 }
 0x73c   :  { %6096 = vtanh.f32 %v764_v8  ;;  %v5384_v11 = vpop.f32.mrb[5].mxu0  ;;  %v5006_v17 = vmul.f32 -1.442695, %v764_v8 }
 0x73e   :  { %6098 = vpow2.f32 %v5006_v17 }
 0x746   :  { %v6097_v16 = vpop.eup %6096 }
 0x747   :  { %777 = vrot.lane.b32.xlu1 %v6097_v16, %s6488_s4  ;;  %v5020_v16 = vld [vmem:[%s7714_s1 + $0xa] sm:$0x3] }
 0x748   :  { %v6099_v18 = vpop.eup %6098 }
 0x749   :  { %v771_v19 = vadd.f32 1.0, %v6099_v18 }
 0x74b   :  { %6100 = vrcp.f32 %v771_v19 }
 0x755   :  { %v6101_v20 = vpop.eup %6100 }
 0x756   :  { %v775_v23 = vmul.f32 %v6101_v20, %v530_v59 }
 0x7b9   :  { %v778_v21 = vpop.permute.xlu1 %777 }
 0x7ba   :  { %v780_v22 = vmul.f32 %v6101_v20, %v778_v21 }
 0x7bc   :  { %782 = vrot.lane.b32.xlu0 %v780_v22, %s6489_s11 }
 0x82e   :  { %v783_v24 = vpop.permute.xlu0 %782 }
 0x82f   :  { %v785_v25 = vadd.f32 %v783_v24, %v775_v23 }
 0x831   :  { %6102 = vtanh.f32 %v785_v25 }
 0x83b   :  { %v6103_v26 = vpop.eup %6102 }
 0x83c   :  { %788 = vrot.lane.b32.xlu1 %v6103_v26, %s6488_s4 }
 0x840   :  { %875 = vperm.xlu1 %6079, %v5008_v27  }
 0x8ae   :  { %v789_v28 = vpop.permute.xlu1 %788 }
 0x8af   :  { %v791_v29 = vmul.f32 %v6101_v20, %v789_v28 }
 0x8b1   :  { %793 = vrot.lane.b32.xlu0 %v791_v29, %s6489_s11 }
 0x8bf   :  { %v876_v31 = vpop.permute.xlu1 %875 }
 0x8c0   :  { %vm877_vm7 = vcmp.eq.s32.totalorder %v6664_v15, %v876_v31 }
 0x8c1   :  { %v5009_v32 = vsel %vm877_vm7, 1.0, %v6487_v9 }
 0x923   :  { %v794_v30 = vpop.permute.xlu0 %793 }
 0x924   :  { %797 = vst.msk [vmem:[#allocation2 + $0x4] sm:$0x3] %vm287_vm3, %v794_v30  ;;  %5394 = vmatmul.mubr.msk.f32.vlgmr.msra.gmra.mrb[6].mxu1 %vm111_vm4, %v794_v30 }
 0x925   :  { %5829 = vmatpush3.bf16.msra.mxu1 %v6634_v5  ;;  %5404 = vmatprep.mubr.msk.f32.mxu1 %vm6486_vm0, %v6487_v9 }
 0x926   :  { %5830 = vmatprep.subr.bf16.mxu1 %v6485_v1 }
 0x929   :  { %5832 = vmatpush3.bf16.msra.mxu1 %v6649_v12 }
 0x92a   :  { %5833 = vmatprep.subr.bf16.mxu1 %v6485_v1 }
 0x92c   :  { %5405 = vmatmul.mubr.msk.f32.vlgmr.msra.gmra.mrb[8].mxu1 %vm111_vm4, %v794_v30 }
 0x92d   :  { %5835 = vmatpush3.bf16.msra.mxu1 %v6641_v10  ;;  %5413 = vmatprep.mubr.msk.f32.mxu1 %vm6486_vm0, %v6487_v9 }
 0x92e   :  { %5411 = vmatprep.subr.mxu1 %v6487_v9 }
 0x931   :  { %5412 = vmatpush3.msra.mxu1 %v6654_v13 }
 0x932   :  { %5851 = vmatprep.subr.bf16.mxu1 %v6485_v1 }
 0x934   :  { %5414 = vmatmul.mubr.msk.f32.vlgmr.msra.gmra.mrb[8].mxu1 %vm185_vm1, %v5009_v32 }
 0x935   :  { %5853 = vmatpush3.bf16.msra.mxu1 %v6676_v36  ;;  %5455 = vmatprep.mubr.msk.f32.mxu1 %vm6486_vm0, %v6487_v9 }
 0x936   :  { %5854 = vmatprep.subr.bf16.mxu1 %v6485_v1 }
 0x939   :  { %5856 = vmatpush3.bf16.msra.mxu1 %v6681_v38 }
 0x93a   :  { %5857 = vmatprep.subr.bf16.mxu1 %v6485_v1 }
 0x9f7   :  { %v866_v33 = vpop.f32.mrb[6].mxu1 }
 0x9f8   :  { %871 = vst [vmem:[#allocation3 + $0x4] sm:$0x3] %v866_v33  ;;  %v5395_v34 = vpop.f32.mrb[7].mxu1 }
 0xa07   :  { %v1019_v35 = vpop.f32.mrb[8].mxu1 }
 0xa08   :  { %6104 = vtanh.f32 %v1019_v35  ;;  %v5415_v37 = vpop.f32.mrb[9].mxu1  ;;  %v5012_v40 = vmul.f32 -1.442695, %v1019_v35 }
 0xa0a   :  { %6106 = vpow2.f32 %v5012_v40 }
 0xa12   :  { %v6105_v39 = vpop.eup %6104 }
 0xa13   :  { %1032 = vrot.lane.b32.xlu0 %v6105_v39, %s6488_s4  ;;  %v5026_v39 = vld [vmem:[%s7714_s1 + $0xc] sm:$0x3] }
 0xa14   :  { %v6107_v41 = vpop.eup %6106 }
 0xa15   :  { %v1026_v42 = vadd.f32 1.0, %v6107_v41 }
 0xa17   :  { %6108 = vrcp.f32 %v1026_v42 }
 0xa21   :  { %v6109_v43 = vpop.eup %6108 }
 0xa22   :  { %v1030_v46 = vmul.f32 %v6109_v43, %v785_v25 }
 0xa85   :  { %v1033_v44 = vpop.permute.xlu0 %1032 }
 0xa86   :  { %v1035_v45 = vmul.f32 %v6109_v43, %v1033_v44 }
 0xa88   :  { %1037 = vrot.lane.b32.xlu1 %v1035_v45, %s6489_s11 }
 0xafa   :  { %v1038_v47 = vpop.permute.xlu1 %1037 }
 0xafb   :  { %v1040_v48 = vadd.f32 %v1038_v47, %v1030_v46 }
 0xafd   :  { %6110 = vtanh.f32 %v1040_v48 }
 0xb07   :  { %v6111_v49 = vpop.eup %6110 }
 0xb08   :  { %1043 = vrot.lane.b32.xlu0 %v6111_v49, %s6488_s4 }
 0xb0c   :  { %1130 = vperm.xlu0 %6078, %v5014_v50  }
 0xb7a   :  { %v1044_v51 = vpop.permute.xlu0 %1043 }
 0xb7b   :  { %v1046_v52 = vmul.f32 %v6109_v43, %v1044_v51 }
 0xb7d   :  { %1048 = vrot.lane.b32.xlu1 %v1046_v52, %s6489_s11 }
 0xb8b   :  { %v1131_v54 = vpop.permute.xlu0 %1130 }
 0xb8c   :  { %vm1132_vm8 = vcmp.eq.s32.totalorder %v6664_v15, %v1131_v54 }
 0xb8d   :  { %v5015_v55 = vsel %vm1132_vm8, 1.0, %v6487_v9 }
 0xbef   :  { %v1049_v53 = vpop.permute.xlu1 %1048 }
 0xbf0   :  { %1052 = vst.msk [vmem:[#allocation2 + $0x6] sm:$0x3] %vm287_vm3, %v1049_v53  ;;  %5425 = vmatmul.mubr.msk.f32.vlgmr.msra.gmra.mrb[6].mxu0 %vm111_vm4, %v1049_v53 }
 0xbf1   :  { %5844 = vmatpush3.bf16.msra.mxu0 %v6634_v5  ;;  %5435 = vmatprep.mubr.msk.f32.mxu0 %vm6486_vm0, %v6487_v9 }
 0xbf2   :  { %5845 = vmatprep.subr.bf16.mxu0 %v6485_v1 }
 0xbf5   :  { %5847 = vmatpush3.bf16.msra.mxu0 %v6649_v12 }
 0xbf6   :  { %5848 = vmatprep.subr.bf16.mxu0 %v6485_v1 }
 0xbf8   :  { %5436 = vmatmul.mubr.msk.f32.vlgmr.msra.gmra.mrb[8].mxu0 %vm111_vm4, %v1049_v53 }
 0xbf9   :  { %5850 = vmatpush3.bf16.msra.mxu0 %v6641_v10  ;;  %5444 = vmatprep.mubr.msk.f32.mxu0 %vm6486_vm0, %v6487_v9 }
 0xbfa   :  { %5442 = vmatprep.subr.mxu0 %v6487_v9 }
 0xbfd   :  { %5443 = vmatpush3.msra.mxu0 %v6654_v13 }
 0xbfe   :  { %5866 = vmatprep.subr.bf16.mxu0 %v6485_v1 }
 0xc00   :  { %5445 = vmatmul.mubr.msk.f32.vlgmr.msra.gmra.mrb[8].mxu0 %vm185_vm1, %v5015_v55 }
 0xc01   :  { %5868 = vmatpush3.bf16.msra.mxu0 %v6676_v36  ;;  %5486 = vmatprep.mubr.msk.f32.mxu0 %vm6486_vm0, %v6487_v9 }
 0xc02   :  { %5869 = vmatprep.subr.bf16.mxu0 %v6485_v1 }
 0xc05   :  { %5871 = vmatpush3.bf16.msra.mxu0 %v6681_v38 }
 0xc06   :  { %5872 = vmatprep.subr.bf16.mxu0 %v6485_v1 }
 0xcc3   :  { %v1121_v56 = vpop.f32.mrb[6].mxu0 }
 0xcc4   :  { %1126 = vst [vmem:[#allocation3 + $0x6] sm:$0x3] %v1121_v56  ;;  %v5426_v57 = vpop.f32.mrb[7].mxu0 }
 0xcd3   :  { %v1274_v58 = vpop.f32.mrb[8].mxu0 }
 0xcd4   :  { %6112 = vtanh.f32 %v1274_v58  ;;  %v5446_v59 = vpop.f32.mrb[9].mxu0  ;;  %v5018_v61 = vmul.f32 -1.442695, %v1274_v58  ;;  %v5032_v58 = vld [vmem:[%s7714_s1 + $0xe] sm:$0x3] }
 0xcd6   :  { %6114 = vpow2.f32 %v5018_v61 }
 0xcde   :  { %v6113_v60 = vpop.eup %6112 }
 0xcdf   :  { %1287 = vrot.lane.b32.xlu1 %v6113_v60, %s6488_s4 }
 0xce0   :  { %v6115_v62 = vpop.eup %6114 }
 0xce1   :  { %v1281_v63 = vadd.f32 1.0, %v6115_v62 }
 0xce3   :  { %6116 = vrcp.f32 %v1281_v63 }
 0xced   :  { %v6117_v2 = vpop.eup %6116 }
 0xcee   :  { %v1285_v6 = vmul.f32 %v6117_v2, %v1040_v48 }
 0xd51   :  { %v1288_v3 = vpop.permute.xlu1 %1287 }
 0xd52   :  { %v1290_v4 = vmul.f32 %v6117_v2, %v1288_v3 }
 0xd54   :  { %1292 = vrot.lane.b32.xlu0 %v1290_v4, %s6489_s11 }
 0xdc6   :  { %v1293_v7 = vpop.permute.xlu0 %1292 }
 0xdc7   :  { %v1295_v8 = vadd.f32 %v1293_v7, %v1285_v6 }
 0xdc9   :  { %6118 = vtanh.f32 %v1295_v8 }
 0xdd3   :  { %v6119_v11 = vpop.eup %6118 }
 0xdd4   :  { %1298 = vrot.lane.b32.xlu1 %v6119_v11, %s6488_s4 }
 0xdd8   :  { %1385 = vperm.xlu1 %6079, %v5020_v16   ;;  %v2177_v16 = vld [vmem:[%s7715_s2] sm:$0x3] }
 0xe46   :  { %v1299_v17 = vpop.permute.xlu1 %1298 }
 0xe47   :  { %v1301_v18 = vmul.f32 %v6117_v2, %v1299_v17 }
 0xe49   :  { %1303 = vrot.lane.b32.xlu0 %v1301_v18, %s6489_s11 }
 0xe57   :  { %v1386_v20 = vpop.permute.xlu1 %1385 }
 0xe58   :  { %vm1387_vm9 = vcmp.eq.s32.totalorder %v6664_v15, %v1386_v20 }
 0xe59   :  { %v5021_v21 = vsel %vm1387_vm9, 1.0, %v6487_v9 }
 0xebb   :  { %v1304_v19 = vpop.permute.xlu0 %1303 }
 0xebc   :  { %1307 = vst.msk [vmem:[#allocation2 + $0x8] sm:$0x3] %vm287_vm3, %v1304_v19  ;;  %5456 = vmatmul.mubr.msk.f32.vlgmr.msra.gmra.mrb[10].mxu1 %vm111_vm4, %v1304_v19 }
 0xebd   :  { %5859 = vmatpush3.bf16.msra.mxu1 %v6634_v5  ;;  %5466 = vmatprep.mubr.msk.f32.mxu1 %vm6486_vm0, %v6487_v9 }
 0xebe   :  { %5860 = vmatprep.subr.bf16.mxu1 %v6485_v1 }
 0xec1   :  { %5862 = vmatpush3.bf16.msra.mxu1 %v6649_v12 }
 0xec2   :  { %5863 = vmatprep.subr.bf16.mxu1 %v6485_v1 }
 0xec4   :  { %5467 = vmatmul.mubr.msk.f32.vlgmr.msra.gmra.mrb[12].mxu1 %vm111_vm4, %v1304_v19 }
 0xec5   :  { %5865 = vmatpush3.bf16.msra.mxu1 %v6641_v10  ;;  %5475 = vmatprep.mubr.msk.f32.mxu1 %vm6486_vm0, %v6487_v9 }
 0xec6   :  { %5473 = vmatprep.subr.mxu1 %v6487_v9 }
 0xec9   :  { %5474 = vmatpush3.msra.mxu1 %v6654_v13 }
 0xeca   :  { %5881 = vmatprep.subr.bf16.mxu1 %v6485_v1 }
 0xecc   :  { %5476 = vmatmul.mubr.msk.f32.vlgmr.msra.gmra.mrb[12].mxu1 %vm185_vm1, %v5021_v21 }
 0xecd   :  { %5883 = vmatpush3.bf16.msra.mxu1 %v6676_v36  ;;  %5517 = vmatprep.mubr.msk.f32.mxu1 %vm6486_vm0, %v6487_v9 }
 0xece   :  { %5884 = vmatprep.subr.bf16.mxu1 %v6485_v1 }
 0xed1   :  { %5886 = vmatpush3.bf16.msra.mxu1 %v6681_v38 }
 0xed2   :  { %5887 = vmatprep.subr.bf16.mxu1 %v6485_v1 }
 0xf8f   :  { %v1376_v22 = vpop.f32.mrb[10].mxu1 }
 0xf90   :  { %1381 = vst [vmem:[#allocation3 + $0x8] sm:$0x3] %v1376_v22  ;;  %v5457_v23 = vpop.f32.mrb[11].mxu1 }
 0xf91   :  { %v2164_v23 = vld [vmem:[%s7719_s6] sm:$0xff] }
 0xf9f   :  { %v1529_v24 = vpop.f32.mrb[12].mxu1 }
 0xfa0   :  { %6120 = vtanh.f32 %v1529_v24  ;;  %v5477_v25 = vpop.f32.mrb[13].mxu1  ;;  %v5024_v27 = vmul.f32 -1.442695, %v1529_v24  ;;  %v2165_v24 = vld [vmem:[%s7719_s6 + $0x8] sm:$0xff] }
 0xfa1   :  { %v6918_v25 = vpack.c.bf16 %v2165_v24, %v2164_v23 }
 0xfa2   :  { %6122 = vpow2.f32 %v5024_v27  ;;  %v2167_v27 = vld [vmem:[%s7719_s6 + $0x18] sm:$0xff] }
 0xfaa   :  { %v6121_v26 = vpop.eup %6120 }
 0xfab   :  { %1542 = vrot.lane.b32.xlu0 %v6121_v26, %s6488_s4  ;;  %v2166_v26 = vld [vmem:[%s7719_s6 + $0x10] sm:$0xff] }
 0xfac   :  { %v6123_v28 = vpop.eup %6122 }
 0xfad   :  { %v1536_v29 = vadd.f32 1.0, %v6123_v28 }
 0xfaf   :  { %6124 = vrcp.f32 %v1536_v29  ;;  %v6926_v29 = vld [vmem:[#allocation2 + $0x2] sm:$0x3] }
 0xfb9   :  { %v6125_v30 = vpop.eup %6124 }
 0xfba   :  { %v1540_v33 = vmul.f32 %v6125_v30, %v1295_v8 }
0x101d   :  { %v1543_v31 = vpop.permute.xlu0 %1542 }
0x101e   :  { %v1545_v32 = vmul.f32 %v6125_v30, %v1543_v31 }
0x1020   :  { %1547 = vrot.lane.b32.xlu1 %v1545_v32, %s6489_s11 }
0x1092   :  { %v1548_v34 = vpop.permute.xlu1 %1547 }
0x1093   :  { %v1550_v35 = vadd.f32 %v1548_v34, %v1540_v33  ;;  %v6935_v34 = vpack.c.bf16 %v2167_v27, %v2166_v26 }
0x1095   :  { %6126 = vtanh.f32 %v1550_v35 }
0x109f   :  { %v6127_v37 = vpop.eup %6126 }
0x10a0   :  { %1553 = vrot.lane.b32.xlu0 %v6127_v37, %s6488_s4  ;;  %v6941_v37 = vld [vmem:[#allocation2 + $0x6] sm:$0x3] }
0x10a4   :  { %1640 = vperm.xlu0 %6078, %v5026_v39  }
0x1112   :  { %v1554_v40 = vpop.permute.xlu0 %1553 }
0x1113   :  { %v1556_v41 = vmul.f32 %v6125_v30, %v1554_v40  ;;  %v6928_v30 = vld [vmem:[#allocation2] sm:$0x3] }
0x1115   :  { %1558 = vrot.lane.b32.xlu1 %v1556_v41, %s6489_s11 }
0x1123   :  { %v1641_v43 = vpop.permute.xlu0 %1640 }
0x1124   :  { %vm1642_vm10 = vcmp.eq.s32.totalorder %v6664_v15, %v1641_v43  ;;  %v2168_v43 = vld [vmem:[#allocation9] sm:$0xff] }
0x1125   :  { %v5027_v44 = vsel %vm1642_vm10, 1.0, %v6487_v9 }
0x1187   :  { %v1559_v42 = vpop.permute.xlu1 %1558 }
0x1188   :  { %1562 = vst.msk [vmem:[#allocation2 + $0xa] sm:$0x3] %vm287_vm3, %v1559_v42  ;;  %5487 = vmatmul.mubr.msk.f32.vlgmr.msra.gmra.mrb[10].mxu0 %vm111_vm4, %v1559_v42 }
0x1189   :  { %5874 = vmatpush3.bf16.msra.mxu0 %v6634_v5  ;;  %5497 = vmatprep.mubr.msk.f32.mxu0 %vm6486_vm0, %v6487_v9 }
0x118a   :  { %5875 = vmatprep.subr.bf16.mxu0 %v6485_v1 }
0x118d   :  { %5877 = vmatpush3.bf16.msra.mxu0 %v6649_v12 }
0x118e   :  { %5878 = vmatprep.subr.bf16.mxu0 %v6485_v1 }
0x1190   :  { %5498 = vmatmul.mubr.msk.f32.vlgmr.msra.gmra.mrb[12].mxu0 %vm111_vm4, %v1559_v42 }
0x1191   :  { %5880 = vmatpush3.bf16.msra.mxu0 %v6641_v10  ;;  %5506 = vmatprep.mubr.msk.f32.mxu0 %vm6486_vm0, %v6487_v9 }
0x1192   :  { %5504 = vmatprep.subr.mxu0 %v6487_v9 }
0x1195   :  { %5505 = vmatpush3.msra.mxu0 %v6654_v13 }
0x1196   :  { %5896 = vmatprep.subr.bf16.mxu0 %v6485_v1 }
0x1198   :  { %5507 = vmatmul.mubr.msk.f32.vlgmr.msra.gmra.mrb[12].mxu0 %vm185_vm1, %v5027_v44  ;;  %v2169_v44 = vld [vmem:[#allocation9 + $0x8] sm:$0xff] }
0x1199   :  { %5898 = vmatpush3.bf16.msra.mxu0 %v6676_v36  ;;  %5548 = vmatprep.mubr.msk.f32.mxu0 %vm6486_vm0, %v6487_v9 }
0x119a   :  { %5899 = vmatprep.subr.bf16.mxu0 %v6485_v1 }
0x119d   :  { %5901 = vmatpush3.bf16.msra.mxu0 %v6681_v38 }
0x119e   :  { %5902 = vmatprep.subr.bf16.mxu0 %v6485_v1 }
0x125b   :  { %v1631_v45 = vpop.f32.mrb[10].mxu0 }
0x125c   :  { %1636 = vst [vmem:[#allocation3 + $0xa] sm:$0x3] %v1631_v45  ;;  %v5488_v46 = vpop.f32.mrb[11].mxu0  ;;  %v6950_v45 = vpack.c.bf16 %v2169_v44, %v2168_v43 }
0x125d   :  { %v6952_v46 = vld [vmem:[#allocation2 + $0x8] sm:$0x3] }
0x126b   :  { %v1784_v47 = vpop.f32.mrb[12].mxu0 }
0x126c   :  { %6128 = vtanh.f32 %v1784_v47  ;;  %v5508_v48 = vpop.f32.mrb[13].mxu0  ;;  %v5030_v50 = vmul.f32 -1.442695, %v1784_v47  ;;  %v6954_v47 = vld [vmem:[#allocation2 + $0xa] sm:$0x3] }
0x126e   :  { %6130 = vpow2.f32 %v5030_v50 }
0x1276   :  { %v6129_v49 = vpop.eup %6128 }
0x1277   :  { %1797 = vrot.lane.b32.xlu1 %v6129_v49, %s6488_s4 }
0x1278   :  { %v6131_v36 = vpop.eup %6130 }
0x1279   :  { %v1791_v51 = vadd.f32 1.0, %v6131_v36 }
0x127b   :  { %6132 = vrcp.f32 %v1791_v51  ;;  %v2170_v51 = vld [vmem:[#allocation9 + $0x10] sm:$0xff] }
0x1285   :  { %v6133_v52 = vpop.eup %6132 }
0x1286   :  { %v1795_v38 = vmul.f32 %v6133_v52, %v1550_v35  ;;  %v6939_v35 = vld [vmem:[#allocation2 + $0x4] sm:$0x3] }
0x12e9   :  { %v1798_v53 = vpop.permute.xlu1 %1797 }
0x12ea   :  { %v1800_v54 = vmul.f32 %v6133_v52, %v1798_v53 }
0x12ec   :  { %1802 = vrot.lane.b32.xlu0 %v1800_v54, %s6489_s11 }
0x135e   :  { %v1803_v55 = vpop.permute.xlu0 %1802 }
0x135f   :  { %v1805_v56 = vadd.f32 %v1803_v55, %v1795_v38 }
0x1361   :  { %6134 = vtanh.f32 %v1805_v56 }
0x136b   :  { %v6135_v57 = vpop.eup %6134 }
0x136c   :  { %1808 = vrot.lane.b32.xlu1 %v6135_v57, %s6488_s4 }
0x1370   :  { %1895 = vperm.xlu1 %6079, %v5032_v58  }
0x13de   :  { %v1809_v59 = vpop.permute.xlu1 %1808 }
0x13df   :  { %v1811_v60 = vmul.f32 %v6133_v52, %v1809_v59  ;;  %v2171_v52 = vld [vmem:[#allocation9 + $0x18] sm:$0xff] }
0x13e0   :  { %v6966_v38 = vpack.c.bf16 %v2171_v52, %v2170_v51 }
0x13e1   :  { %1813 = vrot.lane.b32.xlu0 %v1811_v60, %s6489_s11 }
0x13ef   :  { %v1896_v62 = vpop.permute.xlu1 %1895 }
0x13f0   :  { %vm1897_vm11 = vcmp.eq.s32.totalorder %v6664_v15, %v1896_v62 }
0x1453   :  { %v1814_v61 = vpop.permute.xlu0 %1813 }
0x1454   :  { %1817 = vst.msk [vmem:[#allocation2 + $0xc] sm:$0x3] %vm287_vm3, %v1814_v61  ;;  %5518 = vmatmul.mubr.msk.f32.vlgmr.msra.gmra.mrb[14].mxu1 %vm111_vm4, %v1814_v61 }
0x1455   :  { %5889 = vmatpush3.bf16.msra.mxu1 %v6634_v5  ;;  %5528 = vmatprep.mubr.msk.f32.mxu1 %vm6486_vm0, %v6487_v9  ;;  %v5033_v5 = vsel %vm1897_vm11, 1.0, %v6487_v9 }
0x1456   :  { %5890 = vmatprep.subr.bf16.mxu1 %v6485_v1 }
0x1459   :  { %5892 = vmatpush3.bf16.msra.mxu1 %v6649_v12 }
0x145a   :  { %5893 = vmatprep.subr.bf16.mxu1 %v6485_v1 }
0x145b   :  { %v6970_v55 = vld [vmem:[#allocation2 + $0xc] sm:$0x3] }
0x145c   :  { %5529 = vmatmul.mubr.msk.f32.vlgmr.msra.gmra.mrb[16].mxu1 %vm111_vm4, %v1814_v61 }
0x145d   :  { %5895 = vmatpush3.bf16.msra.mxu1 %v6641_v10  ;;  %5537 = vmatprep.mubr.msk.f32.mxu1 %vm6486_vm0, %v6487_v9 }
0x145e   :  { %5535 = vmatprep.subr.mxu1 %v6487_v9 }
0x1461   :  { %5536 = vmatpush3.msra.mxu1 %v6654_v13 }
0x1462   :  { %5914 = vmatprep.subr.bf16.mxu1 %v6485_v1 }
0x1464   :  { %5538 = vmatmul.mubr.msk.f32.vlgmr.msra.gmra.mrb[16].mxu1 %vm185_vm1, %v5033_v5 }
0x1465   :  { %5581 = vmatprep.mubr.msk.f32.mxu1 %vm6486_vm0, %v6487_v9 }
0x1527   :  { %v1886_v12 = vpop.f32.mrb[14].mxu1 }
0x1528   :  { %1891 = vst [vmem:[#allocation3 + $0xc] sm:$0x3] %v1886_v12  ;;  %v5519_v10 = vpop.f32.mrb[15].mxu1 }
0x1537   :  { %v2039_v63 = vpop.f32.mrb[16].mxu1 }
0x1538   :  { %6136 = vtanh.f32 %v2039_v63  ;;  %v5539_v2 = vpop.f32.mrb[17].mxu1  ;;  %v5036_v4 = vmul.f32 -1.442695, %v2039_v63 }
0x153a   :  { %6138 = vpow2.f32 %v5036_v4 }
0x1542   :  { %v6137_v3 = vpop.eup %6136 }
0x1543   :  { %2052 = vrot.lane.b32.xlu0 %v6137_v3, %s6488_s4 }
0x1544   :  { %v6139_v13 = vpop.eup %6138 }
0x1545   :  { %v2046_v6 = vadd.f32 1.0, %v6139_v13 }
0x1547   :  { %6140 = vrcp.f32 %v2046_v6 }
0x1551   :  { %v6141_v7 = vpop.eup %6140 }
0x1552   :  { %v2050_v17 = vmul.f32 %v6141_v7, %v1805_v56 }
0x15b5   :  { %v2053_v8 = vpop.permute.xlu0 %2052 }
0x15b6   :  { %v2055_v11 = vmul.f32 %v6141_v7, %v2053_v8 }
0x15b8   :  { %2057 = vrot.lane.b32.xlu1 %v2055_v11, %s6489_s11 }
0x15bc   :  { %2179 = vperm.xlu1 %6079, %v2177_v16  }
0x162a   :  { %v2058_v18 = vpop.permute.xlu1 %2057 }
0x162b   :  { %v6907_v19 = vadd.f32 %v2058_v18, %v2050_v17 }
0x162d   :  { %6142 = vtanh.f32 %v6907_v19 }
0x1637   :  { %v6143_v20 = vpop.eup %6142 }
0x1638   :  { %2063 = vrot.lane.b32.xlu0 %v6143_v20, %s6488_s4 }
0x163b   :  { %v2180_v33 = vpop.permute.xlu1 %2179 }
0x163c   :  { %vm2181_vm12 = vcmp.eq.s32.totalorder %v6664_v15, %v2180_v33 }
0x163d   :  { %v5038_v53 = vsel %vm2181_vm12, 1.0, %v6487_v9 }
0x16aa   :  { %v2064_v21 = vpop.permute.xlu0 %2063 }
0x16ab   :  { %v2066_v22 = vmul.f32 %v6141_v7, %v2064_v21 }
0x16ad   :  { %2068 = vrot.lane.b32.xlu0 %v2066_v22, %s6489_s11 }
0x171f   :  { %v2069_v28 = vpop.permute.xlu0 %2068 }
0x1720   :  { %2072 = vst.msk [vmem:[#allocation2 + $0xe] sm:$0x3] %vm287_vm3, %v2069_v28  ;;  %5549 = vmatmul.mubr.msk.f32.vlgmr.msra.gmra.mrb[14].mxu0 %vm111_vm4, %v2069_v28  ;;  %v2185_v31 = vmul.f32 %v6926_v29, %v2069_v28  ;;  %v2184_v32 = vmul.f32 %v6928_v30, %v2069_v28  ;;  %v2186_v41 = vmul.f32 %v6939_v35, %v2069_v28 }
0x1721   :  { %5904 = vmatpush3.bf16.msra.mxu0 %v6918_v25  ;;  %5559 = vmatprep.mubr.msk.f32.mxu0 %vm6486_vm0, %v6487_v9  ;;  %v2187_v42 = vmul.f32 %v6941_v37, %v2069_v28  ;;  %v2188_v50 = vmul.f32 %v6952_v46, %v2069_v28  ;;  %v2189_v36 = vmul.f32 %v6954_v47, %v2069_v28 }
0x1722   :  { %5905 = vmatprep.subr.bf16.mxu0 %v6485_v1  ;;  %v2195_v39 = vsel %vm287_vm3, %v2185_v31, 0.0  ;;  %v2192_v40 = vsel %vm287_vm3, %v2184_v32, 0.0  ;;  %v2198_v48 = vsel %vm287_vm3, %v2186_v41, 0.0  ;;  %v2190_v58 = vmul.f32 %v6970_v55, %v2069_v28 }
0x1723   :  { %2196 = vadd.xlane.f32.xlu0 %v2195_v39  ;;  %2193 = vadd.xlane.f32.xlu1 %v2192_v40  ;;  %v2201_v49 = vsel %vm287_vm3, %v2187_v42, 0.0  ;;  %v2204_v56 = vsel %vm287_vm3, %v2188_v50, 0.0  ;;  %v2207_v57 = vsel %vm287_vm3, %v2189_v36, 0.0 }
0x1724   :  { %v2210_v60 = vsel %vm287_vm3, %v2190_v58, 0.0 }
0x1725   :  { %5907 = vmatpush3.bf16.msra.mxu0 %v6935_v34 }
0x1726   :  { %5908 = vmatprep.subr.bf16.mxu0 %v6485_v1 }
0x1727   :  { %2199 = vadd.xlane.f32.xlu0 %v2198_v48  ;;  %2202 = vadd.xlane.f32.xlu1 %v2201_v49  ;;  %v6962_v54 = vld [vmem:[#allocation2 + $0xe] sm:$0x3] }
0x1728   :  { %5560 = vmatmul.mubr.msk.f32.vlgmr.msra.gmra.mrb[16].mxu0 %vm111_vm4, %v5038_v53  ;;  %v2191_v59 = vmul.f32 %v6962_v54, %v2069_v28 }
0x1729   :  { %5910 = vmatpush3.bf16.msra.mxu0 %v6950_v45  ;;  %5570 = vmatprep.mubr.msk.f32.mxu0 %vm6486_vm0, %v6487_v9 }
0x172a   :  { %5911 = vmatprep.subr.bf16.mxu0 %v6485_v1  ;;  %v2213_v61 = vsel %vm287_vm3, %v2191_v59, 0.0 }
0x172b   :  { %2205 = vadd.xlane.f32.xlu0 %v2204_v56  ;;  %2208 = vadd.xlane.f32.xlu1 %v2207_v57 }
0x172d   :  { %5913 = vmatpush3.bf16.msra.mxu0 %v6966_v38 }
0x172e   :  { %5932 = vmatprep.subr.bf16.mxu0 %v6485_v1 }
0x172f   :  { %2211 = vadd.xlane.f32.xlu0 %v2210_v60  ;;  %2214 = vadd.xlane.f32.xlu1 %v2213_v61 }
0x1730   :  { %5571 = vmatmul.mubr.msk.f32.vlgmr.msra.gmra.mrb[16].mxu0 %vm111_vm4, %v2069_v28 }
0x1731   :  { %5614 = vmatprep.mubr.msk.f32.mxu0 %vm6486_vm0, %v6487_v9 }
0x17b0   :  { %v2197_v62 = vpop.xlane.xlu0 %2196  ;;  %v2194_v5 = vpop.xlane.xlu1 %2193 }
0x17b1   :  { %v2218_v13 = vsel %vm2216_vm13, %v2197_v62, -inf  ;;  %v2217_v6 = vsel %vm2216_vm13, %v2194_v5, -inf }
0x17b4   :  { %v2200_v12 = vpop.xlane.xlu0 %2199  ;;  %v2203_v10 = vpop.xlane.xlu1 %2202 }
0x17b5   :  { %v2219_v17 = vsel %vm2216_vm13, %v2200_v12, -inf  ;;  %v2220_v18 = vsel %vm2216_vm13, %v2203_v10, -inf }
0x17b8   :  { %v2206_v63 = vpop.xlane.xlu0 %2205  ;;  %v2209_v2 = vpop.xlane.xlu1 %2208 }
0x17b9   :  { %v2221_v3 = vsel %vm2216_vm13, %v2206_v63, -inf  ;;  %v2223_v4 = vsel %vm2216_vm13, %v2209_v2, -inf }
0x17ba   :  { %v2222_v7 = vmax.f32 %v2217_v6, %v2221_v3  ;;  %v2224_v8 = vmax.f32 %v2218_v13, %v2223_v4 }
0x17bc   :  { %v2212_v11 = vpop.xlane.xlu0 %2211  ;;  %v2215_v16 = vpop.xlane.xlu1 %2214  ;;  %v2229_v24 = vmax.f32 %v2222_v7, %v2224_v8 }
0x17bd   :  { %v2225_v20 = vsel %vm2216_vm13, %v2212_v11, -inf  ;;  %v2227_v21 = vsel %vm2216_vm13, %v2215_v16, -inf }
0x17be   :  { %v2226_v22 = vmax.f32 %v2219_v17, %v2225_v20  ;;  %v2228_v23 = vmax.f32 %v2220_v18, %v2227_v21 }
0x17c0   :  { %v2230_v26 = vmax.f32 %v2226_v22, %v2228_v23 }
0x17c2   :  { %v2231_v27 = vmax.f32 %v2229_v24, %v2230_v26  ;;  %v7000_v26 = vld [vmem:[#allocation3] sm:$0x3] }
0x17c4   :  { %v2232_v28 = vsub.f32 %v2194_v5, %v2231_v27  ;;  %v2233_v31 = vsub.f32 %v2197_v62, %v2231_v27  ;;  %v2234_v32 = vsub.f32 %v2200_v12, %v2231_v27  ;;  %v2235_v33 = vsub.f32 %v2203_v10, %v2231_v27 }
0x17c5   :  { %v2236_v39 = vsub.f32 %v2206_v63, %v2231_v27  ;;  %v2237_v43 = vsub.f32 %v2209_v2, %v2231_v27  ;;  %v2238_v48 = vsub.f32 %v2212_v11, %v2231_v27  ;;  %v2239_v50 = vsub.f32 %v2215_v16, %v2231_v27  ;;  %v7002_v27 = vld [vmem:[#allocation3 + $0x2] sm:$0x3] }
0x17c6   :  { %v2240_v40 = vmul.f32 1.442695, %v2232_v28  ;;  %v2242_v41 = vmul.f32 1.442695, %v2233_v31  ;;  %v2244_v42 = vmul.f32 1.442695, %v2234_v32 }
0x17c7   :  { %v2246_v44 = vmul.f32 1.442695, %v2235_v33  ;;  %v2248_v49 = vmul.f32 1.442695, %v2236_v39  ;;  %v2250_v36 = vmul.f32 1.442695, %v2237_v43 }
0x17c8   :  { %6144 = vpow2.f32 %v2240_v40  ;;  %v2252_v51 = vmul.f32 1.442695, %v2238_v48  ;;  %v2254_v52 = vmul.f32 1.442695, %v2239_v50  ;;  %v7004_v28 = vld [vmem:[#allocation3 + $0x4] sm:$0x3] }
0x17c9   :  { %6146 = vpow2.f32 %v2242_v41  ;;  %v7009_v40 = vld [vmem:[#allocation3 + $0x6] sm:$0x3] }
0x17ca   :  { %6148 = vpow2.f32 %v2244_v42 }
0x17cb   :  { %6150 = vpow2.f32 %v2246_v44 }
0x17cc   :  { %6152 = vpow2.f32 %v2248_v49  ;;  %v7014_v49 = vld [vmem:[#allocation3 + $0x8] sm:$0x3] }
0x17cd   :  { %6154 = vpow2.f32 %v2250_v36 }
0x17ce   :  { %6156 = vpow2.f32 %v2252_v51 }
0x17cf   :  { %6158 = vpow2.f32 %v2254_v52 }
0x17d2   :  { %v6145_v53 = vpop.eup %6144 }
0x17d3   :  { %v6147_v56 = vpop.eup %6146  ;;  %v2256_v57 = vsel %vm2216_vm13, %v6145_v53, 0.0 }
0x17d4   :  { %v6149_v58 = vpop.eup %6148  ;;  %v2257_v59 = vsel %vm2216_vm13, %v6147_v56, 0.0 }
0x17d5   :  { %v6151_v60 = vpop.eup %6150  ;;  %v2258_v61 = vadd.f32 %v2257_v59, %v2256_v57  ;;  %v2259_v62 = vsel %vm2216_vm13, %v6149_v58, 0.0 }
0x17d6   :  { %v6153_v5 = vpop.eup %6152  ;;  %v2261_v10 = vsel %vm2216_vm13, %v6151_v60, 0.0 }
0x17d7   :  { %v2260_v12 = vadd.f32 %v2259_v62, %v2258_v61  ;;  %v6155_v63 = vpop.eup %6154  ;;  %v2263_v3 = vsel %vm2216_vm13, %v6153_v5, 0.0  ;;  %v7022_v61 = vld [vmem:[#allocation3 + $0xc] sm:$0x3] }
0x17d8   :  { %v6157_v4 = vpop.eup %6156  ;;  %v2265_v6 = vsel %vm2216_vm13, %v6155_v63, 0.0 }
0x17d9   :  { %v2262_v2 = vadd.f32 %v2261_v10, %v2260_v12  ;;  %v6159_v7 = vpop.eup %6158  ;;  %v2267_v11 = vsel %vm2216_vm13, %v6157_v4, 0.0 }
0x17da   :  { %v2269_v17 = vsel %vm2216_vm13, %v6159_v7, 0.0 }
0x17db   :  { %v2264_v13 = vadd.f32 %v2263_v3, %v2262_v2 }
0x17dd   :  { %v2266_v8 = vadd.f32 %v2265_v6, %v2264_v13 }
0x17df   :  { %v2268_v16 = vadd.f32 %v2267_v11, %v2266_v8 }
0x17e1   :  { %v2270_v18 = vadd.f32 %v2269_v17, %v2268_v16 }
0x17e3   :  { %6160 = vrcp.f32 %v2270_v18 }
0x17ed   :  { %v6161_v20 = vpop.eup %6160 }
0x17ee   :  { %v2272_v21 = vmul.f32 %v6161_v20, %v6145_v53  ;;  %v2273_v22 = vmul.f32 %v6161_v20, %v6147_v56  ;;  %v2274_v23 = vmul.f32 %v6161_v20, %v6149_v58  ;;  %v2275_v24 = vmul.f32 %v6161_v20, %v6151_v60  ;;  %v7018_v53 = vld [vmem:[#allocation3 + $0xa] sm:$0x3] }
0x17ef   :  { %v2276_v31 = vmul.f32 %v6161_v20, %v6153_v5  ;;  %v2277_v41 = vmul.f32 %v6161_v20, %v6155_v63  ;;  %v2278_v56 = vmul.f32 %v6161_v20, %v6157_v4  ;;  %v2279_v10 = vmul.f32 %v6161_v20, %v6159_v7 }
0x17f0   :  { %v2280_v32 = vmul.f32 %v2272_v21, %v7000_v26  ;;  %v2281_v33 = vmul.f32 %v2273_v22, %v7002_v27  ;;  %v2282_v39 = vmul.f32 %v2274_v23, %v7004_v28  ;;  %v2283_v42 = vmul.f32 %v2275_v24, %v7009_v40 }
0x17f1   :  { %v2284_v51 = vmul.f32 %v2276_v31, %v7014_v49  ;;  %v2285_v58 = vmul.f32 %v2277_v41, %v7018_v53  ;;  %v2286_v5 = vmul.f32 %v2278_v56, %v7022_v61  ;;  %v2172_v41 = vld [vmem:[#allocation10] sm:$0xff]  ;;  %v7065_v56 = vld [vmem:[%s7722_s9] ss:$0 sm:$0xff] }
0x17f2   :  { %v2288_v43 = vsel %vm2216_vm13, %v2280_v32, 0.0  ;;  %v2289_v44 = vsel %vm2216_vm13, %v2281_v33, 0.0  ;;  %v2291_v52 = vsel %vm2216_vm13, %v2282_v39, 0.0  ;;  %v2293_v59 = vsel %vm2216_vm13, %v2283_v42, 0.0  ;;  %v2173_v42 = vld [vmem:[#allocation10 + $0x8] sm:$0xff] }
0x17f3   :  { %v2141_v48 = vpop.f32.mrb[14].mxu0  ;;  %v2290_v50 = vadd.f32 %v2289_v44, %v2288_v43  ;;  %v2295_v62 = vsel %vm2216_vm13, %v2284_v51, 0.0  ;;  %v2297_v63 = vsel %vm2216_vm13, %v2285_v58, 0.0  ;;  %v2299_v13 = vsel %vm2216_vm13, %v2286_v5, 0.0  ;;  %v2174_v43 = vld [vmem:[#allocation10 + $0x10] sm:$0xff] }
0x17f4   :  { %2146 = vst [vmem:[#allocation3 + $0xe] sm:$0x3] %v2141_v48  ;;  %v5550_v36 = vpop.f32.mrb[15].mxu0  ;;  %v7038_v44 = vpack.c.bf16 %v2173_v42, %v2172_v41  ;;  %v2175_v48 = vld [vmem:[#allocation10 + $0x18] sm:$0xff]  ;;  %v5044_v41 = vld [vmem:[%s7713_s0 + $0x1] sm:$0x1] }
0x17f5   :  { %v2292_v57 = vadd.f32 %v2291_v52, %v2290_v50  ;;  %v7041_v50 = vpack.c.bf16 %v2175_v48, %v2174_v43  ;;  %v2582_v42 = vshrl.u32 %v102_v14, 7  ;;  %vm2577_vm1 = vcmp.gt.s32.totalorder %v5044_v41, 0 }
0x17f6   :  { %5916 = vmatpush3.bf16.msra.mxu1 %v7038_v44  ;;  %5934 = vmatpush3.bf16.msra.mxu0 %v7038_v44  ;;  %v2580_v48 = vsel %vm2577_vm1, 1, %v6484_v0 }
0x17f7   :  { %v2294_v60 = vadd.f32 %v2293_v59, %v2292_v57  ;;  %5917 = vmatprep.subr.bf16.mxu1 %v6485_v1  ;;  %5935 = vmatprep.subr.bf16.mxu0 %v6485_v1  ;;  %v7097_v43 = vsub.s32 0, %v2582_v42 }
0x17f9   :  { %v2296_v12 = vadd.f32 %v2295_v62, %v2294_v60 }
0x17fa   :  { %5919 = vmatpush3.bf16.msra.mxu1 %v7041_v50  ;;  %5937 = vmatpush3.bf16.msra.mxu0 %v7041_v50 }
0x17fb   :  { %v7027_v2 = vld [vmem:[#allocation3 + $0xe] sm:$0x3]  ;;  %v2298_v3 = vadd.f32 %v2297_v63, %v2296_v12  ;;  %5920 = vmatprep.subr.bf16.mxu1 %v6485_v1  ;;  %5938 = vmatprep.subr.bf16.mxu0 %v6485_v1 }
0x17fc   :  { %v2287_v4 = vmul.f32 %v2279_v10, %v7027_v2 }
0x17fd   :  { %v2300_v6 = vadd.f32 %v2299_v13, %v2298_v3 }
0x17fe   :  { %v2301_v8 = vsel %vm2216_vm13, %v2287_v4, 0.0 }
0x17ff   :  { %v2302_v11 = vadd.f32 %v2301_v8, %v2300_v6 }
0x1803   :  { %v2443_v16 = vpop.f32.mrb[16].mxu0 }
0x1804   :  { %v6029_v17 = vadd.f32 %v2443_v16, %v2302_v11  ;;  %v5572_v18 = vpop.f32.mrb[17].mxu0 }
0x1806   :  { %6162 = vtanh.f32 %v6029_v17  ;;  %v5041_v7 = vmul.f32 -1.442695, %v6029_v17 }
0x1808   :  { %6164 = vpow2.f32 %v5041_v7 }
0x1810   :  { %v6163_v21 = vpop.eup %6162 }
0x1811   :  { %2457 = vrot.lane.b32.xlu0 %v6163_v21, %s6488_s4 }
0x1812   :  { %v6165_v20 = vpop.eup %6164 }
0x1813   :  { %v2451_v22 = vadd.f32 1.0, %v6165_v20 }
0x1815   :  { %6166 = vrcp.f32 %v2451_v22 }
0x181f   :  { %v6167_v23 = vpop.eup %6166 }
0x1820   :  { %v2455_v32 = vmul.f32 %v6167_v23, %v6907_v19 }
0x1883   :  { %v2458_v24 = vpop.permute.xlu0 %2457 }
0x1884   :  { %v2460_v31 = vmul.f32 %v6167_v23, %v2458_v24 }
0x1886   :  { %2462 = vrot.lane.b32.xlu1 %v2460_v31, %s6489_s11 }
0x18f8   :  { %v2463_v33 = vpop.permute.xlu1 %2462 }
0x18f9   :  { %v7035_v39 = vadd.f32 %v2463_v33, %v2455_v32 }
0x18fb   :  { %6168 = vtanh.f32 %v7035_v39 }
0x1905   :  { %v6169_v19 = vpop.eup %6168 }
0x1906   :  { %2468 = vrot.lane.b32.xlu1 %v6169_v19, %s6488_s4 }
0x1978   :  { %v2469_v36 = vpop.permute.xlu1 %2468 }
0x1979   :  { %v2471_v51 = vmul.f32 %v6167_v23, %v2469_v36  ;;  %v2584_v36 = vrot.slane %v2580_v48, %v7097_v43 }
0x197b   :  { %2479 = vrot.lane.b32.xlu0 %v2471_v51, %s6489_s11  ;;  %vm2585_vm2 = vcmp.eq.s32.totalorder %v2584_v36, 1 }
0x19ed   :  { %v7052_v52 = vpop.permute.xlu0 %2479 }
0x19ee   :  { %5582 = vmatmul.mubr.msk.f32.vlgmr.msra.gmra.mrb[18].mxu1 %vm111_vm4, %v7052_v52  ;;  %v2594_v8 = vmul.f32 %v7052_v52, %v6928_v30  ;;  %v2595_v16 = vmul.f32 %v7052_v52, %v6926_v29  ;;  %v2596_v18 = vmul.f32 %v7052_v52, %v6939_v35  ;;  %v2597_v7 = vmul.f32 %v7052_v52, %v6941_v37 }
0x19ef   :  { %5922 = vmatpush3.bf16.msra.mxu1 %v6918_v25  ;;  %5592 = vmatprep.mubr.msk.f32.mxu1 %vm6486_vm0, %v6487_v9  ;;  %v2599_v22 = vmul.f32 %v7052_v52, %v6954_v47  ;;  %v2600_v24 = vmul.f32 %v7052_v52, %v6970_v55  ;;  %v2601_v32 = vmul.f32 %v7052_v52, %v6962_v54 }
0x19f0   :  { %5923 = vmatprep.subr.bf16.mxu1 %v6485_v1  ;;  %v2602_v11 = vsel %vm287_vm3, %v2594_v8, 0.0  ;;  %v2605_v17 = vsel %vm287_vm3, %v2595_v16, 0.0  ;;  %v2608_v21 = vsel %vm287_vm3, %v2596_v18, 0.0  ;;  %v2611_v20 = vsel %vm287_vm3, %v2597_v7, 0.0 }
0x19f1   :  { %v2617_v23 = vsel %vm287_vm3, %v2599_v22, 0.0  ;;  %v2620_v31 = vsel %vm287_vm3, %v2600_v24, 0.0  ;;  %v2623_v33 = vsel %vm287_vm3, %v2601_v32, 0.0  ;;  %v2598_v14 = vmul.f32 %v7052_v52, %v6952_v46 }
0x19f3   :  { %5925 = vmatpush3.bf16.msra.mxu1 %v6935_v34 }
0x19f4   :  { %5926 = vmatprep.subr.bf16.mxu1 %v6485_v1 }
0x1ac1   :  { %v2549_v57 = vpop.f32.mrb[18].mxu1 }
0x1ac2   :  { %v2550_v58 = vadd.f32 %v7065_v56, %v2549_v57  ;;  %v5583_v59 = vpop.f32.mrb[19].mxu1 }
0x1ac3   :  { %v5045_v59 = vld [vmem:[%s7715_s2 + $0x2] sm:$0x3] }
0x1ac4   :  { %2554 = vst.msk [vmem:[#allocation12 + $0x2] sm:$0x3] %vm287_vm3, %v2550_v58  ;;  %v2555_v60 = vsel %vm287_vm3, %v2550_v58, -inf }
0x1ac5   :  { %2556 = vmax.xlane.f32.xlu1 %v2555_v60 }
0x1b52   :  { %v2557_v62 = vpop.xlane.xlu1 %2556 }
0x1b53   :  { %vm2558_vm14 = vcmp.eq.f32.partialorder %v2550_v58, %v2557_v62 }
0x1b54   :  { %v2559_v5 = vsel %vm2558_vm14, %v6664_v15, 32 }
0x1b55   :  { %v2560_v12 = vsel %vm287_vm3, %v2559_v5, 2147483647  ;;  %v2614_v5 = vsel %vm287_vm3, %v2598_v14, 0.0 }
0x1b56   :  { %v2562_v10 = vshra.s32 %v2560_v12, 16  ;;  %v2561_v3 = vand.u32 65535, %v2560_v12 }
0x1b58   :  { %v2564_v63 = vcvt.s32.f32 %v2562_v10  ;;  %v2563_v13 = vcvt.s32.f32 %v2561_v3 }
0x1b5a   :  { %2565 = vmin.xlane.f32.xlu0 %v2564_v63 }
0x1be7   :  { %v2566_v4 = vpop.xlane.xlu0 %2565 }
0x1be8   :  { %vm2567_vm15 = vcmp.eq.f32.partialorder %v2564_v63, %v2566_v4  ;;  %v2572_v19 = vcvt.f32.s32 %v2566_v4 }
0x1be9   :  { %v2568_v6 = vsel %vm2567_vm15, %v2563_v13, inf }
0x1bea   :  { %2569 = vmin.xlane.f32.xlu0 %v2568_v6  ;;  %v2573_v57 = vshll.u32 %v2572_v19, 16 }
0x1bee   :  { %2603 = vadd.xlane.f32.xlu0 %v2602_v11 }
0x1bf2   :  { %2606 = vadd.xlane.f32.xlu0 %v2605_v17 }
0x1bf6   :  { %2609 = vadd.xlane.f32.xlu0 %v2608_v21 }
0x1bfa   :  { %2612 = vadd.xlane.f32.xlu0 %v2611_v20 }
0x1bfe   :  { %2618 = vadd.xlane.f32.xlu0 %v2617_v23 }
0x1c02   :  { %2621 = vadd.xlane.f32.xlu0 %v2620_v31 }
0x1c06   :  { %2624 = vadd.xlane.f32.xlu0 %v2623_v33 }
0x1c77   :  { %v2570_v51 = vpop.xlane.xlu0 %2569 }
0x1c78   :  { %v2571_v58 = vcvt.f32.s32 %v2570_v51 }
0x1c7a   :  { %v2574_v60 = vadd.s32 %v2573_v57, %v2571_v58 }
0x1c7b   :  { %v2604_v63 = vpop.xlane.xlu0 %2603 }
0x1c7c   :  { %v2586_v62 = vsel %vm2585_vm2, %v5045_v59, %v2574_v60  ;;  %v2626_v17 = vsel %vm2216_vm13, %v2604_v63, -inf }
0x1c7d   :  { %2588 = vperm.xlu1 %6079, %v2586_v62  }
0x1c7f   :  { %v2607_v3 = vpop.xlane.xlu0 %2606 }
0x1c80   :  { %v2627_v20 = vsel %vm2216_vm13, %v2607_v3, -inf }
0x1c83   :  { %v2610_v4 = vpop.xlane.xlu0 %2609 }
0x1c84   :  { %v2628_v32 = vsel %vm2216_vm13, %v2610_v4, -inf }
0x1c87   :  { %v2613_v13 = vpop.xlane.xlu0 %2612 }
0x1c88   :  { %v2629_v22 = vsel %vm2216_vm13, %v2613_v13, -inf }
0x1c8b   :  { %v2619_v6 = vpop.xlane.xlu0 %2618 }
0x1c8c   :  { %v2632_v18 = vsel %vm2216_vm13, %v2619_v6, -inf }
0x1c8d   :  { %v2633_v24 = vmax.f32 %v2627_v20, %v2632_v18 }
0x1c8f   :  { %v2622_v8 = vpop.xlane.xlu0 %2621 }
0x1c90   :  { %v2634_v23 = vsel %vm2216_vm13, %v2622_v8, -inf }
0x1c91   :  { %v2635_v33 = vmax.f32 %v2628_v32, %v2634_v23 }
0x1c93   :  { %v2625_v16 = vpop.xlane.xlu0 %2624 }
0x1c94   :  { %v2636_v21 = vsel %vm2216_vm13, %v2625_v16, -inf }
0x1c95   :  { %v2637_v31 = vmax.f32 %v2629_v22, %v2636_v21 }
0x1c97   :  { %v2639_v42 = vmax.f32 %v2635_v33, %v2637_v31 }
0x1ca1   :  { %2615 = vadd.xlane.f32.xlu1 %v2614_v5 }
0x1cfc   :  { %v2589_v12 = vpop.permute.xlu1 %2588 }
0x1cfd   :  { %vm2590_vm5 = vcmp.eq.s32.totalorder %v6664_v15, %v2589_v12 }
0x1cfe   :  { %v5046_v10 = vsel %vm2590_vm5, 1.0, %v6487_v9 }
0x1cff   :  { %5593 = vmatmul.mubr.msk.f32.vlgmr.msra.gmra.mrb[20].mxu1 %vm111_vm4, %v5046_v10 }
0x1d00   :  { %5928 = vmatpush3.bf16.msra.mxu1 %v6950_v45  ;;  %5603 = vmatprep.mubr.msk.f32.mxu1 %vm6486_vm0, %v6487_v9 }
0x1d01   :  { %5929 = vmatprep.subr.bf16.mxu1 %v6485_v1 }
0x1d04   :  { %5931 = vmatpush3.bf16.msra.mxu1 %v6966_v38 }
0x1d05   :  { %5950 = vmatprep.subr.bf16.mxu1 %v6485_v1 }
0x1d07   :  { %5604 = vmatmul.mubr.msk.f32.vlgmr.msra.gmra.mrb[20].mxu1 %vm111_vm4, %v7052_v52 }
0x1d08   :  { %5952 = vmatpush3.bf16.msra.mxu1 %v7038_v44  ;;  %5647 = vmatprep.mubr.msk.f32.mxu1 %vm6486_vm0, %v6487_v9 }
0x1d09   :  { %5953 = vmatprep.subr.bf16.mxu1 %v6485_v1 }
0x1d0c   :  { %5955 = vmatpush3.bf16.msra.mxu1 %v7041_v50 }
0x1d0d   :  { %5956 = vmatprep.subr.bf16.mxu1 %v6485_v1 }
0x1d2e   :  { %v2616_v11 = vpop.xlane.xlu1 %2615 }
0x1d2f   :  { %v2630_v52 = vsel %vm2216_vm13, %v2616_v11, -inf }
0x1d30   :  { %v2631_v7 = vmax.f32 %v2626_v17, %v2630_v52 }
0x1d32   :  { %v2638_v41 = vmax.f32 %v2631_v7, %v2633_v24 }
0x1d34   :  { %v2640_v48 = vmax.f32 %v2638_v41, %v2639_v42 }
0x1d36   :  { %v2641_v19 = vsub.f32 %v2604_v63, %v2640_v48  ;;  %v2642_v36 = vsub.f32 %v2607_v3, %v2640_v48  ;;  %v2643_v58 = vsub.f32 %v2610_v4, %v2640_v48  ;;  %v2644_v59 = vsub.f32 %v2613_v13, %v2640_v48 }
0x1d37   :  { %v2645_v62 = vsub.f32 %v2616_v11, %v2640_v48  ;;  %v2646_v10 = vsub.f32 %v2619_v6, %v2640_v48  ;;  %v2647_v3 = vsub.f32 %v2622_v8, %v2640_v48  ;;  %v2648_v7 = vsub.f32 %v2625_v16, %v2640_v48 }
0x1d38   :  { %v2649_v51 = vmul.f32 1.442695, %v2641_v19  ;;  %v2651_v57 = vmul.f32 1.442695, %v2642_v36  ;;  %v2653_v60 = vmul.f32 1.442695, %v2643_v58 }
0x1d39   :  { %v2655_v14 = vmul.f32 1.442695, %v2644_v59  ;;  %v2657_v52 = vmul.f32 1.442695, %v2645_v62  ;;  %v2659_v18 = vmul.f32 1.442695, %v2646_v10 }
0x1d3a   :  { %6170 = vpow2.f32 %v2649_v51  ;;  %v2661_v13 = vmul.f32 1.442695, %v2647_v3  ;;  %v2663_v6 = vmul.f32 1.442695, %v2648_v7 }
0x1d3b   :  { %6172 = vpow2.f32 %v2651_v57 }
0x1d3c   :  { %6174 = vpow2.f32 %v2653_v60 }
0x1d3d   :  { %6176 = vpow2.f32 %v2655_v14 }
0x1d3e   :  { %6178 = vpow2.f32 %v2657_v52 }
0x1d3f   :  { %6180 = vpow2.f32 %v2659_v18 }
0x1d40   :  { %6182 = vpow2.f32 %v2661_v13 }
0x1d41   :  { %6184 = vpow2.f32 %v2663_v6 }
0x1d44   :  { %v6171_v5 = vpop.eup %6170 }
0x1d45   :  { %v6173_v12 = vpop.eup %6172  ;;  %v2665_v17 = vsel %vm2216_vm13, %v6171_v5, 0.0 }
0x1d46   :  { %v2666_v63 = vsel %vm2216_vm13, %v6173_v12, 0.0  ;;  %v6175_v4 = vpop.eup %6174 }
0x1d47   :  { %v2667_v21 = vadd.f32 %v2666_v63, %v2665_v17  ;;  %v2668_v11 = vsel %vm2216_vm13, %v6175_v4, 0.0  ;;  %v6177_v20 = vpop.eup %6176 }
0x1d48   :  { %v2670_v23 = vsel %vm2216_vm13, %v6177_v20, 0.0  ;;  %v6179_v24 = vpop.eup %6178 }
0x1d49   :  { %v2669_v22 = vadd.f32 %v2668_v11, %v2667_v21  ;;  %v2672_v8 = vsel %vm2216_vm13, %v6179_v24, 0.0  ;;  %v6181_v32 = vpop.eup %6180 }
0x1d4a   :  { %v2674_v41 = vsel %vm2216_vm13, %v6181_v32, 0.0  ;;  %v6183_v42 = vpop.eup %6182 }
0x1d4b   :  { %v2671_v31 = vadd.f32 %v2670_v23, %v2669_v22  ;;  %v2676_v16 = vsel %vm2216_vm13, %v6183_v42, 0.0  ;;  %v6185_v48 = vpop.eup %6184 }
0x1d4c   :  { %v2678_v51 = vsel %vm2216_vm13, %v6185_v48, 0.0 }
0x1d4d   :  { %v2673_v33 = vadd.f32 %v2672_v8, %v2671_v31 }
0x1d4f   :  { %v2675_v19 = vadd.f32 %v2674_v41, %v2673_v33 }
0x1d51   :  { %v2677_v36 = vadd.f32 %v2676_v16, %v2675_v19 }
0x1d53   :  { %v2679_v57 = vadd.f32 %v2678_v51, %v2677_v36 }
0x1d55   :  { %6186 = vrcp.f32 %v2679_v57 }
0x1d5f   :  { %v6187_v58 = vpop.eup %6186 }
0x1d60   :  { %v2681_v59 = vmul.f32 %v6187_v58, %v6171_v5  ;;  %v2682_v60 = vmul.f32 %v6187_v58, %v6173_v12  ;;  %v2683_v10 = vmul.f32 %v6187_v58, %v6175_v4  ;;  %v2684_v63 = vmul.f32 %v6187_v58, %v6177_v20 }
0x1d61   :  { %v2685_v21 = vmul.f32 %v6187_v58, %v6179_v24  ;;  %v2686_v12 = vmul.f32 %v6187_v58, %v6181_v32  ;;  %v2687_v6 = vmul.f32 %v6187_v58, %v6183_v42  ;;  %v2688_v8 = vmul.f32 %v6187_v58, %v6185_v48 }
0x1d62   :  { %v2689_v62 = vmul.f32 %v2681_v59, %v7000_v26  ;;  %v2690_v14 = vmul.f32 %v2682_v60, %v7002_v27  ;;  %v2691_v3 = vmul.f32 %v2683_v10, %v7004_v28  ;;  %v2692_v13 = vmul.f32 %v2684_v63, %v7009_v40 }
0x1d63   :  { %v2693_v11 = vmul.f32 %v2685_v21, %v7014_v49  ;;  %v2694_v23 = vmul.f32 %v2686_v12, %v7018_v53  ;;  %v2695_v24 = vmul.f32 %v2687_v6, %v7022_v61  ;;  %v2696_v19 = vmul.f32 %v2688_v8, %v7027_v2 }
0x1d64   :  { %v2697_v52 = vsel %vm2216_vm13, %v2689_v62, 0.0  ;;  %v2698_v17 = vsel %vm2216_vm13, %v2690_v14, 0.0  ;;  %v2700_v7 = vsel %vm2216_vm13, %v2691_v3, 0.0  ;;  %v2702_v22 = vsel %vm2216_vm13, %v2692_v13, 0.0 }
0x1d65   :  { %v2699_v18 = vadd.f32 %v2698_v17, %v2697_v52  ;;  %v2704_v20 = vsel %vm2216_vm13, %v2693_v11, 0.0  ;;  %v2706_v33 = vsel %vm2216_vm13, %v2694_v23, 0.0  ;;  %v2708_v32 = vsel %vm2216_vm13, %v2695_v24, 0.0 }
0x1d66   :  { %v2710_v36 = vsel %vm2216_vm13, %v2696_v19, 0.0 }
0x1d67   :  { %v2701_v5 = vadd.f32 %v2700_v7, %v2699_v18 }
0x1d69   :  { %v2703_v4 = vadd.f32 %v2702_v22, %v2701_v5 }
0x1d6b   :  { %v2705_v31 = vadd.f32 %v2704_v20, %v2703_v4 }
0x1d6d   :  { %v2707_v41 = vadd.f32 %v2706_v33, %v2705_v31 }
0x1d6f   :  { %v2709_v16 = vadd.f32 %v2708_v32, %v2707_v41 }
0x1d71   :  { %v2711_v51 = vadd.f32 %v2710_v36, %v2709_v16 }
0x1dda   :  { %v2852_v42 = vpop.f32.mrb[20].mxu1 }
0x1ddb   :  { %v6030_v57 = vadd.f32 %v2852_v42, %v2711_v51  ;;  %v5605_v59 = vpop.f32.mrb[21].mxu1 }
0x1ddd   :  { %6188 = vtanh.f32 %v6030_v57  ;;  %v5049_v48 = vmul.f32 -1.442695, %v6030_v57 }
0x1ddf   :  { %6190 = vpow2.f32 %v5049_v48 }
0x1de7   :  { %v6189_v60 = vpop.eup %6188 }
0x1de8   :  { %2866 = vrot.lane.b32.xlu0 %v6189_v60, %s6488_s4 }
0x1de9   :  { %v6191_v58 = vpop.eup %6190 }
0x1dea   :  { %v2860_v62 = vadd.f32 1.0, %v6191_v58 }
0x1dec   :  { %6192 = vrcp.f32 %v2860_v62 }
0x1df6   :  { %v6193_v14 = vpop.eup %6192 }
0x1df7   :  { %v2864_v17 = vmul.f32 %v6193_v14, %v7035_v39 }
0x1e5a   :  { %v2867_v10 = vpop.permute.xlu0 %2866 }
0x1e5b   :  { %v2869_v52 = vmul.f32 %v6193_v14, %v2867_v10  ;;  %v5052_v10 = vld [vmem:[%s7715_s2 + $0x4] sm:$0x3] }
0x1e5d   :  { %2871 = vrot.lane.b32.xlu0 %v2869_v52, %s6489_s11 }
0x1ecf   :  { %v2872_v63 = vpop.permute.xlu0 %2871 }
0x1ed0   :  { %v7159_v3 = vadd.f32 %v2872_v63, %v2864_v17 }
0x1ed2   :  { %6194 = vtanh.f32 %v7159_v3 }
0x1edc   :  { %v6195_v18 = vpop.eup %6194 }
0x1edd   :  { %2877 = vrot.lane.b32.xlu1 %v6195_v18, %s6488_s4 }
0x1f4f   :  { %v2878_v21 = vpop.permute.xlu1 %2877 }
0x1f50   :  { %v2880_v13 = vmul.f32 %v6193_v14, %v2878_v21 }
0x1f52   :  { %2882 = vrot.lane.b32.xlu0 %v2880_v13, %s6489_s11 }
0x1fc4   :  { %v7164_v7 = vpop.permute.xlu0 %2882 }
0x1fc5   :  { %5615 = vmatmul.mubr.msk.f32.vlgmr.msra.gmra.mrb[18].mxu0 %vm111_vm4, %v7164_v7  ;;  %v2997_v31 = vmul.f32 %v7164_v7, %v6928_v30  ;;  %v2998_v24 = vmul.f32 %v7164_v7, %v6926_v29  ;;  %v2999_v41 = vmul.f32 %v7164_v7, %v6939_v35  ;;  %v3001_v32 = vmul.f32 %v7164_v7, %v6952_v46 }
0x1fc6   :  { %5940 = vmatpush3.bf16.msra.mxu0 %v6918_v25  ;;  %5625 = vmatprep.mubr.msk.f32.mxu0 %vm6486_vm0, %v6487_v9  ;;  %v3002_v16 = vmul.f32 %v7164_v7, %v6954_v47  ;;  %v3003_v36 = vmul.f32 %v7164_v7, %v6970_v55  ;;  %v3004_v51 = vmul.f32 %v7164_v7, %v6962_v54  ;;  %v5051_v55 = vld [vmem:[%s7713_s0 + $0x2] sm:$0x1] }
0x1fc7   :  { %5941 = vmatprep.subr.bf16.mxu0 %v6485_v1  ;;  %v3005_v8 = vsel %vm287_vm3, %v2997_v31, 0.0  ;;  %v3008_v33 = vsel %vm287_vm3, %v2998_v24, 0.0  ;;  %v3011_v19 = vsel %vm287_vm3, %v2999_v41, 0.0  ;;  %v3017_v30 = vsel %vm287_vm3, %v3001_v32, 0.0 }
0x1fc8   :  { %v3020_v29 = vsel %vm287_vm3, %v3002_v16, 0.0  ;;  %v3023_v35 = vsel %vm287_vm3, %v3003_v36, 0.0  ;;  %v3026_v46 = vsel %vm287_vm3, %v3004_v51, 0.0  ;;  %vm2980_vm8 = vcmp.gt.s32.totalorder %v5051_v55, 0 }
0x1fc9   :  { %v2983_v60 = vsel %vm2980_vm8, 1, %v6484_v0  ;;  %v3000_v63 = vmul.f32 %v7164_v7, %v6941_v37 }
0x1fca   :  { %5943 = vmatpush3.bf16.msra.mxu0 %v6935_v34  ;;  %v2987_v54 = vrot.slane %v2983_v60, %v7097_v43 }
0x1fcb   :  { %5944 = vmatprep.subr.bf16.mxu0 %v6485_v1  ;;  %v3014_v18 = vsel %vm287_vm3, %v3000_v63, 0.0 }
0x1fcc   :  { %vm2988_vm9 = vcmp.eq.s32.totalorder %v2987_v54, 1 }
0x2098   :  { %v2952_v39 = vpop.f32.mrb[18].mxu0 }
0x2099   :  { %v2953_v5 = vadd.f32 %v7065_v56, %v2952_v39  ;;  %v5616_v12 = vpop.f32.mrb[19].mxu0 }
0x209b   :  { %2957 = vst.msk [vmem:[#allocation12 + $0x4] sm:$0x3] %vm287_vm3, %v2953_v5  ;;  %v2958_v11 = vsel %vm287_vm3, %v2953_v5, -inf }
0x209c   :  { %2959 = vmax.xlane.f32.xlu0 %v2958_v11 }
0x2129   :  { %v2960_v22 = vpop.xlane.xlu0 %2959 }
0x212a   :  { %vm2961_vm6 = vcmp.eq.f32.partialorder %v2953_v5, %v2960_v22 }
0x212b   :  { %v2962_v4 = vsel %vm2961_vm6, %v6664_v15, 32 }
0x212c   :  { %v2963_v6 = vsel %vm287_vm3, %v2962_v4, 2147483647 }
0x212d   :  { %v2965_v23 = vshra.s32 %v2963_v6, 16  ;;  %v2964_v42 = vand.u32 65535, %v2963_v6 }
0x212f   :  { %v2967_v20 = vcvt.s32.f32 %v2965_v23  ;;  %v2966_v59 = vcvt.s32.f32 %v2964_v42 }
0x2131   :  { %2968 = vmin.xlane.f32.xlu1 %v2967_v20 }
0x2135   :  { %3006 = vadd.xlane.f32.xlu1 %v3005_v8 }
0x2139   :  { %3009 = vadd.xlane.f32.xlu1 %v3008_v33 }
0x213d   :  { %3012 = vadd.xlane.f32.xlu1 %v3011_v19 }
0x2141   :  { %3018 = vadd.xlane.f32.xlu1 %v3017_v30 }
0x2145   :  { %3021 = vadd.xlane.f32.xlu1 %v3020_v29 }
0x2149   :  { %3024 = vadd.xlane.f32.xlu1 %v3023_v35 }
0x214d   :  { %3027 = vadd.xlane.f32.xlu1 %v3026_v46 }
0x21be   :  { %v2969_v57 = vpop.xlane.xlu1 %2968 }
0x21bf   :  { %vm2970_vm7 = vcmp.eq.f32.partialorder %v2967_v20, %v2969_v57  ;;  %v2975_v48 = vcvt.f32.s32 %v2969_v57 }
0x21c0   :  { %v2971_v47 = vsel %vm2970_vm7, %v2966_v59, inf }
0x21c1   :  { %2972 = vmin.xlane.f32.xlu0 %v2971_v47  ;;  %v2976_v62 = vshll.u32 %v2975_v48, 16 }
0x21c2   :  { %v3007_v37 = vpop.xlane.xlu1 %3006 }
0x21c3   :  { %v3029_v30 = vsel %vm2216_vm13, %v3007_v37, -inf }
0x21c6   :  { %v3010_v39 = vpop.xlane.xlu1 %3009 }
0x21c7   :  { %v3030_v24 = vsel %vm2216_vm13, %v3010_v39, -inf }
0x21ca   :  { %v3013_v5 = vpop.xlane.xlu1 %3012 }
0x21cb   :  { %v3031_v33 = vsel %vm2216_vm13, %v3013_v5, -inf }
0x21ce   :  { %v3019_v12 = vpop.xlane.xlu1 %3018 }
0x21cf   :  { %v3033_v41 = vsel %vm2216_vm13, %v3019_v12, -inf }
0x21d0   :  { %v3034_v16 = vmax.f32 %v3029_v30, %v3033_v41 }
0x21d2   :  { %v3022_v11 = vpop.xlane.xlu1 %3021 }
0x21d3   :  { %v3035_v23 = vsel %vm2216_vm13, %v3022_v11, -inf }
0x21d4   :  { %v3036_v19 = vmax.f32 %v3030_v24, %v3035_v23 }
0x21d6   :  { %v3025_v22 = vpop.xlane.xlu1 %3024  ;;  %v3041_v36 = vmax.f32 %v3034_v16, %v3036_v19 }
0x21d7   :  { %v3037_v20 = vsel %vm2216_vm13, %v3025_v22, -inf }
0x21d8   :  { %v3038_v32 = vmax.f32 %v3031_v33, %v3037_v20 }
0x21da   :  { %v3028_v6 = vpop.xlane.xlu1 %3027 }
0x21db   :  { %v3039_v31 = vsel %vm2216_vm13, %v3028_v6, -inf }
0x224e   :  { %v2973_v58 = vpop.xlane.xlu0 %2972 }
0x224f   :  { %v2974_v14 = vcvt.f32.s32 %v2973_v58 }
0x2251   :  { %v2977_v52 = vadd.s32 %v2976_v62, %v2974_v14 }
0x2253   :  { %v2989_v17 = vsel %vm2988_vm9, %v5052_v10, %v2977_v52 }
0x2254   :  { %2991 = vperm.xlu0 %6078, %v2989_v17  }
0x2273   :  { %3015 = vadd.xlane.f32.xlu0 %v3014_v18 }
0x22d3   :  { %v2992_v21 = vpop.permute.xlu0 %2991 }
0x22d4   :  { %vm2993_vm10 = vcmp.eq.s32.totalorder %v6664_v15, %v2992_v21 }
0x22d5   :  { %v5053_v13 = vsel %vm2993_vm10, 1.0, %v6487_v9 }
0x22d6   :  { %5626 = vmatmul.mubr.msk.f32.vlgmr.msra.gmra.mrb[20].mxu0 %vm111_vm4, %v5053_v13 }
0x22d7   :  { %5946 = vmatpush3.bf16.msra.mxu0 %v6950_v45  ;;  %5636 = vmatprep.mubr.msk.f32.mxu0 %vm6486_vm0, %v6487_v9 }
0x22d8   :  { %5947 = vmatprep.subr.bf16.mxu0 %v6485_v1 }
0x22db   :  { %5949 = vmatpush3.bf16.msra.mxu0 %v6966_v38 }
0x22dc   :  { %5968 = vmatprep.subr.bf16.mxu0 %v6485_v1 }
0x22de   :  { %5637 = vmatmul.mubr.msk.f32.vlgmr.msra.gmra.mrb[20].mxu0 %vm111_vm4, %v7164_v7 }
0x22df   :  { %5970 = vmatpush3.bf16.msra.mxu0 %v7038_v44  ;;  %5680 = vmatprep.mubr.msk.f32.mxu0 %vm6486_vm0, %v6487_v9 }
0x22e0   :  { %5971 = vmatprep.subr.bf16.mxu0 %v6485_v1 }
0x22e3   :  { %5973 = vmatpush3.bf16.msra.mxu0 %v7041_v50 }
0x22e4   :  { %5974 = vmatprep.subr.bf16.mxu0 %v6485_v1 }
0x2300   :  { %v3016_v4 = vpop.xlane.xlu0 %3015 }
0x2301   :  { %v3032_v7 = vsel %vm2216_vm13, %v3016_v4, -inf }
0x2302   :  { %v3040_v8 = vmax.f32 %v3032_v7, %v3039_v31 }
0x2304   :  { %v3042_v29 = vmax.f32 %v3038_v32, %v3040_v8 }
0x2306   :  { %v3043_v35 = vmax.f32 %v3041_v36, %v3042_v29 }
0x2308   :  { %v3044_v51 = vsub.f32 %v3007_v37, %v3043_v35  ;;  %v3045_v46 = vsub.f32 %v3010_v39, %v3043_v35  ;;  %v3046_v59 = vsub.f32 %v3013_v5, %v3043_v35  ;;  %v3047_v47 = vsub.f32 %v3016_v4, %v3043_v35 }
0x2309   :  { %v3048_v60 = vsub.f32 %v3019_v12, %v3043_v35  ;;  %v3049_v62 = vsub.f32 %v3022_v11, %v3043_v35  ;;  %v3050_v17 = vsub.f32 %v3025_v22, %v3043_v35  ;;  %v3051_v13 = vsub.f32 %v3028_v6, %v3043_v35 }
0x230a   :  { %v3052_v42 = vmul.f32 1.442695, %v3044_v51  ;;  %v3054_v57 = vmul.f32 1.442695, %v3045_v46  ;;  %v3056_v55 = vmul.f32 1.442695, %v3046_v59 }
0x230b   :  { %v3058_v48 = vmul.f32 1.442695, %v3047_v47  ;;  %v3060_v14 = vmul.f32 1.442695, %v3048_v60  ;;  %v3062_v63 = vmul.f32 1.442695, %v3049_v62 }
0x230c   :  { %6196 = vpow2.f32 %v3052_v42  ;;  %v3064_v37 = vmul.f32 1.442695, %v3050_v17  ;;  %v3066_v11 = vmul.f32 1.442695, %v3051_v13 }
0x230d   :  { %6198 = vpow2.f32 %v3054_v57 }
0x230e   :  { %6200 = vpow2.f32 %v3056_v55 }
0x230f   :  { %6202 = vpow2.f32 %v3058_v48 }
0x2310   :  { %6204 = vpow2.f32 %v3060_v14 }
0x2311   :  { %6206 = vpow2.f32 %v3062_v63 }
0x2312   :  { %6208 = vpow2.f32 %v3064_v37 }
0x2313   :  { %6210 = vpow2.f32 %v3066_v11 }
0x2316   :  { %v6197_v54 = vpop.eup %6196 }
0x2317   :  { %v6199_v58 = vpop.eup %6198  ;;  %v3068_v10 = vsel %vm2216_vm13, %v6197_v54, 0.0 }
0x2318   :  { %v3069_v52 = vsel %vm2216_vm13, %v6199_v58, 0.0  ;;  %v6201_v18 = vpop.eup %6200 }
0x2319   :  { %v3070_v21 = vadd.f32 %v3069_v52, %v3068_v10  ;;  %v3071_v39 = vsel %vm2216_vm13, %v6201_v18, 0.0  ;;  %v6203_v5 = vpop.eup %6202 }
0x231a   :  { %v3073_v4 = vsel %vm2216_vm13, %v6203_v5, 0.0  ;;  %v6205_v7 = vpop.eup %6204 }
0x231b   :  { %v3072_v12 = vadd.f32 %v3071_v39, %v3070_v21  ;;  %v3075_v22 = vsel %vm2216_vm13, %v6205_v7, 0.0  ;;  %v6207_v20 = vpop.eup %6206 }
0x231c   :  { %v3077_v8 = vsel %vm2216_vm13, %v6207_v20, 0.0  ;;  %v6209_v6 = vpop.eup %6208 }
0x231d   :  { %v3074_v23 = vadd.f32 %v3073_v4, %v3072_v12  ;;  %v3079_v33 = vsel %vm2216_vm13, %v6209_v6, 0.0  ;;  %v6211_v41 = vpop.eup %6210 }
0x231e   :  { %v3081_v32 = vsel %vm2216_vm13, %v6211_v41, 0.0 }
0x231f   :  { %v3076_v31 = vadd.f32 %v3075_v22, %v3074_v23 }
0x2321   :  { %v3078_v24 = vadd.f32 %v3077_v8, %v3076_v31 }
0x2323   :  { %v3080_v19 = vadd.f32 %v3079_v33, %v3078_v24 }
0x2325   :  { %v3082_v30 = vadd.f32 %v3081_v32, %v3080_v19 }
0x2327   :  { %6212 = vrcp.f32 %v3082_v30 }
0x2331   :  { %v6213_v16 = vpop.eup %6212 }
0x2332   :  { %v3084_v29 = vmul.f32 %v6213_v16, %v6197_v54  ;;  %v3085_v36 = vmul.f32 %v6213_v16, %v6199_v58  ;;  %v3086_v46 = vmul.f32 %v6213_v16, %v6201_v18  ;;  %v3087_v59 = vmul.f32 %v6213_v16, %v6203_v5 }
0x2333   :  { %v3088_v60 = vmul.f32 %v6213_v16, %v6205_v7  ;;  %v3089_v58 = vmul.f32 %v6213_v16, %v6207_v20  ;;  %v3090_v10 = vmul.f32 %v6213_v16, %v6209_v6 }
0x2334   :  { %v3092_v35 = vmul.f32 %v3084_v29, %v7000_v26  ;;  %v3093_v51 = vmul.f32 %v3085_v36, %v7002_v27  ;;  %v3094_v47 = vmul.f32 %v3086_v46, %v7004_v28  ;;  %v3095_v48 = vmul.f32 %v3087_v59, %v7009_v40  ;;  %v7288_v59 = vld [vmem:[#allocation2 + $0x2] sm:$0x3] }
0x2335   :  { %v3096_v26 = vmul.f32 %v3088_v60, %v7014_v49  ;;  %v3097_v52 = vmul.f32 %v3089_v58, %v7018_v53  ;;  %v3091_v28 = vmul.f32 %v6213_v16, %v6211_v41  ;;  %v3098_v18 = vmul.f32 %v3090_v10, %v7022_v61  ;;  %v7293_v60 = vld [vmem:[#allocation2 + $0x4] sm:$0x3] }
0x2336   :  { %v3100_v42 = vsel %vm2216_vm13, %v3092_v35, 0.0  ;;  %v3101_v57 = vsel %vm2216_vm13, %v3093_v51, 0.0  ;;  %v3103_v62 = vsel %vm2216_vm13, %v3094_v47, 0.0  ;;  %v3105_v27 = vsel %vm2216_vm13, %v3095_v48, 0.0 }
0x2337   :  { %v3102_v55 = vadd.f32 %v3101_v57, %v3100_v42  ;;  %v3107_v17 = vsel %vm2216_vm13, %v3096_v26, 0.0  ;;  %v3109_v40 = vsel %vm2216_vm13, %v3097_v52, 0.0  ;;  %v3099_v13 = vmul.f32 %v3091_v28, %v7027_v2  ;;  %v7283_v42 = vld [vmem:[#allocation2] sm:$0x3]  ;;  %v7308_v52 = vld [vmem:[#allocation2 + $0xc] sm:$0x3] }
0x2338   :  { %v3111_v37 = vsel %vm2216_vm13, %v3098_v18, 0.0  ;;  %v7313_v28 = vld [vmem:[#allocation2 + $0xe] sm:$0x3] }
0x2339   :  { %v3104_v54 = vadd.f32 %v3103_v62, %v3102_v55  ;;  %v3113_v39 = vsel %vm2216_vm13, %v3099_v13, 0.0 }
0x233b   :  { %v3106_v14 = vadd.f32 %v3105_v27, %v3104_v54  ;;  %v7298_v54 = vld [vmem:[#allocation2 + $0x6] sm:$0x3]  ;;  %v7303_v27 = vld [vmem:[#allocation2 + $0xa] sm:$0x3] }
0x233d   :  { %v3108_v63 = vadd.f32 %v3107_v17, %v3106_v14 }
0x233f   :  { %v3110_v21 = vadd.f32 %v3109_v40, %v3108_v63 }
0x2341   :  { %v3112_v49 = vadd.f32 %v3111_v37, %v3110_v21 }
0x2343   :  { %v3114_v5 = vadd.f32 %v3113_v39, %v3112_v49  ;;  %v5058_v39 = vld [vmem:[%s7713_s0 + $0x3] sm:$0x1] }
0x2344   :  { %vm3383_vm14 = vcmp.gt.s32.totalorder %v5058_v39, 0 }
0x23b1   :  { %v3255_v12 = vpop.f32.mrb[20].mxu0 }
0x23b2   :  { %v6031_v11 = vadd.f32 %v3255_v12, %v3114_v5  ;;  %v5638_v53 = vpop.f32.mrb[21].mxu0  ;;  %v3386_v5 = vsel %vm3383_vm14, 1, %v6484_v0 }
0x23b4   :  { %6214 = vtanh.f32 %v6031_v11  ;;  %v5056_v7 = vmul.f32 -1.442695, %v6031_v11  ;;  %v3390_v11 = vrot.slane %v3386_v5, %v7097_v43 }
0x23b6   :  { %6216 = vpow2.f32 %v5056_v7  ;;  %vm3391_vm15 = vcmp.eq.s32.totalorder %v3390_v11, 1 }
0x23be   :  { %v6215_v4 = vpop.eup %6214 }
0x23bf   :  { %3269 = vrot.lane.b32.xlu1 %v6215_v4, %s6488_s4 }
0x23c0   :  { %v6217_v61 = vpop.eup %6216 }
0x23c1   :  { %v3263_v23 = vadd.f32 1.0, %v6217_v61  ;;  %v5059_v61 = vld [vmem:[%s7715_s2 + $0x6] sm:$0x3] }
0x23c3   :  { %6218 = vrcp.f32 %v3263_v23 }
0x23cd   :  { %v6219_v22 = vpop.eup %6218 }
0x23ce   :  { %v3267_v31 = vmul.f32 %v6219_v22, %v7159_v3 }
0x2431   :  { %v3270_v2 = vpop.permute.xlu1 %3269 }
0x2432   :  { %v3272_v20 = vmul.f32 %v6219_v22, %v3270_v2  ;;  %v7326_v2 = vld [vmem:[#allocation2 + $0x8] sm:$0x3] }
0x2434   :  { %3274 = vrot.lane.b32.xlu0 %v3272_v20, %s6489_s11 }
0x24a6   :  { %v3275_v8 = vpop.permute.xlu0 %3274 }
0x24a7   :  { %v7263_v6 = vadd.f32 %v3275_v8, %v3267_v31 }
0x24a9   :  { %6220 = vtanh.f32 %v7263_v6 }
0x24b3   :  { %v6221_v24 = vpop.eup %6220 }
0x24b4   :  { %3280 = vrot.lane.b32.xlu1 %v6221_v24, %s6488_s4 }
0x2526   :  { %v3281_v33 = vpop.permute.xlu1 %3280 }
0x2527   :  { %v3283_v41 = vmul.f32 %v6219_v22, %v3281_v33 }
0x2529   :  { %3285 = vrot.lane.b32.xlu1 %v3283_v41, %s6489_s11 }
0x259b   :  { %v7268_v19 = vpop.permute.xlu1 %3285 }
0x259c   :  { %5648 = vmatmul.mubr.msk.f32.vlgmr.msra.gmra.mrb[22].mxu1 %vm111_vm4, %v7268_v19  ;;  %v3400_v57 = vmul.f32 %v7283_v42, %v7268_v19  ;;  %v3401_v47 = vmul.f32 %v7288_v59, %v7268_v19  ;;  %v3402_v48 = vmul.f32 %v7293_v60, %v7268_v19  ;;  %v3403_v58 = vmul.f32 %v7298_v54, %v7268_v19 }
0x259d   :  { %5958 = vmatpush3.bf16.msra.mxu1 %v6918_v25  ;;  %5658 = vmatprep.mubr.msk.f32.mxu1 %vm6486_vm0, %v6487_v9  ;;  %v3405_v14 = vmul.f32 %v7303_v27, %v7268_v19  ;;  %v3406_v17 = vmul.f32 %v7308_v52, %v7268_v19  ;;  %v3407_v18 = vmul.f32 %v7313_v28, %v7268_v19 }
0x259e   :  { %5959 = vmatprep.subr.bf16.mxu1 %v6485_v1  ;;  %v3411_v55 = vsel %vm287_vm3, %v3401_v47, 0.0  ;;  %v3414_v62 = vsel %vm287_vm3, %v3402_v48, 0.0  ;;  %v3417_v26 = vsel %vm287_vm3, %v3403_v58, 0.0  ;;  %v3404_v20 = vmul.f32 %v7326_v2, %v7268_v19 }
0x259f   :  { %v3423_v10 = vsel %vm287_vm3, %v3405_v14, 0.0  ;;  %v3426_v63 = vsel %vm287_vm3, %v3406_v17, 0.0  ;;  %v3429_v40 = vsel %vm287_vm3, %v3407_v18, 0.0 }
0x25a0   :  { %v3420_v31 = vsel %vm287_vm3, %v3404_v20, 0.0 }
0x25a1   :  { %5961 = vmatpush3.bf16.msra.mxu1 %v6935_v34 }
0x25a2   :  { %5962 = vmatprep.subr.bf16.mxu1 %v6485_v1 }
0x266f   :  { %v3355_v3 = vpop.f32.mrb[22].mxu1 }
0x2670   :  { %v3356_v32 = vadd.f32 %v7065_v56, %v3355_v3  ;;  %v5649_v30 = vpop.f32.mrb[23].mxu1  ;;  %v3408_v56 = vsel %vm287_vm3, %v3400_v57, 0.0 }
0x2672   :  { %3360 = vst.msk [vmem:[#allocation12 + $0x6] sm:$0x3] %vm287_vm3, %v3356_v32  ;;  %v3361_v16 = vsel %vm287_vm3, %v3356_v32, -inf }
0x2673   :  { %3362 = vmax.xlane.f32.xlu1 %v3361_v16 }
0x2700   :  { %v3363_v29 = vpop.xlane.xlu1 %3362 }
0x2701   :  { %vm3364_vm11 = vcmp.eq.f32.partialorder %v3356_v32, %v3363_v29 }
0x2702   :  { %v3365_v36 = vsel %vm3364_vm11, %v6664_v15, 32 }
0x2703   :  { %v3366_v35 = vsel %vm287_vm3, %v3365_v36, 2147483647 }
0x2704   :  { %v3368_v51 = vshra.s32 %v3366_v35, 16  ;;  %v3367_v21 = vand.u32 65535, %v3366_v35 }
0x2706   :  { %v3370_v46 = vcvt.s32.f32 %v3368_v51  ;;  %v3369_v37 = vcvt.s32.f32 %v3367_v21 }
0x2708   :  { %3371 = vmin.xlane.f32.xlu0 %v3370_v46 }
0x270c   :  { %3409 = vadd.xlane.f32.xlu0 %v3408_v56 }
0x2710   :  { %3412 = vadd.xlane.f32.xlu0 %v3411_v55 }
0x2714   :  { %3415 = vadd.xlane.f32.xlu0 %v3414_v62 }
0x2718   :  { %3418 = vadd.xlane.f32.xlu0 %v3417_v26 }
0x271c   :  { %3424 = vadd.xlane.f32.xlu0 %v3423_v10 }
0x2720   :  { %3427 = vadd.xlane.f32.xlu0 %v3426_v63 }
0x2724   :  { %3430 = vadd.xlane.f32.xlu0 %v3429_v40 }
0x2795   :  { %v3372_v13 = vpop.xlane.xlu0 %3371 }
0x2796   :  { %vm3373_vm12 = vcmp.eq.f32.partialorder %v3370_v46, %v3372_v13  ;;  %v3378_v12 = vcvt.f32.s32 %v3372_v13 }
0x2797   :  { %v3374_v49 = vsel %vm3373_vm12, %v3369_v37, inf }
0x2798   :  { %3375 = vmin.xlane.f32.xlu1 %v3374_v49  ;;  %v3379_v4 = vshll.u32 %v3378_v12, 16 }
0x2799   :  { %v3410_v33 = vpop.xlane.xlu0 %3409 }
0x279a   :  { %v3432_v35 = vsel %vm2216_vm13, %v3410_v33, -inf }
0x279d   :  { %v3413_v41 = vpop.xlane.xlu0 %3412 }
0x279e   :  { %v3433_v56 = vsel %vm2216_vm13, %v3413_v41, -inf }
0x27a1   :  { %v3416_v3 = vpop.xlane.xlu0 %3415 }
0x27a2   :  { %v3434_v58 = vsel %vm2216_vm13, %v3416_v3, -inf }
0x27a5   :  { %v3419_v32 = vpop.xlane.xlu0 %3418 }
0x27a6   :  { %v3435_v47 = vsel %vm2216_vm13, %v3419_v32, -inf }
0x27a9   :  { %v3425_v30 = vpop.xlane.xlu0 %3424 }
0x27aa   :  { %v3438_v51 = vsel %vm2216_vm13, %v3425_v30, -inf }
0x27ab   :  { %v3439_v48 = vmax.f32 %v3433_v56, %v3438_v51 }
0x27ad   :  { %v3428_v16 = vpop.xlane.xlu0 %3427 }
0x27ae   :  { %v3440_v55 = vsel %vm2216_vm13, %v3428_v16, -inf }
0x27af   :  { %v3441_v26 = vmax.f32 %v3434_v58, %v3440_v55 }
0x27b1   :  { %v3431_v36 = vpop.xlane.xlu0 %3430 }
0x27b2   :  { %v3442_v46 = vsel %vm2216_vm13, %v3431_v36, -inf }
0x27b3   :  { %v3443_v62 = vmax.f32 %v3435_v47, %v3442_v46 }
0x27b5   :  { %v3445_v10 = vmax.f32 %v3441_v26, %v3443_v62 }
0x2825   :  { %v3376_v53 = vpop.xlane.xlu1 %3375 }
0x2826   :  { %v3377_v7 = vcvt.f32.s32 %v3376_v53 }
0x2828   :  { %v3380_v23 = vadd.s32 %v3379_v4, %v3377_v7 }
0x282a   :  { %v3392_v22 = vsel %vm3391_vm15, %v5059_v61, %v3380_v23 }
0x282b   :  { %3394 = vperm.xlu1 %6079, %v3392_v22  }
0x284f   :  { %3421 = vadd.xlane.f32.xlu1 %v3420_v31 }
0x28aa   :  { %v3395_v8 = vpop.permute.xlu1 %3394 }
0x28ab   :  { %vm3396_vm1 = vcmp.eq.s32.totalorder %v6664_v15, %v3395_v8 }
0x28ac   :  { %v5060_v24 = vsel %vm3396_vm1, 1.0, %v6487_v9 }
0x28ad   :  { %5659 = vmatmul.mubr.msk.f32.vlgmr.msra.gmra.mrb[24].mxu1 %vm111_vm4, %v5060_v24 }
0x28ae   :  { %5964 = vmatpush3.bf16.msra.mxu1 %v6950_v45  ;;  %5669 = vmatprep.mubr.msk.f32.mxu1 %vm6486_vm0, %v6487_v9 }
0x28af   :  { %5965 = vmatprep.subr.bf16.mxu1 %v6485_v1 }
0x28b2   :  { %5967 = vmatpush3.bf16.msra.mxu1 %v6966_v38 }
0x28b3   :  { %5986 = vmatprep.subr.bf16.mxu1 %v6485_v1 }
0x28b5   :  { %5670 = vmatmul.mubr.msk.f32.vlgmr.msra.gmra.mrb[24].mxu1 %vm111_vm4, %v7268_v19 }
0x28b6   :  { %5988 = vmatpush3.bf16.msra.mxu1 %v7038_v44  ;;  %5713 = vmatprep.mubr.msk.f32.mxu1 %vm6486_vm0, %v6487_v9 }
0x28b7   :  { %5989 = vmatprep.subr.bf16.mxu1 %v6485_v1 }
0x28ba   :  { %5991 = vmatpush3.bf16.msra.mxu1 %v7041_v50 }
0x28bb   :  { %5992 = vmatprep.subr.bf16.mxu1 %v6485_v1 }
0x28dc   :  { %v3422_v29 = vpop.xlane.xlu1 %3421 }
0x28dd   :  { %v3436_v19 = vsel %vm2216_vm13, %v3422_v29, -inf }
0x28de   :  { %v3437_v57 = vmax.f32 %v3432_v35, %v3436_v19 }
0x28e0   :  { %v3444_v14 = vmax.f32 %v3437_v57, %v3439_v48 }
0x28e2   :  { %v3446_v17 = vmax.f32 %v3444_v14, %v3445_v10  ;;  %v7364_v10 = vld [vmem:[#allocation3] sm:$0x3] }
0x28e4   :  { %v3447_v63 = vsub.f32 %v3410_v33, %v3446_v17  ;;  %v3448_v18 = vsub.f32 %v3413_v41, %v3446_v17  ;;  %v3449_v13 = vsub.f32 %v3416_v3, %v3446_v17  ;;  %v3450_v37 = vsub.f32 %v3419_v32, %v3446_v17 }
0x28e5   :  { %v3451_v39 = vsub.f32 %v3422_v29, %v3446_v17  ;;  %v3452_v53 = vsub.f32 %v3425_v30, %v3446_v17  ;;  %v3453_v23 = vsub.f32 %v3428_v16, %v3446_v17  ;;  %v3454_v24 = vsub.f32 %v3431_v36, %v3446_v17 }
0x28e6   :  { %v3455_v40 = vmul.f32 1.442695, %v3447_v63  ;;  %v3457_v21 = vmul.f32 1.442695, %v3448_v18  ;;  %v3459_v49 = vmul.f32 1.442695, %v3449_v13 }
0x28e7   :  { %v3461_v5 = vmul.f32 1.442695, %v3450_v37  ;;  %v3463_v4 = vmul.f32 1.442695, %v3451_v39  ;;  %v3465_v22 = vmul.f32 1.442695, %v3452_v53 }
0x28e8   :  { %6222 = vpow2.f32 %v3455_v40  ;;  %v3467_v8 = vmul.f32 1.442695, %v3453_v23  ;;  %v3469_v32 = vmul.f32 1.442695, %v3454_v24  ;;  %v7367_v63 = vld [vmem:[#allocation3 + $0x2] sm:$0x3] }
0x28e9   :  { %6224 = vpow2.f32 %v3457_v21  ;;  %v7379_v23 = vld [vmem:[#allocation3 + $0x8] sm:$0x3]  ;;  %v7383_v24 = vld [vmem:[#allocation3 + $0xa] sm:$0x3] }
0x28ea   :  { %6226 = vpow2.f32 %v3459_v49  ;;  %v7372_v49 = vld [vmem:[#allocation3 + $0x4] sm:$0x3] }
0x28eb   :  { %6228 = vpow2.f32 %v3461_v5 }
0x28ec   :  { %6230 = vpow2.f32 %v3463_v4 }
0x28ed   :  { %6232 = vpow2.f32 %v3465_v22 }
0x28ee   :  { %6234 = vpow2.f32 %v3467_v8 }
0x28ef   :  { %6236 = vpow2.f32 %v3469_v32 }
0x28f2   :  { %v6223_v12 = vpop.eup %6222 }
0x28f3   :  { %v6225_v11 = vpop.eup %6224  ;;  %v3471_v7 = vsel %vm2216_vm13, %v6223_v12, 0.0 }
0x28f4   :  { %v3472_v61 = vsel %vm2216_vm13, %v6225_v11, 0.0  ;;  %v6227_v20 = vpop.eup %6226 }
0x28f5   :  { %v3473_v31 = vadd.f32 %v3472_v61, %v3471_v7  ;;  %v3474_v33 = vsel %vm2216_vm13, %v6227_v20, 0.0  ;;  %v6229_v41 = vpop.eup %6228 }
0x28f6   :  { %v3476_v30 = vsel %vm2216_vm13, %v6229_v41, 0.0  ;;  %v6231_v29 = vpop.eup %6230 }
0x28f7   :  { %v3475_v3 = vadd.f32 %v3474_v33, %v3473_v31  ;;  %v3478_v16 = vsel %vm2216_vm13, %v6231_v29, 0.0  ;;  %v6233_v35 = vpop.eup %6232 }
0x28f8   :  { %v3480_v46 = vsel %vm2216_vm13, %v6233_v35, 0.0  ;;  %v6235_v57 = vpop.eup %6234 }
0x28f9   :  { %v3477_v19 = vadd.f32 %v3476_v30, %v3475_v3  ;;  %v3482_v36 = vsel %vm2216_vm13, %v6235_v57, 0.0  ;;  %v6237_v47 = vpop.eup %6236  ;;  %v7387_v30 = vld [vmem:[#allocation3 + $0xc] sm:$0x3] }
0x28fa   :  { %v3484_v48 = vsel %vm2216_vm13, %v6237_v47, 0.0 }
0x28fb   :  { %v3479_v51 = vadd.f32 %v3478_v16, %v3477_v19 }
0x28fd   :  { %v3481_v56 = vadd.f32 %v3480_v46, %v3479_v51 }
0x28ff   :  { %v3483_v55 = vadd.f32 %v3482_v36, %v3481_v56 }
0x2901   :  { %v3485_v62 = vadd.f32 %v3484_v48, %v3483_v55 }
0x2903   :  { %6238 = vrcp.f32 %v3485_v62 }
0x290d   :  { %v6239_v58 = vpop.eup %6238 }
0x290e   :  { %v3487_v26 = vmul.f32 %v6239_v58, %v6223_v12  ;;  %v3488_v14 = vmul.f32 %v6239_v58, %v6225_v11  ;;  %v3489_v40 = vmul.f32 %v6239_v58, %v6227_v20  ;;  %v3490_v37 = vmul.f32 %v6239_v58, %v6229_v41  ;;  %v7375_v11 = vld [vmem:[#allocation3 + $0x6] sm:$0x3] }
0x290f   :  { %v3491_v12 = vmul.f32 %v6239_v58, %v6231_v29  ;;  %v3492_v61 = vmul.f32 %v6239_v58, %v6233_v35  ;;  %v3493_v8 = vmul.f32 %v6239_v58, %v6235_v57  ;;  %v3494_v32 = vmul.f32 %v6239_v58, %v6237_v47  ;;  %v7391_v35 = vld [vmem:[#allocation3 + $0xe] sm:$0x3] }
0x2910   :  { %v3495_v17 = vmul.f32 %v7364_v10, %v3487_v26  ;;  %v3496_v18 = vmul.f32 %v7367_v63, %v3488_v14  ;;  %v3497_v39 = vmul.f32 %v7372_v49, %v3489_v40  ;;  %v3498_v53 = vmul.f32 %v7375_v11, %v3490_v37 }
0x2911   :  { %v3499_v22 = vmul.f32 %v7379_v23, %v3491_v12  ;;  %v3500_v33 = vmul.f32 %v7383_v24, %v3492_v61  ;;  %v3501_v29 = vmul.f32 %v7387_v30, %v3493_v8  ;;  %v3502_v51 = vmul.f32 %v7391_v35, %v3494_v32 }
0x2912   :  { %v3503_v21 = vsel %vm2216_vm13, %v3495_v17, 0.0  ;;  %v3504_v13 = vsel %vm2216_vm13, %v3496_v18, 0.0  ;;  %v3506_v4 = vsel %vm2216_vm13, %v3497_v39, 0.0  ;;  %v3508_v20 = vsel %vm2216_vm13, %v3498_v53, 0.0 }
0x2913   :  { %v3505_v5 = vadd.f32 %v3504_v13, %v3503_v21  ;;  %v3510_v41 = vsel %vm2216_vm13, %v3499_v22, 0.0  ;;  %v3512_v19 = vsel %vm2216_vm13, %v3500_v33, 0.0  ;;  %v3514_v46 = vsel %vm2216_vm13, %v3501_v29, 0.0 }
0x2914   :  { %v3516_v56 = vsel %vm2216_vm13, %v3502_v51, 0.0 }
0x2915   :  { %v3507_v7 = vadd.f32 %v3506_v4, %v3505_v5  ;;  %v7417_v4 = vld [vmem:[%s7722_s9] ss:$0 sm:$0xff] }
0x2917   :  { %v3509_v31 = vadd.f32 %v3508_v20, %v3507_v7 }
0x2919   :  { %v3511_v3 = vadd.f32 %v3510_v41, %v3509_v31 }
0x291b   :  { %v3513_v16 = vadd.f32 %v3512_v19, %v3511_v3 }
0x291d   :  { %v3515_v57 = vadd.f32 %v3514_v46, %v3513_v16 }
0x291f   :  { %v3517_v36 = vadd.f32 %v3516_v56, %v3515_v57 }
0x2988   :  { %v3658_v55 = vpop.f32.mrb[24].mxu1 }
0x2989   :  { %v6032_v48 = vadd.f32 %v3658_v55, %v3517_v36  ;;  %v5671_v47 = vpop.f32.mrb[25].mxu1 }
0x298b   :  { %6240 = vtanh.f32 %v6032_v48  ;;  %v5063_v58 = vmul.f32 -1.442695, %v6032_v48 }
0x298d   :  { %6242 = vpow2.f32 %v5063_v58 }
0x2995   :  { %v6241_v62 = vpop.eup %6240 }
0x2996   :  { %3672 = vrot.lane.b32.xlu0 %v6241_v62, %s6488_s4 }
0x2997   :  { %v6243_v26 = vpop.eup %6242 }
0x2998   :  { %v3666_v14 = vadd.f32 1.0, %v6243_v26 }
0x299a   :  { %6244 = vrcp.f32 %v3666_v14 }
0x29a4   :  { %v6245_v17 = vpop.eup %6244 }
0x29a5   :  { %v3670_v21 = vmul.f32 %v6245_v17, %v7263_v6 }
0x2a08   :  { %v3673_v18 = vpop.permute.xlu0 %3672 }
0x2a09   :  { %v3675_v40 = vmul.f32 %v6245_v17, %v3673_v18  ;;  %v5065_v18 = vld [vmem:[%s7713_s0 + $0x4] sm:$0x1] }
0x2a0a   :  { %vm3786_vm6 = vcmp.gt.s32.totalorder %v5065_v18, 0 }
0x2a0b   :  { %3677 = vrot.lane.b32.xlu0 %v3675_v40, %s6489_s11  ;;  %v3789_v40 = vsel %vm3786_vm6, 1, %v6484_v0 }
0x2a7d   :  { %v3678_v13 = vpop.permute.xlu0 %3677 }
0x2a7e   :  { %v7399_v37 = vadd.f32 %v3678_v13, %v3670_v21  ;;  %v3793_v13 = vrot.slane %v3789_v40, %v7097_v43 }
0x2a80   :  { %6246 = vtanh.f32 %v7399_v37  ;;  %vm3794_vm7 = vcmp.eq.s32.totalorder %v3793_v13, 1 }
0x2a8a   :  { %v6247_v39 = vpop.eup %6246 }
0x2a8b   :  { %3683 = vrot.lane.b32.xlu1 %v6247_v39, %s6488_s4 }
0x2afd   :  { %v3684_v5 = vpop.permute.xlu1 %3683 }
0x2afe   :  { %v3686_v12 = vmul.f32 %v6245_v17, %v3684_v5 }
0x2b00   :  { %3688 = vrot.lane.b32.xlu0 %v3686_v12, %s6489_s11 }
0x2b72   :  { %v7404_v53 = vpop.permute.xlu0 %3688 }
0x2b73   :  { %5681 = vmatmul.mubr.msk.f32.vlgmr.msra.gmra.mrb[22].mxu0 %vm111_vm4, %v7404_v53  ;;  %v3803_v3 = vmul.f32 %v7283_v42, %v7404_v53  ;;  %v3804_v29 = vmul.f32 %v7288_v59, %v7404_v53  ;;  %v3805_v16 = vmul.f32 %v7293_v60, %v7404_v53  ;;  %v3807_v46 = vmul.f32 %v7326_v2, %v7404_v53 }
0x2b74   :  { %5976 = vmatpush3.bf16.msra.mxu0 %v6918_v25  ;;  %5691 = vmatprep.mubr.msk.f32.mxu0 %vm6486_vm0, %v6487_v9  ;;  %v3808_v56 = vmul.f32 %v7303_v27, %v7404_v53  ;;  %v3809_v55 = vmul.f32 %v7308_v52, %v7404_v53  ;;  %v3810_v47 = vmul.f32 %v7313_v28, %v7404_v53 }
0x2b75   :  { %5977 = vmatprep.subr.bf16.mxu0 %v6485_v1  ;;  %v3811_v32 = vsel %vm287_vm3, %v3803_v3, 0.0  ;;  %v3814_v19 = vsel %vm287_vm3, %v3804_v29, 0.0  ;;  %v3817_v51 = vsel %vm287_vm3, %v3805_v16, 0.0  ;;  %v3823_v57 = vsel %vm287_vm3, %v3807_v46, 0.0 }
0x2b76   :  { %v3826_v36 = vsel %vm287_vm3, %v3808_v56, 0.0  ;;  %v3829_v48 = vsel %vm287_vm3, %v3809_v55, 0.0  ;;  %v3832_v62 = vsel %vm287_vm3, %v3810_v47, 0.0 }
0x2b78   :  { %5979 = vmatpush3.bf16.msra.mxu0 %v6935_v34 }
0x2b79   :  { %5980 = vmatprep.subr.bf16.mxu0 %v6485_v1 }
0x2c46   :  { %v3758_v6 = vpop.f32.mrb[22].mxu0 }
0x2c47   :  { %v3759_v7 = vadd.f32 %v7417_v4, %v3758_v6  ;;  %v5682_v61 = vpop.f32.mrb[23].mxu0  ;;  %v5066_v6 = vld [vmem:[%s7715_s2 + $0x8] sm:$0x3] }
0x2c49   :  { %3763 = vst.msk [vmem:[#allocation12 + $0x8] sm:$0x3] %vm287_vm3, %v3759_v7  ;;  %v3764_v22 = vsel %vm287_vm3, %v3759_v7, -inf }
0x2c4a   :  { %3765 = vmax.xlane.f32.xlu0 %v3764_v22  ;;  %v3806_v22 = vmul.f32 %v7298_v54, %v7404_v53 }
0x2cd7   :  { %v3766_v20 = vpop.xlane.xlu0 %3765 }
0x2cd8   :  { %vm3767_vm2 = vcmp.eq.f32.partialorder %v3759_v7, %v3766_v20  ;;  %v3820_v20 = vsel %vm287_vm3, %v3806_v22, 0.0 }
0x2cd9   :  { %v3768_v31 = vsel %vm3767_vm2, %v6664_v15, 32 }
0x2cda   :  { %v3769_v8 = vsel %vm287_vm3, %v3768_v31, 2147483647 }
0x2cdb   :  { %v3771_v33 = vshra.s32 %v3769_v8, 16  ;;  %v3770_v58 = vand.u32 65535, %v3769_v8 }
0x2cdd   :  { %v3773_v41 = vcvt.s32.f32 %v3771_v33  ;;  %v3772_v14 = vcvt.s32.f32 %v3770_v58 }
0x2cdf   :  { %3774 = vmin.xlane.f32.xlu1 %v3773_v41 }
0x2ce3   :  { %3812 = vadd.xlane.f32.xlu1 %v3811_v32 }
0x2ce7   :  { %3815 = vadd.xlane.f32.xlu1 %v3814_v19 }
0x2ceb   :  { %3818 = vadd.xlane.f32.xlu1 %v3817_v51 }
0x2cef   :  { %3824 = vadd.xlane.f32.xlu1 %v3823_v57 }
0x2cf3   :  { %3827 = vadd.xlane.f32.xlu1 %v3826_v36 }
0x2cf7   :  { %3830 = vadd.xlane.f32.xlu1 %v3829_v48 }
0x2cfb   :  { %3833 = vadd.xlane.f32.xlu1 %v3832_v62 }
0x2d6c   :  { %v3775_v26 = vpop.xlane.xlu1 %3774 }
0x2d6d   :  { %vm3776_vm5 = vcmp.eq.f32.partialorder %v3773_v41, %v3775_v26  ;;  %v3781_v21 = vcvt.f32.s32 %v3775_v26 }
0x2d6e   :  { %v3777_v17 = vsel %vm3776_vm5, %v3772_v14, inf }
0x2d6f   :  { %3778 = vmin.xlane.f32.xlu0 %v3777_v17  ;;  %v3782_v5 = vshll.u32 %v3781_v21, 16 }
0x2d70   :  { %v3813_v33 = vpop.xlane.xlu1 %3812 }
0x2d71   :  { %v3835_v26 = vsel %vm2216_vm13, %v3813_v33, -inf }
0x2d74   :  { %v3816_v41 = vpop.xlane.xlu1 %3815 }
0x2d75   :  { %v3836_v55 = vsel %vm2216_vm13, %v3816_v41, -inf }
0x2d78   :  { %v3819_v3 = vpop.xlane.xlu1 %3818 }
0x2d79   :  { %v3837_v48 = vsel %vm2216_vm13, %v3819_v3, -inf }
0x2d7c   :  { %v3825_v32 = vpop.xlane.xlu1 %3824 }
0x2d7d   :  { %v3839_v47 = vsel %vm2216_vm13, %v3825_v32, -inf }
0x2d7e   :  { %v3840_v14 = vmax.f32 %v3835_v26, %v3839_v47 }
0x2d80   :  { %v3828_v29 = vpop.xlane.xlu1 %3827 }
0x2d81   :  { %v3841_v46 = vsel %vm2216_vm13, %v3828_v29, -inf }
0x2d82   :  { %v3842_v62 = vmax.f32 %v3836_v55, %v3841_v46 }
0x2d84   :  { %v3831_v19 = vpop.xlane.xlu1 %3830  ;;  %v3847_v18 = vmax.f32 %v3840_v14, %v3842_v62 }
0x2d85   :  { %v3843_v57 = vsel %vm2216_vm13, %v3831_v19, -inf }
0x2d86   :  { %v3844_v58 = vmax.f32 %v3837_v48, %v3843_v57 }
0x2d88   :  { %v3834_v51 = vpop.xlane.xlu1 %3833 }
0x2d89   :  { %v3845_v56 = vsel %vm2216_vm13, %v3834_v51, -inf }
0x2dfc   :  { %v3779_v39 = vpop.xlane.xlu0 %3778 }
0x2dfd   :  { %v3780_v12 = vcvt.f32.s32 %v3779_v39 }
0x2dff   :  { %v3783_v7 = vadd.s32 %v3782_v5, %v3780_v12 }
0x2e01   :  { %v3795_v61 = vsel %vm3794_vm7, %v5066_v6, %v3783_v7 }
0x2e02   :  { %3797 = vperm.xlu0 %6078, %v3795_v61  }
0x2e21   :  { %3821 = vadd.xlane.f32.xlu0 %v3820_v20 }
0x2e81   :  { %v3798_v31 = vpop.permute.xlu0 %3797 }
0x2e82   :  { %vm3799_vm8 = vcmp.eq.s32.totalorder %v6664_v15, %v3798_v31 }
0x2e83   :  { %v5067_v8 = vsel %vm3799_vm8, 1.0, %v6487_v9 }
0x2e84   :  { %5692 = vmatmul.mubr.msk.f32.vlgmr.msra.gmra.mrb[24].mxu0 %vm111_vm4, %v5067_v8 }
0x2e85   :  { %5982 = vmatpush3.bf16.msra.mxu0 %v6950_v45  ;;  %5702 = vmatprep.mubr.msk.f32.mxu0 %vm6486_vm0, %v6487_v9 }
0x2e86   :  { %5983 = vmatprep.subr.bf16.mxu0 %v6485_v1 }
0x2e89   :  { %5985 = vmatpush3.bf16.msra.mxu0 %v6966_v38 }
0x2e8a   :  { %6004 = vmatprep.subr.bf16.mxu0 %v6485_v1 }
0x2e8c   :  { %5703 = vmatmul.mubr.msk.f32.vlgmr.msra.gmra.mrb[24].mxu0 %vm111_vm4, %v7404_v53 }
0x2e8d   :  { %6006 = vmatpush3.bf16.msra.mxu0 %v7038_v44  ;;  %5746 = vmatprep.mubr.msk.f32.mxu0 %vm6486_vm0, %v6487_v9 }
0x2e8e   :  { %6007 = vmatprep.subr.bf16.mxu0 %v6485_v1 }
0x2e91   :  { %6009 = vmatpush3.bf16.msra.mxu0 %v7041_v50 }
0x2e92   :  { %6010 = vmatprep.subr.bf16.mxu0 %v6485_v1 }
0x2eae   :  { %v3822_v16 = vpop.xlane.xlu0 %3821 }
0x2eaf   :  { %v3838_v53 = vsel %vm2216_vm13, %v3822_v16, -inf }
0x2eb0   :  { %v3846_v36 = vmax.f32 %v3838_v53, %v3845_v56 }
0x2eb2   :  { %v3848_v17 = vmax.f32 %v3844_v58, %v3846_v36 }
0x2eb4   :  { %v3849_v40 = vmax.f32 %v3847_v18, %v3848_v17 }
0x2eb6   :  { %v3850_v21 = vsub.f32 %v3813_v33, %v3849_v40  ;;  %v3851_v13 = vsub.f32 %v3816_v41, %v3849_v40  ;;  %v3852_v12 = vsub.f32 %v3819_v3, %v3849_v40  ;;  %v3853_v6 = vsub.f32 %v3822_v16, %v3849_v40 }
0x2eb7   :  { %v3854_v61 = vsub.f32 %v3825_v32, %v3849_v40  ;;  %v3855_v8 = vsub.f32 %v3828_v29, %v3849_v40  ;;  %v3856_v41 = vsub.f32 %v3831_v19, %v3849_v40  ;;  %v3857_v36 = vsub.f32 %v3834_v51, %v3849_v40 }
0x2eb8   :  { %v3858_v39 = vmul.f32 1.442695, %v3850_v21  ;;  %v3860_v5 = vmul.f32 1.442695, %v3851_v13  ;;  %v3862_v7 = vmul.f32 1.442695, %v3852_v12 }
0x2eb9   :  { %v3864_v22 = vmul.f32 1.442695, %v3853_v6  ;;  %v3866_v53 = vmul.f32 1.442695, %v3854_v61  ;;  %v3868_v57 = vmul.f32 1.442695, %v3855_v8 }
0x2eba   :  { %6248 = vpow2.f32 %v3858_v39  ;;  %v3870_v16 = vmul.f32 1.442695, %v3856_v41  ;;  %v3872_v29 = vmul.f32 1.442695, %v3857_v36 }
0x2ebb   :  { %6250 = vpow2.f32 %v3860_v5 }
0x2ebc   :  { %6252 = vpow2.f32 %v3862_v7 }
0x2ebd   :  { %6254 = vpow2.f32 %v3864_v22 }
0x2ebe   :  { %6256 = vpow2.f32 %v3866_v53 }
0x2ebf   :  { %6258 = vpow2.f32 %v3868_v57 }
0x2ec0   :  { %6260 = vpow2.f32 %v3870_v16 }
0x2ec1   :  { %6262 = vpow2.f32 %v3872_v29 }
0x2ec4   :  { %v6249_v20 = vpop.eup %6248 }
0x2ec5   :  { %v6251_v31 = vpop.eup %6250  ;;  %v3874_v46 = vsel %vm2216_vm13, %v6249_v20, 0.0 }
0x2ec6   :  { %v3875_v33 = vsel %vm2216_vm13, %v6251_v31, 0.0  ;;  %v6253_v3 = vpop.eup %6252 }
0x2ec7   :  { %v3876_v56 = vadd.f32 %v3875_v33, %v3874_v46  ;;  %v3877_v32 = vsel %vm2216_vm13, %v6253_v3, 0.0  ;;  %v6255_v55 = vpop.eup %6254 }
0x2ec8   :  { %v3879_v47 = vsel %vm2216_vm13, %v6255_v55, 0.0  ;;  %v6257_v62 = vpop.eup %6256 }
0x2ec9   :  { %v3878_v48 = vadd.f32 %v3877_v32, %v3876_v56  ;;  %v3881_v19 = vsel %vm2216_vm13, %v6257_v62, 0.0  ;;  %v6259_v26 = vpop.eup %6258 }
0x2eca   :  { %v3883_v17 = vsel %vm2216_vm13, %v6259_v26, 0.0  ;;  %v6261_v51 = vpop.eup %6260 }
0x2ecb   :  { %v3880_v58 = vadd.f32 %v3879_v47, %v3878_v48  ;;  %v3885_v40 = vsel %vm2216_vm13, %v6261_v51, 0.0  ;;  %v6263_v21 = vpop.eup %6262 }
0x2ecc   :  { %v3887_v39 = vsel %vm2216_vm13, %v6263_v21, 0.0 }
0x2ecd   :  { %v3882_v14 = vadd.f32 %v3881_v19, %v3880_v58 }
0x2ecf   :  { %v3884_v18 = vadd.f32 %v3883_v17, %v3882_v14 }
0x2ed1   :  { %v3886_v13 = vadd.f32 %v3885_v40, %v3884_v18 }
0x2ed3   :  { %v3888_v5 = vadd.f32 %v3887_v39, %v3886_v13 }
0x2ed5   :  { %6264 = vrcp.f32 %v3888_v5 }
0x2edf   :  { %v6265_v12 = vpop.eup %6264 }
0x2ee0   :  { %v3890_v6 = vmul.f32 %v6265_v12, %v6249_v20  ;;  %v3891_v7 = vmul.f32 %v6265_v12, %v6251_v31  ;;  %v3892_v8 = vmul.f32 %v6265_v12, %v6253_v3  ;;  %v3893_v33 = vmul.f32 %v6265_v12, %v6255_v55 }
0x2ee1   :  { %v3894_v56 = vmul.f32 %v6265_v12, %v6257_v62  ;;  %v3895_v31 = vmul.f32 %v6265_v12, %v6259_v26  ;;  %v3896_v29 = vmul.f32 %v6265_v12, %v6261_v51  ;;  %v3897_v19 = vmul.f32 %v6265_v12, %v6263_v21 }
0x2ee2   :  { %v3898_v61 = vmul.f32 %v7364_v10, %v3890_v6  ;;  %v3899_v22 = vmul.f32 %v7367_v63, %v3891_v7  ;;  %v3900_v41 = vmul.f32 %v7372_v49, %v3892_v8  ;;  %v3901_v36 = vmul.f32 %v7375_v11, %v3893_v33 }
0x2ee3   :  { %v3902_v32 = vmul.f32 %v7379_v23, %v3894_v56  ;;  %v3903_v47 = vmul.f32 %v7383_v24, %v3895_v31  ;;  %v3904_v62 = vmul.f32 %v7387_v30, %v3896_v29  ;;  %v3905_v18 = vmul.f32 %v7391_v35, %v3897_v19 }
0x2ee4   :  { %v3906_v53 = vsel %vm2216_vm13, %v3898_v61, 0.0  ;;  %v3907_v46 = vsel %vm2216_vm13, %v3899_v22, 0.0  ;;  %v3909_v16 = vsel %vm2216_vm13, %v3900_v41, 0.0  ;;  %v3911_v48 = vsel %vm2216_vm13, %v3901_v36, 0.0 }
0x2ee5   :  { %v3908_v57 = vadd.f32 %v3907_v46, %v3906_v53  ;;  %v3913_v55 = vsel %vm2216_vm13, %v3902_v32, 0.0  ;;  %v3915_v14 = vsel %vm2216_vm13, %v3903_v47, 0.0  ;;  %v3917_v26 = vsel %vm2216_vm13, %v3904_v62, 0.0 }
0x2ee6   :  { %v3919_v13 = vsel %vm2216_vm13, %v3905_v18, 0.0 }
0x2ee7   :  { %v3910_v20 = vadd.f32 %v3909_v16, %v3908_v57 }
0x2ee9   :  { %v3912_v3 = vadd.f32 %v3911_v48, %v3910_v20 }
0x2eeb   :  { %v3914_v58 = vadd.f32 %v3913_v55, %v3912_v3 }
0x2eed   :  { %v3916_v17 = vadd.f32 %v3915_v14, %v3914_v58 }
0x2eef   :  { %v3918_v40 = vadd.f32 %v3917_v26, %v3916_v17 }
0x2ef1   :  { %v3920_v39 = vadd.f32 %v3919_v13, %v3918_v40 }
0x2f5f   :  { %v4061_v51 = vpop.f32.mrb[24].mxu0 }
0x2f60   :  { %v6033_v5 = vadd.f32 %v4061_v51, %v3920_v39  ;;  %v5704_v6 = vpop.f32.mrb[25].mxu0 }
0x2f62   :  { %6266 = vtanh.f32 %v6033_v5  ;;  %v5070_v21 = vmul.f32 -1.442695, %v6033_v5 }
0x2f64   :  { %6268 = vpow2.f32 %v5070_v21 }
0x2f6c   :  { %v6267_v7 = vpop.eup %6266 }
0x2f6d   :  { %4075 = vrot.lane.b32.xlu1 %v6267_v7, %s6488_s4 }
0x2f6e   :  { %v6269_v12 = vpop.eup %6268 }
0x2f6f   :  { %v4069_v61 = vadd.f32 1.0, %v6269_v12 }
0x2f71   :  { %6270 = vrcp.f32 %v4069_v61 }
0x2f7b   :  { %v6271_v22 = vpop.eup %6270 }
0x2f7c   :  { %v4073_v46 = vmul.f32 %v6271_v22, %v7399_v37 }
0x2fdf   :  { %v4076_v8 = vpop.permute.xlu1 %4075 }
0x2fe0   :  { %v4078_v53 = vmul.f32 %v6271_v22, %v4076_v8  ;;  %v5073_v8 = vld [vmem:[%s7715_s2 + $0xa] sm:$0x3] }
0x2fe2   :  { %4080 = vrot.lane.b32.xlu0 %v4078_v53, %s6489_s11 }
0x3054   :  { %v4081_v33 = vpop.permute.xlu0 %4080 }
0x3055   :  { %v7508_v41 = vadd.f32 %v4081_v33, %v4073_v46 }
0x3057   :  { %6272 = vtanh.f32 %v7508_v41 }
0x3061   :  { %v6273_v57 = vpop.eup %6272 }
0x3062   :  { %4086 = vrot.lane.b32.xlu1 %v6273_v57, %s6488_s4 }
0x30d4   :  { %v4087_v56 = vpop.permute.xlu1 %4086 }
0x30d5   :  { %v4089_v36 = vmul.f32 %v6271_v22, %v4087_v56 }
0x30d7   :  { %4091 = vrot.lane.b32.xlu1 %v4089_v36, %s6489_s11 }
0x3149   :  { %v7513_v16 = vpop.permute.xlu1 %4091 }
0x314a   :  { %5714 = vmatmul.mubr.msk.f32.vlgmr.msra.gmra.mrb[26].mxu1 %vm111_vm4, %v7513_v16  ;;  %v4206_v58 = vmul.f32 %v7283_v42, %v7513_v16  ;;  %v4207_v62 = vmul.f32 %v7288_v59, %v7513_v16  ;;  %v4208_v17 = vmul.f32 %v7293_v60, %v7513_v16  ;;  %v4209_v26 = vmul.f32 %v7298_v54, %v7513_v16 }
0x314b   :  { %5994 = vmatpush3.bf16.msra.mxu1 %v6918_v25  ;;  %5724 = vmatprep.mubr.msk.f32.mxu1 %vm6486_vm0, %v6487_v9  ;;  %v4211_v40 = vmul.f32 %v7303_v27, %v7513_v16  ;;  %v4212_v13 = vmul.f32 %v7308_v52, %v7513_v16  ;;  %v4213_v39 = vmul.f32 %v7313_v28, %v7513_v16  ;;  %v5072_v52 = vld [vmem:[%s7713_s0 + $0x5] sm:$0x1] }
0x314c   :  { %5995 = vmatprep.subr.bf16.mxu1 %v6485_v1  ;;  %v4214_v19 = vsel %vm287_vm3, %v4206_v58, 0.0  ;;  %v4217_v14 = vsel %vm287_vm3, %v4207_v62, 0.0  ;;  %v4220_v18 = vsel %vm287_vm3, %v4208_v17, 0.0  ;;  %v4223_v42 = vsel %vm287_vm3, %v4209_v26, 0.0 }
0x314d   :  { %v4229_v59 = vsel %vm287_vm3, %v4211_v40, 0.0  ;;  %v4232_v60 = vsel %vm287_vm3, %v4212_v13, 0.0  ;;  %v4235_v54 = vsel %vm287_vm3, %v4213_v39, 0.0  ;;  %vm4189_vm11 = vcmp.gt.s32.totalorder %v5072_v52, 0 }
0x314e   :  { %v4192_v7 = vsel %vm4189_vm11, 1, %v6484_v0  ;;  %v4210_v33 = vmul.f32 %v7326_v2, %v7513_v16 }
0x314f   :  { %5997 = vmatpush3.bf16.msra.mxu1 %v6935_v34  ;;  %v4196_v28 = vrot.slane %v4192_v7, %v7097_v43 }
0x3150   :  { %5998 = vmatprep.subr.bf16.mxu1 %v6485_v1  ;;  %v4226_v57 = vsel %vm287_vm3, %v4210_v33, 0.0 }
0x3151   :  { %vm4197_vm12 = vcmp.eq.s32.totalorder %v4196_v28, 1 }
0x321d   :  { %v4161_v37 = vpop.f32.mrb[26].mxu1 }
0x321e   :  { %v4162_v20 = vadd.f32 %v7417_v4, %v4161_v37  ;;  %v5715_v31 = vpop.f32.mrb[27].mxu1 }
0x3220   :  { %4166 = vst.msk [vmem:[#allocation12 + $0xa] sm:$0x3] %vm287_vm3, %v4162_v20  ;;  %v4167_v32 = vsel %vm287_vm3, %v4162_v20, -inf }
0x3221   :  { %4168 = vmax.xlane.f32.xlu1 %v4167_v32 }
0x32ae   :  { %v4169_v48 = vpop.xlane.xlu1 %4168 }
0x32af   :  { %vm4170_vm9 = vcmp.eq.f32.partialorder %v4162_v20, %v4169_v48 }
0x32b0   :  { %v4171_v3 = vsel %vm4170_vm9, %v6664_v15, 32 }
0x32b1   :  { %v4172_v29 = vsel %vm287_vm3, %v4171_v3, 2147483647 }
0x32b2   :  { %v4174_v47 = vshra.s32 %v4172_v29, 16  ;;  %v4173_v51 = vand.u32 65535, %v4172_v29 }
0x32b4   :  { %v4176_v55 = vcvt.s32.f32 %v4174_v47  ;;  %v4175_v6 = vcvt.s32.f32 %v4173_v51 }
0x32b6   :  { %4177 = vmin.xlane.f32.xlu0 %v4176_v55 }
0x32ba   :  { %4215 = vadd.xlane.f32.xlu0 %v4214_v19 }
0x32be   :  { %4218 = vadd.xlane.f32.xlu0 %v4217_v14 }
0x32c2   :  { %4221 = vadd.xlane.f32.xlu0 %v4220_v18 }
0x32c6   :  { %4224 = vadd.xlane.f32.xlu0 %v4223_v42 }
0x32ca   :  { %4230 = vadd.xlane.f32.xlu0 %v4229_v59 }
0x32ce   :  { %4233 = vadd.xlane.f32.xlu0 %v4232_v60 }
0x32d2   :  { %4236 = vadd.xlane.f32.xlu0 %v4235_v54 }
0x3343   :  { %v4178_v5 = vpop.xlane.xlu0 %4177 }
0x3344   :  { %vm4179_vm10 = vcmp.eq.f32.partialorder %v4176_v55, %v4178_v5  ;;  %v4184_v21 = vcvt.f32.s32 %v4178_v5 }
0x3345   :  { %v4180_v27 = vsel %vm4179_vm10, %v4175_v6, inf }
0x3346   :  { %4181 = vmin.xlane.f32.xlu1 %v4180_v27  ;;  %v4185_v61 = vshll.u32 %v4184_v21, 16 }
0x3347   :  { %v4216_v2 = vpop.xlane.xlu0 %4215 }
0x334b   :  { %v4219_v37 = vpop.xlane.xlu0 %4218 }
0x334c   :  { %v4239_v19 = vsel %vm2216_vm13, %v4219_v37, -inf }
0x334f   :  { %v4222_v20 = vpop.xlane.xlu0 %4221 }
0x3350   :  { %v4240_v18 = vsel %vm2216_vm13, %v4222_v20, -inf }
0x3353   :  { %v4225_v31 = vpop.xlane.xlu0 %4224 }
0x3357   :  { %v4231_v32 = vpop.xlane.xlu0 %4230 }
0x335b   :  { %v4234_v48 = vpop.xlane.xlu0 %4233 }
0x335c   :  { %v4246_v62 = vsel %vm2216_vm13, %v4234_v48, -inf }
0x335d   :  { %v4247_v26 = vmax.f32 %v4240_v18, %v4246_v62 }
0x335f   :  { %v4237_v29 = vpop.xlane.xlu0 %4236 }
0x3360   :  { %v4248_v55 = vsel %vm2216_vm13, %v4237_v29, -inf }
0x33d3   :  { %v4182_v12 = vpop.xlane.xlu1 %4181 }
0x33d4   :  { %v4183_v22 = vcvt.f32.s32 %v4182_v12 }
0x33d6   :  { %v4186_v53 = vadd.s32 %v4185_v61, %v4183_v22 }
0x33d8   :  { %v4198_v46 = vsel %vm4197_vm12, %v5073_v8, %v4186_v53 }
0x33d9   :  { %4200 = vperm.xlu1 %6079, %v4198_v46  }
0x33fd   :  { %4227 = vadd.xlane.f32.xlu1 %v4226_v57 }
0x3458   :  { %v4201_v56 = vpop.permute.xlu1 %4200 }
0x3459   :  { %vm4202_vm14 = vcmp.eq.s32.totalorder %v6664_v15, %v4201_v56 }
0x345a   :  { %v5074_v36 = vsel %vm4202_vm14, 1.0, %v6487_v9 }
0x345b   :  { %5725 = vmatmul.mubr.msk.f32.vlgmr.msra.gmra.mrb[28].mxu1 %vm111_vm4, %v5074_v36 }
0x345c   :  { %6000 = vmatpush3.bf16.msra.mxu1 %v6950_v45  ;;  %5735 = vmatprep.mubr.msk.f32.mxu1 %vm6486_vm0, %v6487_v9 }
0x345d   :  { %6001 = vmatprep.subr.bf16.mxu1 %v6485_v1 }
0x3460   :  { %6003 = vmatpush3.bf16.msra.mxu1 %v6966_v38 }
0x3461   :  { %6022 = vmatprep.subr.bf16.mxu1 %v6485_v1 }
0x3463   :  { %5736 = vmatmul.mubr.msk.f32.vlgmr.msra.gmra.mrb[28].mxu1 %vm111_vm4, %v7513_v16  ;;  %v4238_v16 = vsel %vm2216_vm13, %v4216_v2, -inf }
0x3464   :  { %6024 = vmatpush3.bf16.msra.mxu1 %v7038_v44  ;;  %5779 = vmatprep.mubr.msk.f32.mxu1 %vm6486_vm0, %v6487_v9  ;;  %v4244_v44 = vsel %vm2216_vm13, %v4231_v32, -inf }
0x3465   :  { %6025 = vmatprep.subr.bf16.mxu1 %v6485_v1  ;;  %v4245_v14 = vmax.f32 %v4239_v19, %v4244_v44 }
0x3468   :  { %6027 = vmatpush3.bf16.msra.mxu1 %v7041_v50  ;;  %v4241_v50 = vsel %vm2216_vm13, %v4225_v31, -inf }
0x3469   :  { %v4249_v17 = vmax.f32 %v4241_v50, %v4248_v55 }
0x346b   :  { %v4251_v40 = vmax.f32 %v4247_v26, %v4249_v17 }
0x348a   :  { %v4228_v3 = vpop.xlane.xlu1 %4227 }
0x348b   :  { %v4242_v47 = vsel %vm2216_vm13, %v4228_v3, -inf }
0x348c   :  { %v4243_v58 = vmax.f32 %v4238_v16, %v4242_v47 }
0x348e   :  { %v4250_v42 = vmax.f32 %v4243_v58, %v4245_v14 }
0x3490   :  { %v4252_v59 = vmax.f32 %v4250_v42, %v4251_v40 }
0x3492   :  { %v4253_v13 = vsub.f32 %v4216_v2, %v4252_v59  ;;  %v4254_v60 = vsub.f32 %v4219_v37, %v4252_v59  ;;  %v4255_v51 = vsub.f32 %v4222_v20, %v4252_v59  ;;  %v4256_v5 = vsub.f32 %v4225_v31, %v4252_v59 }
0x3493   :  { %v4257_v27 = vsub.f32 %v4228_v3, %v4252_v59  ;;  %v4258_v28 = vsub.f32 %v4231_v32, %v4252_v59  ;;  %v4259_v8 = vsub.f32 %v4234_v48, %v4252_v59  ;;  %v4260_v56 = vsub.f32 %v4237_v29, %v4252_v59 }
0x3494   :  { %v4261_v39 = vmul.f32 1.442695, %v4253_v13  ;;  %v4263_v54 = vmul.f32 1.442695, %v4254_v60  ;;  %v4265_v6 = vmul.f32 1.442695, %v4255_v51 }
0x3495   :  { %v4267_v52 = vmul.f32 1.442695, %v4256_v5  ;;  %v4269_v12 = vmul.f32 1.442695, %v4257_v27  ;;  %v4271_v53 = vmul.f32 1.442695, %v4258_v28 }
0x3496   :  { %6274 = vpow2.f32 %v4261_v39  ;;  %v4273_v57 = vmul.f32 1.442695, %v4259_v8  ;;  %v4275_v20 = vmul.f32 1.442695, %v4260_v56 }
0x3497   :  { %6276 = vpow2.f32 %v4263_v54 }
0x3498   :  { %6278 = vpow2.f32 %v4265_v6 }
0x3499   :  { %6280 = vpow2.f32 %v4267_v52 }
0x349a   :  { %6282 = vpow2.f32 %v4269_v12 }
0x349b   :  { %6284 = vpow2.f32 %v4271_v53 }
0x349c   :  { %6286 = vpow2.f32 %v4273_v57 }
0x349d   :  { %6288 = vpow2.f32 %v4275_v20 }
0x34a0   :  { %v6275_v7 = vpop.eup %6274 }
0x34a1   :  { %v6277_v21 = vpop.eup %6276  ;;  %v4277_v61 = vsel %vm2216_vm13, %v6275_v7, 0.0 }
0x34a2   :  { %v4278_v22 = vsel %vm2216_vm13, %v6277_v21, 0.0  ;;  %v6279_v46 = vpop.eup %6278 }
0x34a3   :  { %v4279_v33 = vadd.f32 %v4278_v22, %v4277_v61  ;;  %v4280_v36 = vsel %vm2216_vm13, %v6279_v46, 0.0  ;;  %v6281_v2 = vpop.eup %6280 }
0x34a4   :  { %v4282_v31 = vsel %vm2216_vm13, %v6281_v2, 0.0  ;;  %v6283_v32 = vpop.eup %6282 }
0x34a5   :  { %v4281_v37 = vadd.f32 %v4280_v36, %v4279_v33  ;;  %v4284_v48 = vsel %vm2216_vm13, %v6283_v32, 0.0  ;;  %v6285_v47 = vpop.eup %6284 }
0x34a6   :  { %v4286_v44 = vsel %vm2216_vm13, %v6285_v47, 0.0  ;;  %v6287_v55 = vpop.eup %6286 }
0x34a7   :  { %v4283_v3 = vadd.f32 %v4282_v31, %v4281_v37  ;;  %v4288_v29 = vsel %vm2216_vm13, %v6287_v55, 0.0  ;;  %v6289_v19 = vpop.eup %6288 }
0x34a8   :  { %v4290_v62 = vsel %vm2216_vm13, %v6289_v19, 0.0 }
0x34a9   :  { %v4285_v16 = vadd.f32 %v4284_v48, %v4283_v3 }
0x34ab   :  { %v4287_v58 = vadd.f32 %v4286_v44, %v4285_v16 }
0x34ad   :  { %v4289_v50 = vadd.f32 %v4288_v29, %v4287_v58 }
0x34af   :  { %v4291_v14 = vadd.f32 %v4290_v62, %v4289_v50 }
0x34b1   :  { %6290 = vrcp.f32 %v4291_v14 }
0x34bb   :  { %v6291_v17 = vpop.eup %6290 }
0x34bc   :  { %v4293_v18 = vmul.f32 %v6291_v17, %v6275_v7  ;;  %v4294_v26 = vmul.f32 %v6291_v17, %v6277_v21  ;;  %v4295_v59 = vmul.f32 %v6291_v17, %v6279_v46  ;;  %v4296_v39 = vmul.f32 %v6291_v17, %v6281_v2 }
0x34bd   :  { %v4297_v5 = vmul.f32 %v6291_v17, %v6283_v32  ;;  %v4298_v7 = vmul.f32 %v6291_v17, %v6285_v47  ;;  %v4299_v28 = vmul.f32 %v6291_v17, %v6287_v55 }
0x34be   :  { %v4301_v42 = vmul.f32 %v7364_v10, %v4293_v18  ;;  %v4302_v40 = vmul.f32 %v7367_v63, %v4294_v26  ;;  %v4303_v54 = vmul.f32 %v7372_v49, %v4295_v59  ;;  %v4304_v6 = vmul.f32 %v7375_v11, %v4296_v39 }
0x34bf   :  { %v4305_v10 = vmul.f32 %v7379_v23, %v4297_v5  ;;  %v4306_v12 = vmul.f32 %v7383_v24, %v4298_v7  ;;  %v4300_v49 = vmul.f32 %v6291_v17, %v6289_v19  ;;  %v4307_v8 = vmul.f32 %v7387_v30, %v4299_v28  ;;  %v6349_v28 = vld [vmem:[#allocation2 + $0xe] sm:$0x3] }
0x34c0   :  { %v4309_v13 = vsel %vm2216_vm13, %v4301_v42, 0.0  ;;  %v4310_v60 = vsel %vm2216_vm13, %v4302_v40, 0.0  ;;  %v4312_v27 = vsel %vm2216_vm13, %v4303_v54, 0.0  ;;  %v4314_v63 = vsel %vm2216_vm13, %v4304_v6, 0.0  ;;  %v6344_v40 = vld [vmem:[#allocation2 + $0x2] sm:$0x3] }
0x34c1   :  { %v4311_v51 = vadd.f32 %v4310_v60, %v4309_v13  ;;  %v4316_v61 = vsel %vm2216_vm13, %v4305_v10, 0.0  ;;  %v4318_v11 = vsel %vm2216_vm13, %v4306_v12, 0.0  ;;  %v4308_v46 = vmul.f32 %v7391_v35, %v4300_v49  ;;  %v6345_v60 = vld [vmem:[#allocation2 + $0x4] sm:$0x3]  ;;  %v6348_v10 = vld [vmem:[#allocation2 + $0xc] sm:$0x3] }
0x34c2   :  { %v4320_v33 = vsel %vm2216_vm13, %v4307_v8, 0.0 }
0x34c3   :  { %v4313_v52 = vadd.f32 %v4312_v27, %v4311_v51  ;;  %v4322_v57 = vsel %vm2216_vm13, %v4308_v46, 0.0  ;;  %v6346_v51 = vld [vmem:[#allocation2 + $0x8] sm:$0x3]  ;;  %v6347_v27 = vld [vmem:[#allocation2 + $0xa] sm:$0x3] }
0x34c5   :  { %v4315_v21 = vadd.f32 %v4314_v63, %v4313_v52 }
0x34c7   :  { %v4317_v22 = vadd.f32 %v4316_v61, %v4315_v21 }
0x34c9   :  { %v4319_v53 = vadd.f32 %v4318_v11, %v4317_v22 }
0x34cb   :  { %v4321_v23 = vadd.f32 %v4320_v33, %v4319_v53  ;;  %v5079_v53 = vld [vmem:[%s7713_s0 + $0x6] sm:$0x1]  ;;  %s6490_s0 = smov [#allocation12]  }
0x34cc   :  { %vm4592_vm2 = vcmp.gt.s32.totalorder %v5079_v53, 0 }
0x34cd   :  { %v4323_v56 = vadd.f32 %v4322_v57, %v4321_v23  ;;  %v4595_v46 = vsel %vm4592_vm2, 1, %v6484_v0 }
0x34ce   :  { %v4599_v23 = vrot.slane %v4595_v46, %v7097_v43 }
0x34d0   :  { %vm4600_vm5 = vcmp.eq.s32.totalorder %v4599_v23, 1 }
0x3536   :  { %v4464_v36 = vpop.f32.mrb[28].mxu1 }
0x3537   :  { %v6034_v2 = vadd.f32 %v4464_v36, %v4323_v56  ;;  %v5737_v24 = vpop.f32.mrb[29].mxu1 }
0x3539   :  { %6292 = vtanh.f32 %v6034_v2  ;;  %v5077_v20 = vmul.f32 -1.442695, %v6034_v2  ;;  %v5080_v2 = vld [vmem:[%s7715_s2 + $0xc] sm:$0x3]  ;;  %s4978_s2 = sshll.u32 %s6490_s0, 4  ;;  %s4979_s2 = int_to_ptr.vmem [resolvable:$true] %s4978_s2 }
0x353a   :  { %p6453_p5 = scmp.lt.s32.totalorder %s4979_s2, %s4979_s2 }
0x353b   :  { %6294 = vpow2.f32 %v5077_v20  ;;  %v6350_v20 = vld [vmem:[#allocation2 + $0x6] sm:$0x3] }
0x3543   :  { %v6293_v37 = vpop.eup %6292 }
0x3544   :  { %4478 = vrot.lane.b32.xlu0 %v6293_v37, %s6488_s4 }
0x3545   :  { %v6295_v30 = vpop.eup %6294 }
0x3546   :  { %v4472_v31 = vadd.f32 1.0, %v6295_v30 }
0x3548   :  { %6296 = vrcp.f32 %v4472_v31 }
0x3552   :  { %v6297_v32 = vpop.eup %6296 }
0x3553   :  { %v4476_v48 = vmul.f32 %v6297_v32, %v7508_v41 }
0x35b6   :  { %v4479_v35 = vpop.permute.xlu0 %4478 }
0x35b7   :  { %v4481_v3 = vmul.f32 %v6297_v32, %v4479_v35 }
0x35b9   :  { %4483 = vrot.lane.b32.xlu0 %v4481_v3, %s6489_s11 }
0x362b   :  { %v4484_v47 = vpop.permute.xlu0 %4483 }
0x362c   :  { %v7611_v16 = vadd.f32 %v4484_v47, %v4476_v48 }
0x362e   :  { %6298 = vtanh.f32 %v7611_v16 }
0x3638   :  { %v6299_v44 = vpop.eup %6298 }
0x3639   :  { %4489 = vrot.lane.b32.xlu1 %v6299_v44, %s6488_s4 }
0x36ab   :  { %v4490_v55 = vpop.permute.xlu1 %4489 }
0x36ac   :  { %v4492_v58 = vmul.f32 %v6297_v32, %v4490_v55 }
0x36ae   :  { %4494 = vrot.lane.b32.xlu0 %v4492_v58, %s6489_s11 }
0x3720   :  { %v7616_v29 = vpop.permute.xlu0 %4494 }
0x3721   :  { %5747 = vmatmul.mubr.msk.f32.vlgmr.msra.gmra.mrb[26].mxu0 %vm111_vm4, %v7616_v29  ;;  %v4610_v59 = vmul.f32 %v6344_v40, %v7616_v29  ;;  %v4611_v39 = vmul.f32 %v6345_v60, %v7616_v29  ;;  %v4613_v5 = vmul.f32 %v6346_v51, %v7616_v29  ;;  %v4614_v52 = vmul.f32 %v6347_v27, %v7616_v29 }
0x3722   :  { %6012 = vmatpush3.bf16.msra.mxu0 %v6918_v25  ;;  %5757 = vmatprep.mubr.msk.f32.mxu0 %vm6486_vm0, %v6487_v9  ;;  %v4615_v63 = vmul.f32 %v6348_v10, %v7616_v29  ;;  %v4616_v12 = vmul.f32 %v6349_v28, %v7616_v29  ;;  %v4612_v30 = vmul.f32 %v6350_v20, %v7616_v29 }
0x3723   :  { %6013 = vmatprep.subr.bf16.mxu0 %v6485_v1  ;;  %v4620_v13 = vsel %vm287_vm3, %v4610_v59, 0.0  ;;  %v4623_v54 = vsel %vm287_vm3, %v4611_v39, 0.0  ;;  %v4629_v6 = vsel %vm287_vm3, %v4613_v5, 0.0  ;;  %v4632_v7 = vsel %vm287_vm3, %v4614_v52, 0.0 }
0x3724   :  { %v4635_v21 = vsel %vm287_vm3, %v4615_v63, 0.0  ;;  %v4638_v61 = vsel %vm287_vm3, %v4616_v12, 0.0  ;;  %v4626_v31 = vsel %vm287_vm3, %v4612_v30, 0.0 }
0x3726   :  { %6015 = vmatpush3.bf16.msra.mxu0 %v6935_v34  ;;  %v6343_v34 = vld [vmem:[#allocation2] sm:$0x3] }
0x3727   :  { %6016 = vmatprep.subr.bf16.mxu0 %v6485_v1  ;;  %v4609_v42 = vmul.f32 %v6343_v34, %v7616_v29 }
0x37f4   :  { %v4564_v41 = vpop.f32.mrb[26].mxu0 }
0x37f5   :  { %v4565_v19 = vadd.f32 %v7417_v4, %v4564_v41  ;;  %v5748_v50 = vpop.f32.mrb[27].mxu0  ;;  %v4617_v4 = vsel %vm287_vm3, %v4609_v42, 0.0 }
0x37f7   :  { %4569 = vst.msk [vmem:[#allocation12 + $0xc] sm:$0x3] %vm287_vm3, %v4565_v19  ;;  %v4570_v62 = vsel %vm287_vm3, %v4565_v19, -inf }
0x37f8   :  { %4571 = vmax.xlane.f32.xlu0 %v4570_v62 }
0x3885   :  { %v4572_v14 = vpop.xlane.xlu0 %4571 }
0x3886   :  { %vm4573_vm15 = vcmp.eq.f32.partialorder %v4565_v19, %v4572_v14 }
0x3887   :  { %v4574_v25 = vsel %vm4573_vm15, %v6664_v15, 32 }
0x3888   :  { %v4575_v17 = vsel %vm287_vm3, %v4574_v25, 2147483647 }
0x3889   :  { %v4577_v18 = vshra.s32 %v4575_v17, 16  ;;  %v4576_v22 = vand.u32 65535, %v4575_v17 }
0x388b   :  { %v4579_v26 = vcvt.s32.f32 %v4577_v18  ;;  %v4578_v8 = vcvt.s32.f32 %v4576_v22 }
0x388d   :  { %4580 = vmin.xlane.f32.xlu1 %v4579_v26 }
0x3891   :  { %4618 = vadd.xlane.f32.xlu1 %v4617_v4 }
0x3895   :  { %4621 = vadd.xlane.f32.xlu1 %v4620_v13 }
0x3899   :  { %4624 = vadd.xlane.f32.xlu1 %v4623_v54 }
0x389d   :  { %4630 = vadd.xlane.f32.xlu1 %v4629_v6 }
0x38a1   :  { %4633 = vadd.xlane.f32.xlu1 %v4632_v7 }
0x38a5   :  { %4636 = vadd.xlane.f32.xlu1 %v4635_v21 }
0x38a9   :  { %4639 = vadd.xlane.f32.xlu1 %v4638_v61 }
0x391a   :  { %v4581_v49 = vpop.xlane.xlu1 %4580 }
0x391b   :  { %vm4582_vm1 = vcmp.eq.f32.partialorder %v4579_v26, %v4581_v49  ;;  %v4587_v33 = vcvt.f32.s32 %v4581_v49 }
0x391c   :  { %v4583_v11 = vsel %vm4582_vm1, %v4578_v8, inf }
0x391d   :  { %4584 = vmin.xlane.f32.xlu0 %v4583_v11  ;;  %v4588_v56 = vshll.u32 %v4587_v33, 16 }
0x391e   :  { %v4619_v32 = vpop.xlane.xlu1 %4618 }
0x391f   :  { %v4641_v14 = vsel %vm2216_vm13, %v4619_v32, -inf }
0x3922   :  { %v4622_v35 = vpop.xlane.xlu1 %4621 }
0x3923   :  { %v4642_v41 = vsel %vm2216_vm13, %v4622_v35, -inf }
0x3926   :  { %v4625_v3 = vpop.xlane.xlu1 %4624 }
0x39aa   :  { %v4585_v57 = vpop.xlane.xlu0 %4584 }
0x39ab   :  { %v4586_v36 = vcvt.f32.s32 %v4585_v57 }
0x39ad   :  { %v4589_v24 = vadd.s32 %v4588_v56, %v4586_v36 }
0x39af   :  { %v4601_v37 = vsel %vm4600_vm5, %v5080_v2, %v4589_v24 }
0x39b0   :  { %4603 = vperm.xlu0 %6078, %v4601_v37  }
0x39cf   :  { %4627 = vadd.xlane.f32.xlu0 %v4626_v31 }
0x3a2f   :  { %v4604_v0 = vpop.permute.xlu0 %4603 }
0x3a30   :  { %vm4605_vm6 = vcmp.eq.s32.totalorder %v6664_v15, %v4604_v0  ;;  %v4631_v15 = vpop.xlane.xlu1 %4630 }
0x3a31   :  { %v5081_v43 = vsel %vm4605_vm6, 1.0, %v6487_v9  ;;  %v4645_v19 = vsel %vm2216_vm13, %v4631_v15, -inf }
0x3a32   :  { %5758 = vmatmul.mubr.msk.f32.vlgmr.msra.gmra.mrb[28].mxu0 %vm111_vm4, %v5081_v43  ;;  %v4646_v25 = vmax.f32 %v4641_v14, %v4645_v19 }
0x3a33   :  { %6018 = vmatpush3.bf16.msra.mxu0 %v6950_v45  ;;  %5768 = vmatprep.mubr.msk.f32.mxu0 %vm6486_vm0, %v6487_v9 }
0x3a34   :  { %6019 = vmatprep.subr.bf16.mxu0 %v6485_v1  ;;  %v4634_v48 = vpop.xlane.xlu1 %4633 }
0x3a35   :  { %v4647_v58 = vsel %vm2216_vm13, %v4634_v48, -inf }
0x3a36   :  { %v4648_v50 = vmax.f32 %v4642_v41, %v4647_v58 }
0x3a37   :  { %6021 = vmatpush3.bf16.msra.mxu0 %v6966_v38 }
0x3a38   :  { %v4637_v47 = vpop.xlane.xlu1 %4636  ;;  %v4653_v18 = vmax.f32 %v4646_v25, %v4648_v50  ;;  %v6355_v25 = vld [vmem:[#allocation3 + $0x8] sm:$0x3] }
0x3a39   :  { %v4649_v9 = vsel %vm2216_vm13, %v4637_v47, -inf }
0x3a3a   :  { %5769 = vmatmul.mubr.msk.f32.vlgmr.msra.gmra.mrb[28].mxu0 %vm111_vm4, %v7616_v29  ;;  %v4643_v29 = vsel %vm2216_vm13, %v4625_v3, -inf }
0x3a3b   :  { %v4650_v62 = vmax.f32 %v4643_v29, %v4649_v9  ;;  %v6353_v9 = vld [vmem:[#allocation3 + $0x4] sm:$0x3]  ;;  %v6354_v29 = vld [vmem:[#allocation3 + $0x6] sm:$0x3] }
0x3a3c   :  { %v4640_v55 = vpop.xlane.xlu1 %4639 }
0x3a3d   :  { %v4651_v1 = vsel %vm2216_vm13, %v4640_v55, -inf }
0x3a5c   :  { %v4628_v44 = vpop.xlane.xlu0 %4627 }
0x3a5d   :  { %v4644_v45 = vsel %vm2216_vm13, %v4628_v44, -inf }
0x3a5e   :  { %v4652_v38 = vmax.f32 %v4644_v45, %v4651_v1 }
0x3a60   :  { %v4654_v17 = vmax.f32 %v4650_v62, %v4652_v38 }
0x3a62   :  { %v4655_v26 = vmax.f32 %v4653_v18, %v4654_v17 }
0x3a64   :  { %v4656_v34 = vsub.f32 %v4619_v32, %v4655_v26  ;;  %v4657_v42 = vsub.f32 %v4622_v35, %v4655_v26  ;;  %v4658_v59 = vsub.f32 %v4625_v3, %v4655_v26  ;;  %v4659_v13 = vsub.f32 %v4628_v44, %v4655_v26  ;;  %v6351_v3 = vld [vmem:[#allocation3] sm:$0x3] }
0x3a65   :  { %v4660_v39 = vsub.f32 %v4631_v15, %v4655_v26  ;;  %v4661_v6 = vsub.f32 %v4634_v48, %v4655_v26  ;;  %v4662_v10 = vsub.f32 %v4637_v47, %v4655_v26  ;;  %v4663_v12 = vsub.f32 %v4640_v55, %v4655_v26  ;;  %v6352_v48 = vld [vmem:[#allocation3 + $0x2] sm:$0x3] }
0x3a66   :  { %v4664_v4 = vmul.f32 1.442695, %v4656_v34  ;;  %v4666_v40 = vmul.f32 1.442695, %v4657_v42  ;;  %v4668_v60 = vmul.f32 1.442695, %v4658_v59 }
0x3a67   :  { %v4670_v54 = vmul.f32 1.442695, %v4659_v13  ;;  %v4672_v27 = vmul.f32 1.442695, %v4660_v39  ;;  %v4674_v63 = vmul.f32 1.442695, %v4661_v6 }
0x3a68   :  { %6300 = vpow2.f32 %v4664_v4  ;;  %v4676_v61 = vmul.f32 1.442695, %v4662_v10  ;;  %v4678_v11 = vmul.f32 1.442695, %v4663_v12  ;;  %v6356_v42 = vld [vmem:[#allocation3 + $0xa] sm:$0x3] }
0x3a69   :  { %6302 = vpow2.f32 %v4666_v40 }
0x3a6a   :  { %6304 = vpow2.f32 %v4668_v60  ;;  %v6357_v60 = vld [vmem:[#allocation3 + $0xc] sm:$0x3] }
0x3a6b   :  { %6306 = vpow2.f32 %v4670_v54 }
0x3a6c   :  { %6308 = vpow2.f32 %v4672_v27 }
0x3a6d   :  { %6310 = vpow2.f32 %v4674_v63 }
0x3a6e   :  { %6312 = vpow2.f32 %v4676_v61 }
0x3a6f   :  { %6314 = vpow2.f32 %v4678_v11 }
0x3a72   :  { %v6301_v51 = vpop.eup %6300 }
0x3a73   :  { %v6303_v5 = vpop.eup %6302  ;;  %v4680_v52 = vsel %vm2216_vm13, %v6301_v51, 0.0 }
0x3a74   :  { %v4681_v7 = vsel %vm2216_vm13, %v6303_v5, 0.0  ;;  %v6305_v21 = vpop.eup %6304 }
0x3a75   :  { %v4682_v28 = vadd.f32 %v4681_v7, %v4680_v52  ;;  %v4683_v22 = vsel %vm2216_vm13, %v6305_v21, 0.0  ;;  %v6307_v49 = vpop.eup %6306 }
0x3a76   :  { %v4685_v53 = vsel %vm2216_vm13, %v6307_v49, 0.0  ;;  %v6309_v46 = vpop.eup %6308 }
0x3a77   :  { %v4684_v8 = vadd.f32 %v4683_v22, %v4682_v28  ;;  %v4687_v23 = vsel %vm2216_vm13, %v6309_v46, 0.0  ;;  %v6311_v57 = vpop.eup %6310 }
0x3a78   :  { %v4689_v36 = vsel %vm2216_vm13, %v6311_v57, 0.0  ;;  %v6313_v2 = vpop.eup %6312 }
0x3a79   :  { %v4686_v33 = vadd.f32 %v4685_v53, %v4684_v8  ;;  %v4691_v37 = vsel %vm2216_vm13, %v6313_v2, 0.0  ;;  %v6315_v20 = vpop.eup %6314 }
0x3a7a   :  { %v4693_v31 = vsel %vm2216_vm13, %v6315_v20, 0.0 }
0x3a7b   :  { %v4688_v56 = vadd.f32 %v4687_v23, %v4686_v33 }
0x3a7d   :  { %v4690_v24 = vadd.f32 %v4689_v36, %v4688_v56 }
0x3a7f   :  { %v4692_v30 = vadd.f32 %v4691_v37, %v4690_v24 }
0x3a81   :  { %v4694_v0 = vadd.f32 %v4693_v31, %v4692_v30 }
0x3a83   :  { %6316 = vrcp.f32 %v4694_v0 }
0x3a8d   :  { %v6317_v43 = vpop.eup %6316 }
0x3a8e   :  { %v4696_v32 = vmul.f32 %v6317_v43, %v6301_v51  ;;  %v4697_v35 = vmul.f32 %v6317_v43, %v6303_v5  ;;  %v4698_v44 = vmul.f32 %v6317_v43, %v6305_v21  ;;  %v4699_v58 = vmul.f32 %v6317_v43, %v6307_v49  ;;  %v6358_v5 = vld [vmem:[#allocation3 + $0xe] sm:$0x3] }
0x3a8f   :  { %v4700_v41 = vmul.f32 %v6317_v43, %v6309_v46  ;;  %v4701_v14 = vmul.f32 %v6317_v43, %v6311_v57  ;;  %v4702_v34 = vmul.f32 %v6317_v43, %v6313_v2  ;;  %v4703_v13 = vmul.f32 %v6317_v43, %v6315_v20 }
0x3a90   :  { %v4704_v15 = vmul.f32 %v6351_v3, %v4696_v32  ;;  %v4705_v47 = vmul.f32 %v6352_v48, %v4697_v35  ;;  %v4706_v1 = vmul.f32 %v6353_v9, %v4698_v44  ;;  %v4707_v19 = vmul.f32 %v6354_v29, %v4699_v58 }
0x3a91   :  { %v4708_v17 = vmul.f32 %v6355_v25, %v4700_v41  ;;  %v4709_v4 = vmul.f32 %v6356_v42, %v4701_v14  ;;  %v4710_v39 = vmul.f32 %v6357_v60, %v4702_v34  ;;  %v4711_v6 = vmul.f32 %v6358_v5, %v4703_v13 }
0x3a92   :  { %v4712_v55 = vsel %vm2216_vm13, %v4704_v15, 0.0  ;;  %v4713_v45 = vsel %vm2216_vm13, %v4705_v47, 0.0  ;;  %v4715_v50 = vsel %vm2216_vm13, %v4706_v1, 0.0  ;;  %v4717_v18 = vsel %vm2216_vm13, %v4707_v19, 0.0 }
0x3a93   :  { %v4714_v38 = vadd.f32 %v4713_v45, %v4712_v55  ;;  %v4719_v40 = vsel %vm2216_vm13, %v4708_v17, 0.0  ;;  %v4721_v54 = vsel %vm2216_vm13, %v4709_v4, 0.0  ;;  %v4723_v27 = vsel %vm2216_vm13, %v4710_v39, 0.0 }
0x3a94   :  { %v4725_v7 = vsel %vm2216_vm13, %v4711_v6, 0.0 }
0x3a95   :  { %v4716_v62 = vadd.f32 %v4715_v50, %v4714_v38 }
0x3a97   :  { %v4718_v26 = vadd.f32 %v4717_v18, %v4716_v62 }
0x3a99   :  { %v4720_v59 = vadd.f32 %v4719_v40, %v4718_v26 }
0x3a9b   :  { %v4722_v51 = vadd.f32 %v4721_v54, %v4720_v59 }
0x3a9d   :  { %v4724_v52 = vadd.f32 %v4723_v27, %v4722_v51 }
0x3a9f   :  { %v4726_v10 = vadd.f32 %v4725_v7, %v4724_v52 }
0x3b0d   :  { %v4867_v63 = vpop.f32.mrb[28].mxu0 }
0x3b0e   :  { %v6035_v21 = vadd.f32 %v4867_v63, %v4726_v10  ;;  %v5770_v28 = vpop.f32.mrb[29].mxu0 }
0x3b10   :  { %6318 = vtanh.f32 %v6035_v21  ;;  %v5084_v61 = vmul.f32 -1.442695, %v6035_v21 }
0x3b12   :  { %6320 = vpow2.f32 %v5084_v61 }
0x3b1a   :  { %v6319_v12 = vpop.eup %6318 }
0x3b1b   :  { %4881 = vrot.lane.b32.xlu1 %v6319_v12, %s6488_s4 }
0x3b1c   :  { %v6321_v22 = vpop.eup %6320 }
0x3b1d   :  { %v4875_v49 = vadd.f32 1.0, %v6321_v22 }
0x3b1f   :  { %6322 = vrcp.f32 %v4875_v49 }
0x3b29   :  { %v6323_v8 = vpop.eup %6322 }
0x3b2a   :  { %v4879_v46 = vmul.f32 %v6323_v8, %v7611_v16  ;;  %v6359_v16 = vld [vmem:[%s7722_s9] ss:$0 sm:$0xff] }
0x3b8d   :  { %v4882_v11 = vpop.permute.xlu1 %4881 }
0x3b8e   :  { %v4884_v53 = vmul.f32 %v6323_v8, %v4882_v11 }
0x3b90   :  { %4886 = vrot.lane.b32.xlu0 %v4884_v53, %s6489_s11 }
0x3c02   :  { %v4887_v33 = vpop.permute.xlu0 %4886 }
0x3c03   :  { %v4889_v23 = vadd.f32 %v4887_v33, %v4879_v46 }
0x3c05   :  { %6324 = vtanh.f32 %v4889_v23 }
0x3c0f   :  { %v6325_v57 = vpop.eup %6324 }
0x3c10   :  { %4892 = vrot.lane.b32.xlu1 %v6325_v57, %s6488_s4  ;;  %s6448_s4 = scalar_lea.vmem %s4979_s2, 256 }
0x3c11   :  { %p6449_p4 = scmp.ne.s32.totalorder %s4979_s2, %s6448_s4  ;;  %p6454_p6 = scmp.lt.s32.totalorder %s6448_s4, %s6448_s4 }
0x3c13   :  { %p6455_p7 = por %p6454_p6, %p6453_p5 }
0x3c15   :  { %p6456_p8 = pnand %p6455_p7, %p6449_p4 }
0x3c82   :  { %v4893_v56 = vpop.permute.xlu1 %4892 }
0x3c83   :  { %v4895_v36 = vmul.f32 %v6323_v8, %v4893_v56 }
0x3c85   :  { %4897 = vrot.lane.b32.xlu1 %v4895_v36, %s6489_s11 }
0x3cf7   :  { %v4898_v2 = vpop.permute.xlu1 %4897 }
0x3cf8   :  { %5780 = vmatmul.mubr.msk.f32.vlgmr.msra.gmra.mrb[30].mxu1 %vm111_vm4, %v4898_v2 }
0x3dcb   :  { %v4967_v24 = vpop.f32.mrb[30].mxu1 }
0x3dcc   :  { %v4968_v37 = vadd.f32 %v6359_v16, %v4967_v24  ;;  %v5781_v20 = vpop.f32.mrb[31].mxu1 }
0x3dce   :  { %4972 = vst.msk [vmem:[#allocation12 + $0xe] sm:$0x3] %vm287_vm3, %v4968_v37 }
0x3dcf   :  { %6459 = shalt.err (!%p6456_p8)
}
0x3dd0   :  { %s6460_s18 = scalar_lea.hbm %s7723_s10, 256 }
0x3dd1   :  { %p6461_p9 = scmp.ne.s32.totalorder %s7723_s10, %s6460_s18  ;;  %p6464_p10 = scmp.lt.u32.totalorder %s6460_s18, %s7723_s10 }
0x3dd3   :  { %p6466_p11 = pnand %p6464_p10, %p6461_p9 }
0x3dd5   :  { %6469 = shalt.err (!%p6466_p11)
}
0x3dd6   :  { %s6491_s21 = smov 2  }
0x3dd7   :  { %4984 = dma.vmem_to_hbm [thread:$0]  %s4979_s2, 256, %s7723_s10, [#allocation6], %s6489_s11, %s6489_s11, %s6491_s21  }
0x3dd8   :  { %6476 = dma.done.wait [#allocation6], 256  }
0x3dd9   :  { %6477 = vsyncadd [#allocation6], 4294967040 }
0x3dda   :  { %4988 = vsyncpa [#allocation5], 1 }
0x3ddb   :  { %4989 = vsyncpa [#allocation8], 1 }
0x3ddc   :  { %4990 = vsyncpa [#allocation11], 1 }
0x3ddd   :  { %4991 = vsyncpa [#allocation6], 1 }

</bundles_post_ra>
